<compile_context>
chip_gen: v6e
topology: v6e:2x2x1
jax: 0.10.0
libtpu: 0.0.40
codegen_flags: <defaults>
</compile_context>

<pallas_src>
import jax
import jax.numpy as jnp
from jax.experimental import pallas as pl
from jax.experimental.pallas import tpu as pltpu

LOG_COV_MAX = 2.0
LOG_COV_MIN = -5.0
BN_EPS = 1e-5

# ---- model dims (small, consistent with the module) ----
BATCH = 2
IN_CH, IN_H = 3, 16                  # maze_dims = (3, 16, 16)
A = 16                               # action_proc_dim
Z = 32                               # z_dim
PPG = 32                             # pre_post_gru_dim
ENC1_CH = 8                          # conv1: 3 -> 8
X_ENC_CH, X_ENC_H = 16, 4            # conv2: 8 -> 16, spatial 16 -> 8 -> 4
FLAT = X_ENC_CH * X_ENC_H * X_ENC_H  # 256
DEC_CH = 8                           # decoder intermediate channels
NPIX = X_ENC_H * X_ENC_H             # 16 coarse 4x4 pixels
ROWS = NPIX * BATCH                  # 32 pixel-batch rows (encoder/decoder)

WDTYPE = jnp.bfloat16

_VMEM = pl.BlockSpec(memory_space=pltpu.MemorySpace.VMEM)


# --------------------------- slab layout (static) -----------------------------

def _layout(entries, align=128):
    offs, cur = {}, 0
    for name, width in entries:
        offs[name] = cur
        cur += -(-width // align) * align
    return offs, cur


# Vector slab (f32): every bias / BN gamma / BN beta, 128-lane aligned.
_VEC_ENTRIES = (
    ('b_act', 4 * A),
    ('att_g', Z), ('att_b', Z), ('att_b2', Z),
    ('ppr_g', FLAT), ('ppr_b', FLAT),
    ('pg_b', 4 * Z),                       # GRU biases packed [rz(2Z) | ih_n | hh_n]
    ('plc_g', Z), ('plc_b', Z), ('plc_b2', Z),
    ('enc_g1', 4 * ENC1_CH), ('enc_b1', 4 * ENC1_CH),   # tiled over 4 col blocks
    ('enc_g2', X_ENC_CH), ('enc_b2', X_ENC_CH),
    ('ppo_g', PPG), ('ppo_b', PPG),
    ('qg_b', 4 * Z),
    ('qlc_g', Z), ('qlc_b', Z), ('qlc_b2', Z),
    ('rfc_g', FLAT), ('rfc_b', FLAT),
    ('up1_bias', 4 * DEC_CH), ('up1_g', 4 * DEC_CH), ('up1_b', 4 * DEC_CH),
    ('up2_bias', 16 * DEC_CH), ('up2_g', 16 * DEC_CH), ('up2_b', 16 * DEC_CH),
    ('rc_b', 16 * 8),                      # [mean(3)|log_cov(3)|pad(2)] x 16
)
VEC_OFF, VEC_W = _layout(_VEC_ENTRIES)
VEC_DIMS = dict(_VEC_ENTRIES)

# K = 16 weight slab (bf16).
_WA_ENTRIES = (('att_w1a', Z), ('ppr_wa', FLAT), ('ppo_wa', PPG), ('up1_w', 4 * DEC_CH))
WA_OFF, WA_W = _layout(_WA_ENTRIES)
WA_DIMS = dict(_WA_ENTRIES)

# K = 32 weight slab (bf16).
_WZ_ENTRIES = (
    ('att_w1z', Z), ('att_w2', Z), ('ppr_wz', FLAT), ('pg_whh', 3 * Z),
    ('plc_w2', Z), ('qg_wih', 3 * Z), ('qg_whh', 3 * Z),
    ('qlc_w1h', Z), ('qlc_w1z', Z), ('qlc_w2', Z),
    ('rfc_w', FLAT), ('enc_w2', X_ENC_CH), ('up2_w', 16 * DEC_CH),
)
WZ_OFF, WZ_W = _layout(_WZ_ENTRIES)
WZ_DIMS = dict(_WZ_ENTRIES)

# K = 256 weight slab (bf16).
_WF_ENTRIES = (('pg_wih', 3 * Z), ('plc_w1', Z), ('ppo_wx', PPG))
WF_OFF, WF_W = _layout(_WF_ENTRIES)
WF_DIMS = dict(_WF_ENTRIES)

# Misc slab (bf16, row-stacked, width 128): w_act (4,64), enc_w1 block-diag
# (48,32), rc 1x1-conv block-diag (128,128).  Row offsets 16-sublane aligned.
_M_WACT_R0, _M_ENC1_R0, _M_RC_R0, MISC_ROWS = 0, 16, 64, 192


def _slab_get(ref, offs, dims, name):
    o = offs[name]
    return ref[:, o:o + dims[name]]


# --------------------------- in-kernel helpers -------------------------------

def _dot(a, w):
    # bf16 MXU matmul with f32 accumulation (w already bf16 for weight slabs).
    return jnp.dot(a.astype(w.dtype), w, preferred_element_type=jnp.float32)


def _bn_relu(y, g, b):
    # training-mode batch statistics over axis 0, biased variance (PyTorch).
    mu = jnp.mean(y, axis=0, keepdims=True)
    var = jnp.mean(jnp.square(y - mu), axis=0, keepdims=True)
    return jnp.maximum((y - mu) * jax.lax.rsqrt(var + BN_EPS) * g + b, 0.0)


def _bn_relu_grouped(y, g_t, b_t, nblocks):
    # BN2d over a stacked-column layout: columns are `nblocks` copies of the
    # channel axis (width = nblocks * gw).  Per-channel statistics over
    # (rows x blocks) are folded + re-tiled with one small averaging matmul
    # (MXU) instead of per-block slice loops.
    w = y.shape[1]
    gw = w // nblocks
    ri = jax.lax.broadcasted_iota(jnp.int32, (w, w), 0)
    ci = jax.lax.broadcasted_iota(jnp.int32, (w, w), 1)
    m = jnp.where((ri % gw) == (ci % gw), 1.0 / nblocks, 0.0).astype(jnp.float32)
    colmean = jnp.mean(y, axis=0, keepdims=True)
    colex2 = jnp.mean(jnp.square(y), axis=0, keepdims=True)
    mu = jnp.dot(colmean, m, preferred_element_type=jnp.float32)
    ex2 = jnp.dot(colex2, m, preferred_element_type=jnp.float32)
    var = jnp.maximum(ex2 - jnp.square(mu), 0.0)
    return jnp.maximum((y - mu) * jax.lax.rsqrt(var + BN_EPS) * g_t + b_t, 0.0)


def _gru(x, h, wih, whh, bvec):
    # PyTorch nn.GRUCell, gate order [r | z | n].  One fused sigmoid over the
    # 2Z-wide [r|z] slice; r/z biases pre-folded (bih+bhh) at build time.
    zd = h.shape[1]
    gi = _dot(x, wih)                                    # (N, 3Z)
    gh = _dot(h, whh)
    b_rz = bvec[:, 0:2 * zd]
    b_in = bvec[:, 2 * zd:3 * zd]
    b_hn = bvec[:, 3 * zd:4 * zd]
    rz = jax.nn.sigmoid(gi[:, 0:2 * zd] + gh[:, 0:2 * zd] + b_rz)
    r = rz[:, 0:zd]
    zg = rz[:, zd:2 * zd]
    n = jnp.tanh(gi[:, 2 * zd:3 * zd] + b_in + r * (gh[:, 2 * zd:3 * zd] + b_hn))
    return (1.0 - zg) * n + zg * h


# ------------------------------ fused kernel ---------------------------------

def _vrnn_kernel(act_ref, prev_z_ref, eps_ref, p1_ref,
                 vec_ref, wa_ref, wz_ref, wf_ref, misc_ref,
                 lat_ref, rec_ref):
    vec = lambda n: _slab_get(vec_ref, VEC_OFF, VEC_DIMS, n)
    wAs = lambda n: _slab_get(wa_ref, WA_OFF, WA_DIMS, n)
    wZs = lambda n: _slab_get(wz_ref, WZ_OFF, WZ_DIMS, n)
    wFs = lambda n: _slab_get(wf_ref, WF_OFF, WF_DIMS, n)

    act = act_ref[...]
    prev_z = prev_z_ref[...]
    eps = eps_ref[...]

    # ---- action processing: 4 FCs in one matmul [prior | post | recon | mask]
    w_act = misc_ref[_M_WACT_R0:_M_WACT_R0 + 4, 0:4 * A]
    acts = _dot(act, w_act) + vec('b_act')                       # (N, 4A)
    prior_act = acts[:, 0:A]
    post_act = acts[:, A:2 * A]
    # acts[:, 2A:3A] == recon_act: computed (free) but unused, as in reference.
    mask_act = acts[:, 3 * A:4 * A]

    # ---- attention mask over prev_z ----
    y = _dot(prev_z, wZs('att_w1z')) + _dot(mask_act, wAs('att_w1a'))
    y = _bn_relu(y, vec('att_g'), vec('att_b'))
    mask = jax.nn.sigmoid(_dot(y, wZs('att_w2')) + vec('att_b2'))

    # ---- prior branch ----
    h_prior = _dot(prev_z * mask, wZs('ppr_wz')) + _dot(prior_act, wAs('ppr_wa'))
    h_prior = _bn_relu(h_prior, vec('ppr_g'), vec('ppr_b'))      # (N, FLAT)
    prior_mean = _gru(h_prior, prev_z, wFs('pg_wih'), wZs('pg_whh'), vec('pg_b'))
    y = _bn_relu(_dot(h_prior, wFs('plc_w1')), vec('plc_g'), vec('plc_b'))
    prior_log_cov = jnp.clip(_dot(y, wZs('plc_w2')) + vec('plc_b2'),
                             LOG_COV_MIN, LOG_COV_MAX)

    # ---- image encoder: conv1 (block-diag, stacked cols) + conv2 (one matmul)
    # p1 rows = (4x4 pixel s, batch n); cols = (d1i,d1j block q, u, v, c_in).
    enc_w1 = misc_ref[_M_ENC1_R0:_M_ENC1_R0 + 4 * 4 * IN_CH, 0:4 * ENC1_CH]
    y1 = _dot(p1_ref[...], enc_w1)                               # (32, 32) = (row, (q,c1))
    y1 = _bn_relu_grouped(y1, vec('enc_g1'), vec('enc_b1'), 4)
    y2 = _bn_relu(_dot(y1, wZs('enc_w2')), vec('enc_g2'), vec('enc_b2'))  # (32, 16)

    # ---- posterior pre-GRU fc: x_enc @ W as 16 selector + block matmuls ----
    # selT_s (2,32) picks y2 rows {2s, 2s+1} -> batch rows; pure MXU, no stores.
    rT = jax.lax.broadcasted_iota(jnp.int32, (BATCH, ROWS), 0)
    cT = jax.lax.broadcasted_iota(jnp.int32, (BATCH, ROWS), 1)
    selT_base = cT - rT
    hp = _dot(post_act, wAs('ppo_wa'))
    ppo_o = WF_OFF['ppo_wx']
    for s in range(NPIX):
        selT = (selT_base == 2 * s).astype(jnp.float32)          # (2, 32)
        ys = jnp.dot(selT, y2, preferred_element_type=jnp.float32)   # (2, 16)
        hp = hp + _dot(ys, wf_ref[s * X_ENC_CH:(s + 1) * X_ENC_CH,
                                  ppo_o:ppo_o + PPG])
    h_post = _bn_relu(hp, vec('ppo_g'), vec('ppo_b'))            # (N, PPG)

    post_mean = _gru(h_post, prev_z, wZs('qg_wih'), wZs('qg_whh'), vec('qg_b'))
    y = _dot(h_post, wZs('qlc_w1h')) + _dot(prev_z, wZs('qlc_w1z'))
    y = _bn_relu(y, vec('qlc_g'), vec('qlc_b'))
    post_log_cov = jnp.clip(_dot(y, wZs('qlc_w2')) + vec('qlc_b2'),
                            LOG_COV_MIN, LOG_COV_MAX)

    # ---- reparameterized sample (eps supplied deterministically from outside)
    post_z = post_mean + eps * jnp.exp(0.5 * post_log_cov)

    # ---- merged lane-packed latent output (one output array / one DMA) ----
    lat_ref[:, 0 * Z:1 * Z] = prior_mean
    lat_ref[:, 1 * Z:2 * Z] = prior_log_cov
    lat_ref[:, 2 * Z:3 * Z] = post_mean
    lat_ref[:, 3 * Z:4 * Z] = post_log_cov
    lat_ref[:, 4 * Z:5 * Z] = post_z

    # ---- reconstruction decoder: pixel rows (s0, n), stacked column blocks ---
    h = _bn_relu(_dot(post_z, wZs('rfc_w')), vec('rfc_g'), vec('rfc_b'))  # (N, FLAT)
    # (N, FLAT) -> (32, 16) pixel rows via 16 selection matmuls (no stores).
    rD = jax.lax.broadcasted_iota(jnp.int32, (ROWS, BATCH), 0)
    nD = jax.lax.broadcasted_iota(jnp.int32, (ROWS, BATCH), 1)
    sel_base = rD - nD
    d0 = jnp.zeros((ROWS, X_ENC_CH), jnp.float32)
    for s in range(NPIX):
        sel = (sel_base == 2 * s).astype(jnp.float32)            # (32, 2)
        d0 = d0 + jnp.dot(sel, h[:, s * X_ENC_CH:(s + 1) * X_ENC_CH],
                          preferred_element_type=jnp.float32)

    # upconv1 (k=2,s=2): per-pixel 16 -> (4 positions x 8 ch) stacked columns.
    t1 = _dot(d0, wAs('up1_w')) + vec('up1_bias')                # (32, 32)
    u1 = _bn_relu_grouped(t1, vec('up1_g'), vec('up1_b'), 4)
    # upconv2 (k=2,s=2): block-diag-replicated weight keeps stacked layout.
    t2 = _dot(u1, wZs('up2_w')) + vec('up2_bias')                # (32, 128)
    u2 = _bn_relu_grouped(t2, vec('up2_g'), vec('up2_b'), 16)
    # fused 1x1 recon convs (block-diag-replicated, 6 real + 2 pad channels).
    rc_w = misc_ref[_M_RC_R0:_M_RC_R0 + 16 * DEC_CH, 0:128]
    rc = _dot(u2, rc_w) + vec('rc_b')                            # (32, 128)
    ch = jax.lax.broadcasted_iota(jnp.int32, rc.shape, 1) % 8
    rec_ref[...] = jnp.where(ch < 3, jax.nn.sigmoid(rc),
                             jnp.clip(rc, LOG_COV_MIN, LOG_COV_MAX))


# --------------------------- wrapper (layout glue) ----------------------------

def _obs_to_patches(obs_nchw):
    """(N, C, 16, 16) -> (32, 48) im2col: rows=(4x4 pixel, n), cols=(q,u,v,c)."""
    n = obs_nchw.shape[0]
    x = jnp.transpose(obs_nchw, (0, 2, 3, 1))                    # NHWC
    x = x.reshape(n, 4, 2, 2, 4, 2, 2, IN_CH)                    # n,i2,d1i,u,j2,d1j,v,c
    x = jnp.transpose(x, (1, 4, 0, 2, 5, 3, 6, 7))               # i2,j2,n,d1i,d1j,u,v,c
    return x.reshape(NPIX * n, 4 * 2 * 2 * IN_CH)


def _assemble_images(rec):
    """(32, 128) rows=(i0,j0,n), cols=(d1i,d1j,d2i,d2j,ch8) -> two (N,3,16,16)."""
    x = rec.reshape(X_ENC_H, X_ENC_H, BATCH, 2, 2, 2, 2, 8)
    x = jnp.transpose(x, (2, 7, 0, 3, 5, 1, 4, 6))               # n,ch,i0,d1i,d2i,j0,d1j,d2j
    img = x.reshape(BATCH, 8, IN_H, IN_H)
    return img[:, 0:3], img[:, 3:6]


def vrnn_forward(params, obs_batch_nchw, act_batch, prev_z, eps):
    p1 = _obs_to_patches(obs_batch_nchw)

    lat, rec = pl.pallas_call(
        _vrnn_kernel,
        out_shape=(
            jax.ShapeDtypeStruct((BATCH, 5 * Z), jnp.float32),   # packed latents
            jax.ShapeDtypeStruct((ROWS, 128), jnp.float32),      # packed recon pixels
        ),
        in_specs=[_VMEM] * 9,
        out_specs=(_VMEM, _VMEM),
    )(act_batch, prev_z, eps, p1,
      params['vec'], params['wa'], params['wz'], params['wf'], params['misc'])

    prior_mean = lat[:, 0 * Z:1 * Z]
    prior_log_cov = lat[:, 1 * Z:2 * Z]
    post_mean = lat[:, 2 * Z:3 * Z]
    post_log_cov = lat[:, 3 * Z:4 * Z]
    post_z_sample = lat[:, 4 * Z:5 * Z]
    recon_mean, recon_log_cov = _assemble_images(rec)
    return (prior_mean, prior_log_cov, post_mean, post_log_cov,
            recon_mean, recon_log_cov, post_z_sample)


# --------------------------- parameters --------------------------------------

def build_params(key):
    counter = [0]

    def nrm(shape, scale=0.1):
        counter[0] += 1
        return scale * jax.random.normal(jax.random.fold_in(key, counter[0]),
                                         shape, dtype=jnp.float32)

    zeros = lambda s: jnp.zeros(s, jnp.float32)
    ones = lambda s: jnp.ones(s, jnp.float32)

    def gru_bias():
        bih = nrm((1, 3 * Z), 0.05)
        bhh = nrm((1, 3 * Z), 0.05)
        return jnp.concatenate(
            [bih[:, 0:2 * Z] + bhh[:, 0:2 * Z], bih[:, 2 * Z:], bhh[:, 2 * Z:]], axis=1)

    # ---- vector slab (f32) ----
    vec_vals = {
        'b_act': nrm((1, 4 * A), 0.05),
        'att_g': ones((1, Z)), 'att_b': zeros((1, Z)), 'att_b2': nrm((1, Z), 0.05),
        'ppr_g': ones((1, FLAT)), 'ppr_b': zeros((1, FLAT)),
        'pg_b': gru_bias(),
        'plc_g': ones((1, Z)), 'plc_b': zeros((1, Z)), 'plc_b2': nrm((1, Z), 0.05),
        'enc_g1': jnp.tile(ones((1, ENC1_CH)), (1, 4)),
        'enc_b1': jnp.tile(zeros((1, ENC1_CH)), (1, 4)),
        'enc_g2': ones((1, X_ENC_CH)), 'enc_b2': zeros((1, X_ENC_CH)),
        'ppo_g': ones((1, PPG)), 'ppo_b': zeros((1, PPG)),
        'qg_b': gru_bias(),
        'qlc_g': ones((1, Z)), 'qlc_b': zeros((1, Z)), 'qlc_b2': nrm((1, Z), 0.05),
        'rfc_g': ones((1, FLAT)), 'rfc_b': zeros((1, FLAT)),
        'up1_bias': jnp.tile(nrm((1, DEC_CH), 0.05), (1, 4)),
        'up1_g': jnp.tile(ones((1, DEC_CH)), (1, 4)),
        'up1_b': jnp.tile(zeros((1, DEC_CH)), (1, 4)),
        'up2_bias': jnp.tile(nrm((1, DEC_CH), 0.05), (1, 16)),
        'up2_g': jnp.tile(ones((1, DEC_CH)), (1, 16)),
        'up2_b': jnp.tile(zeros((1, DEC_CH)), (1, 16)),
        'rc_b': jnp.tile(jnp.concatenate([nrm((1, 6), 0.05), zeros((1, 2))], axis=1),
                         (1, 16)),
    }
    vec_slab = zeros((1, VEC_W))
    for name, w in _VEC_ENTRIES:
        o = VEC_OFF[name]
        vec_slab = vec_slab.at[:, o:o + w].set(vec_vals[name])

    def pack_cols(rows, entries, offs, width, values):
        slab = zeros((rows, width))
        for name, w in entries:
            o = offs[name]
            slab = slab.at[:, o:o + w].set(values[name])
        return slab.astype(WDTYPE)

    # ---- K = 16 slab ----
    wa_vals = {
        'att_w1a': nrm((A, Z)),
        'ppr_wa': nrm((A, FLAT)),
        'ppo_wa': nrm((A, PPG)),
        'up1_w': nrm((X_ENC_CH, 4 * DEC_CH)),       # cols = (di,dj position, c_out)
    }
    wa_slab = pack_cols(A, _WA_ENTRIES, WA_OFF, WA_W, wa_vals)

    # ---- K = 32 slab ----
    wz_vals = {
        'att_w1z': nrm((Z, Z)), 'att_w2': nrm((Z, Z)),
        'ppr_wz': nrm((Z, FLAT)),
        'pg_whh': nrm((Z, 3 * Z)),
        'plc_w2': nrm((Z, Z)),
        'qg_wih': nrm((PPG, 3 * Z)), 'qg_whh': nrm((Z, 3 * Z)),
        'qlc_w1h': nrm((PPG, Z)), 'qlc_w1z': nrm((Z, Z)), 'qlc_w2': nrm((Z, Z)),
        'rfc_w': nrm((Z, FLAT)),
        'enc_w2': nrm((4 * ENC1_CH, X_ENC_CH)),      # rows = (conv2 tap q, c1)
        # upconv2 weight replicated block-diagonally so the matmul consumes the
        # stacked-column layout directly.
        'up2_w': jnp.kron(jnp.eye(4, dtype=jnp.float32), nrm((DEC_CH, 4 * DEC_CH))),
    }
    wz_slab = pack_cols(Z, _WZ_ENTRIES, WZ_OFF, WZ_W, wz_vals)

    # ---- K = 256 slab ----
    wf_vals = {
        'pg_wih': nrm((FLAT, 3 * Z)),
        'plc_w1': nrm((FLAT, Z)),
        'ppo_wx': nrm((FLAT, PPG)),                  # rows = (4x4 pixel s, c2)
    }
    wf_slab = pack_cols(FLAT, _WF_ENTRIES, WF_OFF, WF_W, wf_vals)

    # ---- misc slab (row-stacked, width 128) ----
    w_act = nrm((4, 4 * A))                          # [prior | post | recon | mask]
    enc_w1 = jnp.kron(jnp.eye(4, dtype=jnp.float32), nrm((4 * IN_CH, ENC1_CH)))
    rc_blk = jnp.concatenate([nrm((DEC_CH, 3)), nrm((DEC_CH, 3)),
                              zeros((DEC_CH, 2))], axis=1)       # (8, 8) per pixel
    rc_w = jnp.kron(jnp.eye(16, dtype=jnp.float32), rc_blk)     # (128, 128)
    misc = zeros((MISC_ROWS, 128))
    misc = misc.at[_M_WACT_R0:_M_WACT_R0 + 4, 0:4 * A].set(w_act)
    misc = misc.at[_M_ENC1_R0:_M_ENC1_R0 + 4 * 4 * IN_CH, 0:4 * ENC1_CH].set(enc_w1)
    misc = misc.at[_M_RC_R0:_M_RC_R0 + 16 * DEC_CH, 0:128].set(rc_w)
    misc = misc.astype(WDTYPE)

    return {'vec': vec_slab, 'wa': wa_slab, 'wz': wz_slab, 'wf': wf_slab,
            'misc': misc}


# --------------------------- main ---------------------------------------------

if __name__ == "__main__":
    key = jax.random.PRNGKey(0)
    k_obs, k_act, k_z, k_eps, k_par = jax.random.split(key, 5)

    obs_batch = jax.random.uniform(k_obs, (BATCH, IN_CH, IN_H, IN_H), jnp.float32)
    act_batch = jax.random.normal(k_act, (BATCH, 4), jnp.float32)
    prev_z = jax.random.normal(k_z, (BATCH, Z), jnp.float32)
    eps = jax.random.normal(k_eps, (BATCH, Z), jnp.float32)

    params = build_params(k_par)

    fwd = jax.jit(vrnn_forward)
    outs = fwd(params, obs_batch, act_batch, prev_z, eps)
    jax.block_until_ready(outs)

    (prior_mean, prior_log_cov, post_mean, post_log_cov,
     recon_mean, recon_log_cov, post_z_sample) = outs
    assert prior_mean.shape == (BATCH, Z)
    assert prior_log_cov.shape == (BATCH, Z)
    assert post_mean.shape == (BATCH, Z)
    assert post_log_cov.shape == (BATCH, Z)
    assert recon_mean.shape == (BATCH, 3, IN_H, IN_H)
    assert recon_log_cov.shape == (BATCH, 3, IN_H, IN_H)
    assert post_z_sample.shape == (BATCH, Z)
    for o in outs:
        assert bool(jnp.all(jnp.isfinite(o)))
    assert bool(jnp.all((recon_mean >= 0.0) & (recon_mean <= 1.0)))
    assert bool(jnp.all((post_log_cov >= LOG_COV_MIN) & (post_log_cov <= LOG_COV_MAX)))

    print("KERNEL_OK")
</pallas_src>

<mosaic_0001>
module attributes {stable_mosaic.version = 11 : i64} {
  func.func @_vrnn_kernel(%arg0: memref<2x4xf32, #tpu.memory_space<vmem>>, %arg1: memref<2x32xf32, #tpu.memory_space<vmem>>, %arg2: memref<2x32xf32, #tpu.memory_space<vmem>>, %arg3: memref<32x48xf32, #tpu.memory_space<vmem>>, %arg4: memref<1x4224xf32, #tpu.memory_space<vmem>>, %arg5: memref<16x640xbf16, #tpu.memory_space<vmem>>, %arg6: memref<32x1920xbf16, #tpu.memory_space<vmem>>, %arg7: memref<256x384xbf16, #tpu.memory_space<vmem>>, %arg8: memref<192x128xbf16, #tpu.memory_space<vmem>>, %arg9: memref<2x160xf32, #tpu.memory_space<vmem>>, %arg10: memref<32x128xf32, #tpu.memory_space<vmem>>) attributes {dimension_semantics = [], scalar_prefetch = 0 : i64, scratch_operands = 0 : i64, tpu.core_type = #tpu.core_type<tc>} {
    %c0 = arith.constant 0 : index
    %c0_0 = arith.constant 0 : index
    %0 = vector.load %arg0[%c0, %c0_0] : memref<2x4xf32, #tpu.memory_space<vmem>>, vector<2x4xf32>
    %c0_1 = arith.constant 0 : index
    %c0_2 = arith.constant 0 : index
    %1 = vector.load %arg1[%c0_1, %c0_2] : memref<2x32xf32, #tpu.memory_space<vmem>>, vector<2x32xf32>
    %c0_3 = arith.constant 0 : index
    %c0_4 = arith.constant 0 : index
    %2 = vector.load %arg2[%c0_3, %c0_4] : memref<2x32xf32, #tpu.memory_space<vmem>>, vector<2x32xf32>
    %c0_5 = arith.constant 0 : index
    %c0_6 = arith.constant 0 : index
    %3 = vector.load %arg8[%c0_5, %c0_6] : memref<192x128xbf16, #tpu.memory_space<vmem>>, vector<4x64xbf16>
    %4 = arith.truncf %0 : vector<2x4xf32> to vector<2x4xbf16>
    %cst = arith.constant dense<0.000000e+00> : vector<2x64xf32>
    %5 = tpu.matmul %4, %3, %cst {dimension_numbers = #tpu.dot_dimension_numbers<[1], [0], [0], [1], [0, 0, 1, 1], [], []>} : vector<2x4xbf16>, vector<4x64xbf16>, vector<2x64xf32> -> vector<2x64xf32>
    %c0_7 = arith.constant 0 : index
    %c0_8 = arith.constant 0 : index
    %6 = vector.load %arg4[%c0_7, %c0_8] : memref<1x4224xf32, #tpu.memory_space<vmem>>, vector<1x64xf32>
    %7 = vector.broadcast %6 : vector<1x64xf32> to vector<2x64xf32>
    %8 = arith.addf %5, %7 : vector<2x64xf32>
    %9 = vector.extract_strided_slice %8 {offsets = [0, 0], sizes = [2, 16], strides = [1, 1]} : vector<2x64xf32> to vector<2x16xf32>
    %10 = vector.extract_strided_slice %8 {offsets = [0, 16], sizes = [2, 16], strides = [1, 1]} : vector<2x64xf32> to vector<2x16xf32>
    %11 = vector.extract_strided_slice %8 {offsets = [0, 48], sizes = [2, 16], strides = [1, 1]} : vector<2x64xf32> to vector<2x16xf32>
    %c0_9 = arith.constant 0 : index
    %c0_10 = arith.constant 0 : index
    %12 = vector.load %arg6[%c0_9, %c0_10] : memref<32x1920xbf16, #tpu.memory_space<vmem>>, vector<32x32xbf16>
    %13 = arith.truncf %1 : vector<2x32xf32> to vector<2x32xbf16>
    %cst_11 = arith.constant dense<0.000000e+00> : vector<2x32xf32>
    %14 = tpu.matmul %13, %12, %cst_11 {dimension_numbers = #tpu.dot_dimension_numbers<[1], [0], [0], [1], [0, 0, 1, 1], [], []>} : vector<2x32xbf16>, vector<32x32xbf16>, vector<2x32xf32> -> vector<2x32xf32>
    %c0_12 = arith.constant 0 : index
    %c0_13 = arith.constant 0 : index
    %15 = vector.load %arg5[%c0_12, %c0_13] : memref<16x640xbf16, #tpu.memory_space<vmem>>, vector<16x32xbf16>
    %16 = arith.truncf %11 : vector<2x16xf32> to vector<2x16xbf16>
    %cst_14 = arith.constant dense<0.000000e+00> : vector<2x32xf32>
    %17 = tpu.matmul %16, %15, %cst_14 {dimension_numbers = #tpu.dot_dimension_numbers<[1], [0], [0], [1], [0, 0, 1, 1], [], []>} : vector<2x16xbf16>, vector<16x32xbf16>, vector<2x32xf32> -> vector<2x32xf32>
    %18 = arith.addf %14, %17 : vector<2x32xf32>
    %c0_15 = arith.constant 0 : index
    %c128 = arith.constant 128 : index
    %19 = vector.load %arg4[%c0_15, %c128] : memref<1x4224xf32, #tpu.memory_space<vmem>>, vector<1x32xf32>
    %c0_16 = arith.constant 0 : index
    %c256 = arith.constant 256 : index
    %20 = vector.load %arg4[%c0_16, %c256] : memref<1x4224xf32, #tpu.memory_space<vmem>>, vector<1x32xf32>
    %cst_17 = arith.constant dense<0.000000e+00> : vector<32xf32>
    %21 = vector.multi_reduction <add>, %18, %cst_17 [0] : vector<2x32xf32> to vector<32xf32>
    %22 = vector.shape_cast %21 : vector<32xf32> to vector<1x32xf32>
    %cst_18 = arith.constant 2.000000e+00 : f32
    %23 = vector.broadcast %cst_18 : f32 to vector<1x32xf32>
    %24 = arith.divf %22, %23 : vector<1x32xf32>
    %25 = vector.broadcast %24 : vector<1x32xf32> to vector<2x32xf32>
    %26 = arith.subf %18, %25 : vector<2x32xf32>
    %27 = arith.mulf %26, %26 : vector<2x32xf32>
    %cst_19 = arith.constant dense<0.000000e+00> : vector<32xf32>
    %28 = vector.multi_reduction <add>, %27, %cst_19 [0] : vector<2x32xf32> to vector<32xf32>
    %29 = vector.shape_cast %28 : vector<32xf32> to vector<1x32xf32>
    %cst_20 = arith.constant 2.000000e+00 : f32
    %30 = vector.broadcast %cst_20 : f32 to vector<1x32xf32>
    %31 = arith.divf %29, %30 : vector<1x32xf32>
    %32 = vector.broadcast %24 : vector<1x32xf32> to vector<2x32xf32>
    %33 = arith.subf %18, %32 : vector<2x32xf32>
    %cst_21 = arith.constant 9.99999974E-6 : f32
    %34 = vector.broadcast %cst_21 : f32 to vector<1x32xf32>
    %35 = arith.addf %31, %34 : vector<1x32xf32>
    %36 = math.rsqrt %35 : vector<1x32xf32>
    %37 = vector.broadcast %36 : vector<1x32xf32> to vector<2x32xf32>
    %38 = arith.mulf %33, %37 : vector<2x32xf32>
    %39 = vector.broadcast %19 : vector<1x32xf32> to vector<2x32xf32>
    %40 = arith.mulf %38, %39 : vector<2x32xf32>
    %41 = vector.broadcast %20 : vector<1x32xf32> to vector<2x32xf32>
    %42 = arith.addf %40, %41 : vector<2x32xf32>
    %cst_22 = arith.constant 0.000000e+00 : f32
    %43 = vector.broadcast %cst_22 : f32 to vector<2x32xf32>
    %44 = arith.maximumf %42, %43 : vector<2x32xf32>
    %c0_23 = arith.constant 0 : index
    %c128_24 = arith.constant 128 : index
    %45 = vector.load %arg6[%c0_23, %c128_24] : memref<32x1920xbf16, #tpu.memory_space<vmem>>, vector<32x32xbf16>
    %46 = arith.truncf %44 : vector<2x32xf32> to vector<2x32xbf16>
    %cst_25 = arith.constant dense<0.000000e+00> : vector<2x32xf32>
    %47 = tpu.matmul %46, %45, %cst_25 {dimension_numbers = #tpu.dot_dimension_numbers<[1], [0], [0], [1], [0, 0, 1, 1], [], []>} : vector<2x32xbf16>, vector<32x32xbf16>, vector<2x32xf32> -> vector<2x32xf32>
    %c0_26 = arith.constant 0 : index
    %c384 = arith.constant 384 : index
    %48 = vector.load %arg4[%c0_26, %c384] : memref<1x4224xf32, #tpu.memory_space<vmem>>, vector<1x32xf32>
    %49 = vector.broadcast %48 : vector<1x32xf32> to vector<2x32xf32>
    %50 = arith.addf %47, %49 : vector<2x32xf32>
    %51 = arith.negf %50 : vector<2x32xf32>
    %52 = math.exp %51 : vector<2x32xf32>
    %cst_27 = arith.constant 1.000000e+00 : f32
    %53 = vector.broadcast %cst_27 : f32 to vector<2x32xf32>
    %54 = arith.addf %53, %52 : vector<2x32xf32>
    %55 = arith.divf %53, %54 : vector<2x32xf32>
    %56 = arith.mulf %1, %55 : vector<2x32xf32>
    %c0_28 = arith.constant 0 : index
    %c256_29 = arith.constant 256 : index
    %57 = vector.load %arg6[%c0_28, %c256_29] : memref<32x1920xbf16, #tpu.memory_space<vmem>>, vector<32x256xbf16>
    %58 = arith.truncf %56 : vector<2x32xf32> to vector<2x32xbf16>
    %cst_30 = arith.constant dense<0.000000e+00> : vector<2x256xf32>
    %59 = tpu.matmul %58, %57, %cst_30 {dimension_numbers = #tpu.dot_dimension_numbers<[1], [0], [0], [1], [0, 0, 1, 1], [], []>} : vector<2x32xbf16>, vector<32x256xbf16>, vector<2x256xf32> -> vector<2x256xf32>
    %c0_31 = arith.constant 0 : index
    %c128_32 = arith.constant 128 : index
    %60 = vector.load %arg5[%c0_31, %c128_32] : memref<16x640xbf16, #tpu.memory_space<vmem>>, vector<16x256xbf16>
    %61 = arith.truncf %9 : vector<2x16xf32> to vector<2x16xbf16>
    %cst_33 = arith.constant dense<0.000000e+00> : vector<2x256xf32>
    %62 = tpu.matmul %61, %60, %cst_33 {dimension_numbers = #tpu.dot_dimension_numbers<[1], [0], [0], [1], [0, 0, 1, 1], [], []>} : vector<2x16xbf16>, vector<16x256xbf16>, vector<2x256xf32> -> vector<2x256xf32>
    %63 = arith.addf %59, %62 : vector<2x256xf32>
    %c0_34 = arith.constant 0 : index
    %c512 = arith.constant 512 : index
    %64 = vector.load %arg4[%c0_34, %c512] : memref<1x4224xf32, #tpu.memory_space<vmem>>, vector<1x256xf32>
    %c0_35 = arith.constant 0 : index
    %c768 = arith.constant 768 : index
    %65 = vector.load %arg4[%c0_35, %c768] : memref<1x4224xf32, #tpu.memory_space<vmem>>, vector<1x256xf32>
    %cst_36 = arith.constant dense<0.000000e+00> : vector<256xf32>
    %66 = vector.multi_reduction <add>, %63, %cst_36 [0] : vector<2x256xf32> to vector<256xf32>
    %67 = vector.shape_cast %66 : vector<256xf32> to vector<1x256xf32>
    %cst_37 = arith.constant 2.000000e+00 : f32
    %68 = vector.broadcast %cst_37 : f32 to vector<1x256xf32>
    %69 = arith.divf %67, %68 : vector<1x256xf32>
    %70 = vector.broadcast %69 : vector<1x256xf32> to vector<2x256xf32>
    %71 = arith.subf %63, %70 : vector<2x256xf32>
    %72 = arith.mulf %71, %71 : vector<2x256xf32>
    %cst_38 = arith.constant dense<0.000000e+00> : vector<256xf32>
    %73 = vector.multi_reduction <add>, %72, %cst_38 [0] : vector<2x256xf32> to vector<256xf32>
    %74 = vector.shape_cast %73 : vector<256xf32> to vector<1x256xf32>
    %cst_39 = arith.constant 2.000000e+00 : f32
    %75 = vector.broadcast %cst_39 : f32 to vector<1x256xf32>
    %76 = arith.divf %74, %75 : vector<1x256xf32>
    %77 = vector.broadcast %69 : vector<1x256xf32> to vector<2x256xf32>
    %78 = arith.subf %63, %77 : vector<2x256xf32>
    %cst_40 = arith.constant 9.99999974E-6 : f32
    %79 = vector.broadcast %cst_40 : f32 to vector<1x256xf32>
    %80 = arith.addf %76, %79 : vector<1x256xf32>
    %81 = math.rsqrt %80 : vector<1x256xf32>
    %82 = vector.broadcast %81 : vector<1x256xf32> to vector<2x256xf32>
    %83 = arith.mulf %78, %82 : vector<2x256xf32>
    %84 = vector.broadcast %64 : vector<1x256xf32> to vector<2x256xf32>
    %85 = arith.mulf %83, %84 : vector<2x256xf32>
    %86 = vector.broadcast %65 : vector<1x256xf32> to vector<2x256xf32>
    %87 = arith.addf %85, %86 : vector<2x256xf32>
    %cst_41 = arith.constant 0.000000e+00 : f32
    %88 = vector.broadcast %cst_41 : f32 to vector<2x256xf32>
    %89 = arith.maximumf %87, %88 : vector<2x256xf32>
    %c0_42 = arith.constant 0 : index
    %c0_43 = arith.constant 0 : index
    %90 = vector.load %arg7[%c0_42, %c0_43] : memref<256x384xbf16, #tpu.memory_space<vmem>>, vector<256x96xbf16>
    %c0_44 = arith.constant 0 : index
    %c512_45 = arith.constant 512 : index
    %91 = vector.load %arg6[%c0_44, %c512_45] : memref<32x1920xbf16, #tpu.memory_space<vmem>>, vector<32x96xbf16>
    %c0_46 = arith.constant 0 : index
    %c1024 = arith.constant 1024 : index
    %92 = vector.load %arg4[%c0_46, %c1024] : memref<1x4224xf32, #tpu.memory_space<vmem>>, vector<1x128xf32>
    %93 = arith.truncf %89 : vector<2x256xf32> to vector<2x256xbf16>
    %cst_47 = arith.constant dense<0.000000e+00> : vector<2x96xf32>
    %94 = tpu.matmul %93, %90, %cst_47 {dimension_numbers = #tpu.dot_dimension_numbers<[1], [0], [0], [1], [0, 0, 1, 1], [], []>} : vector<2x256xbf16>, vector<256x96xbf16>, vector<2x96xf32> -> vector<2x96xf32>
    %95 = arith.truncf %1 : vector<2x32xf32> to vector<2x32xbf16>
    %cst_48 = arith.constant dense<0.000000e+00> : vector<2x96xf32>
    %96 = tpu.matmul %95, %91, %cst_48 {dimension_numbers = #tpu.dot_dimension_numbers<[1], [0], [0], [1], [0, 0, 1, 1], [], []>} : vector<2x32xbf16>, vector<32x96xbf16>, vector<2x96xf32> -> vector<2x96xf32>
    %97 = vector.extract_strided_slice %92 {offsets = [0, 0], sizes = [1, 64], strides = [1, 1]} : vector<1x128xf32> to vector<1x64xf32>
    %98 = vector.extract_strided_slice %92 {offsets = [0, 64], sizes = [1, 32], strides = [1, 1]} : vector<1x128xf32> to vector<1x32xf32>
    %99 = vector.extract_strided_slice %92 {offsets = [0, 96], sizes = [1, 32], strides = [1, 1]} : vector<1x128xf32> to vector<1x32xf32>
    %100 = vector.extract_strided_slice %94 {offsets = [0, 0], sizes = [2, 64], strides = [1, 1]} : vector<2x96xf32> to vector<2x64xf32>
    %101 = vector.extract_strided_slice %96 {offsets = [0, 0], sizes = [2, 64], strides = [1, 1]} : vector<2x96xf32> to vector<2x64xf32>
    %102 = arith.addf %100, %101 : vector<2x64xf32>
    %103 = vector.broadcast %97 : vector<1x64xf32> to vector<2x64xf32>
    %104 = arith.addf %102, %103 : vector<2x64xf32>
    %105 = arith.negf %104 : vector<2x64xf32>
    %106 = math.exp %105 : vector<2x64xf32>
    %cst_49 = arith.constant 1.000000e+00 : f32
    %107 = vector.broadcast %cst_49 : f32 to vector<2x64xf32>
    %108 = arith.addf %107, %106 : vector<2x64xf32>
    %109 = arith.divf %107, %108 : vector<2x64xf32>
    %110 = vector.extract_strided_slice %109 {offsets = [0, 0], sizes = [2, 32], strides = [1, 1]} : vector<2x64xf32> to vector<2x32xf32>
    %111 = vector.extract_strided_slice %109 {offsets = [0, 32], sizes = [2, 32], strides = [1, 1]} : vector<2x64xf32> to vector<2x32xf32>
    %112 = vector.extract_strided_slice %94 {offsets = [0, 64], sizes = [2, 32], strides = [1, 1]} : vector<2x96xf32> to vector<2x32xf32>
    %113 = vector.broadcast %98 : vector<1x32xf32> to vector<2x32xf32>
    %114 = arith.addf %112, %113 : vector<2x32xf32>
    %115 = vector.extract_strided_slice %96 {offsets = [0, 64], sizes = [2, 32], strides = [1, 1]} : vector<2x96xf32> to vector<2x32xf32>
    %116 = vector.broadcast %99 : vector<1x32xf32> to vector<2x32xf32>
    %117 = arith.addf %115, %116 : vector<2x32xf32>
    %118 = arith.mulf %110, %117 : vector<2x32xf32>
    %119 = arith.addf %114, %118 : vector<2x32xf32>
    %120 = math.tanh %119 : vector<2x32xf32>
    %cst_50 = arith.constant 1.000000e+00 : f32
    %121 = vector.broadcast %cst_50 : f32 to vector<2x32xf32>
    %122 = arith.subf %121, %111 : vector<2x32xf32>
    %123 = arith.mulf %122, %120 : vector<2x32xf32>
    %124 = arith.mulf %111, %1 : vector<2x32xf32>
    %125 = arith.addf %123, %124 : vector<2x32xf32>
    %c0_51 = arith.constant 0 : index
    %c128_52 = arith.constant 128 : index
    %126 = vector.load %arg7[%c0_51, %c128_52] : memref<256x384xbf16, #tpu.memory_space<vmem>>, vector<256x32xbf16>
    %127 = arith.truncf %89 : vector<2x256xf32> to vector<2x256xbf16>
    %cst_53 = arith.constant dense<0.000000e+00> : vector<2x32xf32>
    %128 = tpu.matmul %127, %126, %cst_53 {dimension_numbers = #tpu.dot_dimension_numbers<[1], [0], [0], [1], [0, 0, 1, 1], [], []>} : vector<2x256xbf16>, vector<256x32xbf16>, vector<2x32xf32> -> vector<2x32xf32>
    %c0_54 = arith.constant 0 : index
    %c1152 = arith.constant 1152 : index
    %129 = vector.load %arg4[%c0_54, %c1152] : memref<1x4224xf32, #tpu.memory_space<vmem>>, vector<1x32xf32>
    %c0_55 = arith.constant 0 : index
    %c1280 = arith.constant 1280 : index
    %130 = vector.load %arg4[%c0_55, %c1280] : memref<1x4224xf32, #tpu.memory_space<vmem>>, vector<1x32xf32>
    %cst_56 = arith.constant dense<0.000000e+00> : vector<32xf32>
    %131 = vector.multi_reduction <add>, %128, %cst_56 [0] : vector<2x32xf32> to vector<32xf32>
    %132 = vector.shape_cast %131 : vector<32xf32> to vector<1x32xf32>
    %cst_57 = arith.constant 2.000000e+00 : f32
    %133 = vector.broadcast %cst_57 : f32 to vector<1x32xf32>
    %134 = arith.divf %132, %133 : vector<1x32xf32>
    %135 = vector.broadcast %134 : vector<1x32xf32> to vector<2x32xf32>
    %136 = arith.subf %128, %135 : vector<2x32xf32>
    %137 = arith.mulf %136, %136 : vector<2x32xf32>
    %cst_58 = arith.constant dense<0.000000e+00> : vector<32xf32>
    %138 = vector.multi_reduction <add>, %137, %cst_58 [0] : vector<2x32xf32> to vector<32xf32>
    %139 = vector.shape_cast %138 : vector<32xf32> to vector<1x32xf32>
    %cst_59 = arith.constant 2.000000e+00 : f32
    %140 = vector.broadcast %cst_59 : f32 to vector<1x32xf32>
    %141 = arith.divf %139, %140 : vector<1x32xf32>
    %142 = vector.broadcast %134 : vector<1x32xf32> to vector<2x32xf32>
    %143 = arith.subf %128, %142 : vector<2x32xf32>
    %cst_60 = arith.constant 9.99999974E-6 : f32
    %144 = vector.broadcast %cst_60 : f32 to vector<1x32xf32>
    %145 = arith.addf %141, %144 : vector<1x32xf32>
    %146 = math.rsqrt %145 : vector<1x32xf32>
    %147 = vector.broadcast %146 : vector<1x32xf32> to vector<2x32xf32>
    %148 = arith.mulf %143, %147 : vector<2x32xf32>
    %149 = vector.broadcast %129 : vector<1x32xf32> to vector<2x32xf32>
    %150 = arith.mulf %148, %149 : vector<2x32xf32>
    %151 = vector.broadcast %130 : vector<1x32xf32> to vector<2x32xf32>
    %152 = arith.addf %150, %151 : vector<2x32xf32>
    %cst_61 = arith.constant 0.000000e+00 : f32
    %153 = vector.broadcast %cst_61 : f32 to vector<2x32xf32>
    %154 = arith.maximumf %152, %153 : vector<2x32xf32>
    %c0_62 = arith.constant 0 : index
    %c640 = arith.constant 640 : index
    %155 = vector.load %arg6[%c0_62, %c640] : memref<32x1920xbf16, #tpu.memory_space<vmem>>, vector<32x32xbf16>
    %156 = arith.truncf %154 : vector<2x32xf32> to vector<2x32xbf16>
    %cst_63 = arith.constant dense<0.000000e+00> : vector<2x32xf32>
    %157 = tpu.matmul %156, %155, %cst_63 {dimension_numbers = #tpu.dot_dimension_numbers<[1], [0], [0], [1], [0, 0, 1, 1], [], []>} : vector<2x32xbf16>, vector<32x32xbf16>, vector<2x32xf32> -> vector<2x32xf32>
    %c0_64 = arith.constant 0 : index
    %c1408 = arith.constant 1408 : index
    %158 = vector.load %arg4[%c0_64, %c1408] : memref<1x4224xf32, #tpu.memory_space<vmem>>, vector<1x32xf32>
    %159 = vector.broadcast %158 : vector<1x32xf32> to vector<2x32xf32>
    %160 = arith.addf %157, %159 : vector<2x32xf32>
    %cst_65 = arith.constant -5.000000e+00 : f32
    %cst_66 = arith.constant 2.000000e+00 : f32
    %161 = vector.broadcast %cst_65 : f32 to vector<2x32xf32>
    %162 = arith.maximumf %161, %160 : vector<2x32xf32>
    %163 = vector.broadcast %cst_66 : f32 to vector<2x32xf32>
    %164 = arith.minimumf %163, %162 : vector<2x32xf32>
    %c16 = arith.constant 16 : index
    %c0_67 = arith.constant 0 : index
    %165 = vector.load %arg8[%c16, %c0_67] : memref<192x128xbf16, #tpu.memory_space<vmem>>, vector<48x32xbf16>
    %c0_68 = arith.constant 0 : index
    %c0_69 = arith.constant 0 : index
    %166 = vector.load %arg3[%c0_68, %c0_69] : memref<32x48xf32, #tpu.memory_space<vmem>>, vector<32x48xf32>
    %167 = arith.truncf %166 : vector<32x48xf32> to vector<32x48xbf16>
    %cst_70 = arith.constant dense<0.000000e+00> : vector<32x32xf32>
    %168 = tpu.matmul %167, %165, %cst_70 {dimension_numbers = #tpu.dot_dimension_numbers<[1], [0], [0], [1], [0, 0, 1, 1], [], []>} : vector<32x48xbf16>, vector<48x32xbf16>, vector<32x32xf32> -> vector<32x32xf32>
    %c0_71 = arith.constant 0 : index
    %c1536 = arith.constant 1536 : index
    %169 = vector.load %arg4[%c0_71, %c1536] : memref<1x4224xf32, #tpu.memory_space<vmem>>, vector<1x32xf32>
    %c0_72 = arith.constant 0 : index
    %c1664 = arith.constant 1664 : index
    %170 = vector.load %arg4[%c0_72, %c1664] : memref<1x4224xf32, #tpu.memory_space<vmem>>, vector<1x32xf32>
    %171 = tpu.iota {dimensions = array<i32: 0>} : vector<32x32xi32>
    %172 = tpu.iota {dimensions = array<i32: 1>} : vector<32x32xi32>
    %c8_i32 = arith.constant 8 : i32
    %c0_i32 = arith.constant 0 : i32
    %173 = arith.cmpi eq, %c8_i32, %c0_i32 : i32
    %c1_i32 = arith.constant 1 : i32
    %174 = arith.select %173, %c1_i32, %c8_i32 : i32
    %175 = vector.broadcast %174 : i32 to vector<32x32xi32>
    %176 = arith.remsi %171, %175 : vector<32x32xi32>
    %c0_i32_73 = arith.constant 0 : i32
    %177 = vector.broadcast %c0_i32_73 : i32 to vector<32x32xi32>
    %178 = arith.cmpi ne, %176, %177 : vector<32x32xi32>
    %c0_i32_74 = arith.constant 0 : i32
    %179 = vector.broadcast %c0_i32_74 : i32 to vector<32x32xi32>
    %180 = arith.cmpi slt, %176, %179 : vector<32x32xi32>
    %c0_i32_75 = arith.constant 0 : i32
    %181 = arith.cmpi slt, %174, %c0_i32_75 : i32
    %182 = vector.broadcast %181 : i1 to vector<32x32xi1>
    %183 = vector.broadcast %182 : vector<32x32xi1> to vector<32x32xi1>
    %184 = arith.xori %180, %183 : vector<32x32xi1>
    %185 = arith.andi %184, %178 : vector<32x32xi1>
    %186 = vector.broadcast %174 : i32 to vector<32x32xi32>
    %187 = arith.addi %176, %186 : vector<32x32xi32>
    %188 = arith.select %185, %187, %176 : vector<32x32xi1>, vector<32x32xi32>
    %c8_i32_76 = arith.constant 8 : i32
    %c0_i32_77 = arith.constant 0 : i32
    %189 = arith.cmpi eq, %c8_i32_76, %c0_i32_77 : i32
    %c1_i32_78 = arith.constant 1 : i32
    %190 = arith.select %189, %c1_i32_78, %c8_i32_76 : i32
    %191 = vector.broadcast %190 : i32 to vector<32x32xi32>
    %192 = arith.remsi %172, %191 : vector<32x32xi32>
    %c0_i32_79 = arith.constant 0 : i32
    %193 = vector.broadcast %c0_i32_79 : i32 to vector<32x32xi32>
    %194 = arith.cmpi ne, %192, %193 : vector<32x32xi32>
    %c0_i32_80 = arith.constant 0 : i32
    %195 = vector.broadcast %c0_i32_80 : i32 to vector<32x32xi32>
    %196 = arith.cmpi slt, %192, %195 : vector<32x32xi32>
    %c0_i32_81 = arith.constant 0 : i32
    %197 = arith.cmpi slt, %190, %c0_i32_81 : i32
    %198 = vector.broadcast %197 : i1 to vector<32x32xi1>
    %199 = vector.broadcast %198 : vector<32x32xi1> to vector<32x32xi1>
    %200 = arith.xori %196, %199 : vector<32x32xi1>
    %201 = arith.andi %200, %194 : vector<32x32xi1>
    %202 = vector.broadcast %190 : i32 to vector<32x32xi32>
    %203 = arith.addi %192, %202 : vector<32x32xi32>
    %204 = arith.select %201, %203, %192 : vector<32x32xi1>, vector<32x32xi32>
    %205 = arith.cmpi eq, %188, %204 : vector<32x32xi32>
    %cst_82 = arith.constant 2.500000e-01 : f32
    %cst_83 = arith.constant 0.000000e+00 : f32
    %206 = vector.broadcast %cst_82 : f32 to vector<32x32xf32>
    %207 = vector.broadcast %cst_83 : f32 to vector<32x32xf32>
    %208 = arith.select %205, %206, %207 : vector<32x32xi1>, vector<32x32xf32>
    %cst_84 = arith.constant dense<0.000000e+00> : vector<32xf32>
    %209 = vector.multi_reduction <add>, %168, %cst_84 [0] : vector<32x32xf32> to vector<32xf32>
    %210 = vector.shape_cast %209 : vector<32xf32> to vector<1x32xf32>
    %cst_85 = arith.constant 3.200000e+01 : f32
    %211 = vector.broadcast %cst_85 : f32 to vector<1x32xf32>
    %212 = arith.divf %210, %211 : vector<1x32xf32>
    %213 = arith.mulf %168, %168 : vector<32x32xf32>
    %cst_86 = arith.constant dense<0.000000e+00> : vector<32xf32>
    %214 = vector.multi_reduction <add>, %213, %cst_86 [0] : vector<32x32xf32> to vector<32xf32>
    %215 = vector.shape_cast %214 : vector<32xf32> to vector<1x32xf32>
    %cst_87 = arith.constant 3.200000e+01 : f32
    %216 = vector.broadcast %cst_87 : f32 to vector<1x32xf32>
    %217 = arith.divf %215, %216 : vector<1x32xf32>
    %cst_88 = arith.constant dense<0.000000e+00> : vector<1x32xf32>
    %218 = tpu.matmul %212, %208, %cst_88 {dimension_numbers = #tpu.dot_dimension_numbers<[1], [0], [0], [1], [0, 0, 1, 1], [], []>} : vector<1x32xf32>, vector<32x32xf32>, vector<1x32xf32> -> vector<1x32xf32>
    %cst_89 = arith.constant dense<0.000000e+00> : vector<1x32xf32>
    %219 = tpu.matmul %217, %208, %cst_89 {dimension_numbers = #tpu.dot_dimension_numbers<[1], [0], [0], [1], [0, 0, 1, 1], [], []>} : vector<1x32xf32>, vector<32x32xf32>, vector<1x32xf32> -> vector<1x32xf32>
    %220 = arith.mulf %218, %218 : vector<1x32xf32>
    %221 = arith.subf %219, %220 : vector<1x32xf32>
    %cst_90 = arith.constant 0.000000e+00 : f32
    %222 = vector.broadcast %cst_90 : f32 to vector<1x32xf32>
    %223 = arith.maximumf %221, %222 : vector<1x32xf32>
    %224 = vector.broadcast %218 : vector<1x32xf32> to vector<32x32xf32>
    %225 = arith.subf %168, %224 : vector<32x32xf32>
    %cst_91 = arith.constant 9.99999974E-6 : f32
    %226 = vector.broadcast %cst_91 : f32 to vector<1x32xf32>
    %227 = arith.addf %223, %226 : vector<1x32xf32>
    %228 = math.rsqrt %227 : vector<1x32xf32>
    %229 = vector.broadcast %228 : vector<1x32xf32> to vector<32x32xf32>
    %230 = arith.mulf %225, %229 : vector<32x32xf32>
    %231 = vector.broadcast %169 : vector<1x32xf32> to vector<32x32xf32>
    %232 = arith.mulf %230, %231 : vector<32x32xf32>
    %233 = vector.broadcast %170 : vector<1x32xf32> to vector<32x32xf32>
    %234 = arith.addf %232, %233 : vector<32x32xf32>
    %cst_92 = arith.constant 0.000000e+00 : f32
    %235 = vector.broadcast %cst_92 : f32 to vector<32x32xf32>
    %236 = arith.maximumf %234, %235 : vector<32x32xf32>
    %c0_93 = arith.constant 0 : index
    %c1664_94 = arith.constant 1664 : index
    %237 = vector.load %arg6[%c0_93, %c1664_94] : memref<32x1920xbf16, #tpu.memory_space<vmem>>, vector<32x16xbf16>
    %238 = arith.truncf %236 : vector<32x32xf32> to vector<32x32xbf16>
    %cst_95 = arith.constant dense<0.000000e+00> : vector<32x16xf32>
    %239 = tpu.matmul %238, %237, %cst_95 {dimension_numbers = #tpu.dot_dimension_numbers<[1], [0], [0], [1], [0, 0, 1, 1], [], []>} : vector<32x32xbf16>, vector<32x16xbf16>, vector<32x16xf32> -> vector<32x16xf32>
    %c0_96 = arith.constant 0 : index
    %c1792 = arith.constant 1792 : index
    %240 = vector.load %arg4[%c0_96, %c1792] : memref<1x4224xf32, #tpu.memory_space<vmem>>, vector<1x16xf32>
    %c0_97 = arith.constant 0 : index
    %c1920 = arith.constant 1920 : index
    %241 = vector.load %arg4[%c0_97, %c1920] : memref<1x4224xf32, #tpu.memory_space<vmem>>, vector<1x16xf32>
    %cst_98 = arith.constant dense<0.000000e+00> : vector<16xf32>
    %242 = vector.multi_reduction <add>, %239, %cst_98 [0] : vector<32x16xf32> to vector<16xf32>
    %243 = vector.shape_cast %242 : vector<16xf32> to vector<1x16xf32>
    %cst_99 = arith.constant 3.200000e+01 : f32
    %244 = vector.broadcast %cst_99 : f32 to vector<1x16xf32>
    %245 = arith.divf %243, %244 : vector<1x16xf32>
    %246 = vector.broadcast %245 : vector<1x16xf32> to vector<32x16xf32>
    %247 = arith.subf %239, %246 : vector<32x16xf32>
    %248 = arith.mulf %247, %247 : vector<32x16xf32>
    %cst_100 = arith.constant dense<0.000000e+00> : vector<16xf32>
    %249 = vector.multi_reduction <add>, %248, %cst_100 [0] : vector<32x16xf32> to vector<16xf32>
    %250 = vector.shape_cast %249 : vector<16xf32> to vector<1x16xf32>
    %cst_101 = arith.constant 3.200000e+01 : f32
    %251 = vector.broadcast %cst_101 : f32 to vector<1x16xf32>
    %252 = arith.divf %250, %251 : vector<1x16xf32>
    %253 = vector.broadcast %245 : vector<1x16xf32> to vector<32x16xf32>
    %254 = arith.subf %239, %253 : vector<32x16xf32>
    %cst_102 = arith.constant 9.99999974E-6 : f32
    %255 = vector.broadcast %cst_102 : f32 to vector<1x16xf32>
    %256 = arith.addf %252, %255 : vector<1x16xf32>
    %257 = math.rsqrt %256 : vector<1x16xf32>
    %258 = vector.broadcast %257 : vector<1x16xf32> to vector<32x16xf32>
    %259 = arith.mulf %254, %258 : vector<32x16xf32>
    %260 = vector.broadcast %240 : vector<1x16xf32> to vector<32x16xf32>
    %261 = arith.mulf %259, %260 : vector<32x16xf32>
    %262 = vector.broadcast %241 : vector<1x16xf32> to vector<32x16xf32>
    %263 = arith.addf %261, %262 : vector<32x16xf32>
    %cst_103 = arith.constant 0.000000e+00 : f32
    %264 = vector.broadcast %cst_103 : f32 to vector<32x16xf32>
    %265 = arith.maximumf %263, %264 : vector<32x16xf32>
    %266 = tpu.iota {dimensions = array<i32: 0>} : vector<2x32xi32>
    %267 = tpu.iota {dimensions = array<i32: 1>} : vector<2x32xi32>
    %268 = arith.subi %267, %266 : vector<2x32xi32>
    %c0_104 = arith.constant 0 : index
    %c384_105 = arith.constant 384 : index
    %269 = vector.load %arg5[%c0_104, %c384_105] : memref<16x640xbf16, #tpu.memory_space<vmem>>, vector<16x32xbf16>
    %270 = arith.truncf %10 : vector<2x16xf32> to vector<2x16xbf16>
    %cst_106 = arith.constant dense<0.000000e+00> : vector<2x32xf32>
    %271 = tpu.matmul %270, %269, %cst_106 {dimension_numbers = #tpu.dot_dimension_numbers<[1], [0], [0], [1], [0, 0, 1, 1], [], []>} : vector<2x16xbf16>, vector<16x32xbf16>, vector<2x32xf32> -> vector<2x32xf32>
    %c0_i32_107 = arith.constant 0 : i32
    %272 = vector.broadcast %c0_i32_107 : i32 to vector<2x32xi32>
    %273 = arith.cmpi eq, %268, %272 : vector<2x32xi32>
    %274 = arith.extui %273 : vector<2x32xi1> to vector<2x32xi32>
    %275 = arith.sitofp %274 : vector<2x32xi32> to vector<2x32xf32>
    %cst_108 = arith.constant dense<0.000000e+00> : vector<2x16xf32>
    %276 = tpu.matmul %275, %265, %cst_108 {dimension_numbers = #tpu.dot_dimension_numbers<[1], [0], [0], [1], [0, 0, 1, 1], [], []>} : vector<2x32xf32>, vector<32x16xf32>, vector<2x16xf32> -> vector<2x16xf32>
    %c0_109 = arith.constant 0 : index
    %c256_110 = arith.constant 256 : index
    %277 = vector.load %arg7[%c0_109, %c256_110] : memref<256x384xbf16, #tpu.memory_space<vmem>>, vector<16x32xbf16>
    %278 = arith.truncf %276 : vector<2x16xf32> to vector<2x16xbf16>
    %cst_111 = arith.constant dense<0.000000e+00> : vector<2x32xf32>
    %279 = tpu.matmul %278, %277, %cst_111 {dimension_numbers = #tpu.dot_dimension_numbers<[1], [0], [0], [1], [0, 0, 1, 1], [], []>} : vector<2x16xbf16>, vector<16x32xbf16>, vector<2x32xf32> -> vector<2x32xf32>
    %280 = arith.addf %271, %279 : vector<2x32xf32>
    %c2_i32 = arith.constant 2 : i32
    %281 = vector.broadcast %c2_i32 : i32 to vector<2x32xi32>
    %282 = arith.cmpi eq, %268, %281 : vector<2x32xi32>
    %283 = arith.extui %282 : vector<2x32xi1> to vector<2x32xi32>
    %284 = arith.sitofp %283 : vector<2x32xi32> to vector<2x32xf32>
    %cst_112 = arith.constant dense<0.000000e+00> : vector<2x16xf32>
    %285 = tpu.matmul %284, %265, %cst_112 {dimension_numbers = #tpu.dot_dimension_numbers<[1], [0], [0], [1], [0, 0, 1, 1], [], []>} : vector<2x32xf32>, vector<32x16xf32>, vector<2x16xf32> -> vector<2x16xf32>
    %c16_113 = arith.constant 16 : index
    %c256_114 = arith.constant 256 : index
    %286 = vector.load %arg7[%c16_113, %c256_114] : memref<256x384xbf16, #tpu.memory_space<vmem>>, vector<16x32xbf16>
    %287 = arith.truncf %285 : vector<2x16xf32> to vector<2x16xbf16>
    %cst_115 = arith.constant dense<0.000000e+00> : vector<2x32xf32>
    %288 = tpu.matmul %287, %286, %cst_115 {dimension_numbers = #tpu.dot_dimension_numbers<[1], [0], [0], [1], [0, 0, 1, 1], [], []>} : vector<2x16xbf16>, vector<16x32xbf16>, vector<2x32xf32> -> vector<2x32xf32>
    %289 = arith.addf %280, %288 : vector<2x32xf32>
    %c4_i32 = arith.constant 4 : i32
    %290 = vector.broadcast %c4_i32 : i32 to vector<2x32xi32>
    %291 = arith.cmpi eq, %268, %290 : vector<2x32xi32>
    %292 = arith.extui %291 : vector<2x32xi1> to vector<2x32xi32>
    %293 = arith.sitofp %292 : vector<2x32xi32> to vector<2x32xf32>
    %cst_116 = arith.constant dense<0.000000e+00> : vector<2x16xf32>
    %294 = tpu.matmul %293, %265, %cst_116 {dimension_numbers = #tpu.dot_dimension_numbers<[1], [0], [0], [1], [0, 0, 1, 1], [], []>} : vector<2x32xf32>, vector<32x16xf32>, vector<2x16xf32> -> vector<2x16xf32>
    %c32 = arith.constant 32 : index
    %c256_117 = arith.constant 256 : index
    %295 = vector.load %arg7[%c32, %c256_117] : memref<256x384xbf16, #tpu.memory_space<vmem>>, vector<16x32xbf16>
    %296 = arith.truncf %294 : vector<2x16xf32> to vector<2x16xbf16>
    %cst_118 = arith.constant dense<0.000000e+00> : vector<2x32xf32>
    %297 = tpu.matmul %296, %295, %cst_118 {dimension_numbers = #tpu.dot_dimension_numbers<[1], [0], [0], [1], [0, 0, 1, 1], [], []>} : vector<2x16xbf16>, vector<16x32xbf16>, vector<2x32xf32> -> vector<2x32xf32>
    %298 = arith.addf %289, %297 : vector<2x32xf32>
    %c6_i32 = arith.constant 6 : i32
    %299 = vector.broadcast %c6_i32 : i32 to vector<2x32xi32>
    %300 = arith.cmpi eq, %268, %299 : vector<2x32xi32>
    %301 = arith.extui %300 : vector<2x32xi1> to vector<2x32xi32>
    %302 = arith.sitofp %301 : vector<2x32xi32> to vector<2x32xf32>
    %cst_119 = arith.constant dense<0.000000e+00> : vector<2x16xf32>
    %303 = tpu.matmul %302, %265, %cst_119 {dimension_numbers = #tpu.dot_dimension_numbers<[1], [0], [0], [1], [0, 0, 1, 1], [], []>} : vector<2x32xf32>, vector<32x16xf32>, vector<2x16xf32> -> vector<2x16xf32>
    %c48 = arith.constant 48 : index
    %c256_120 = arith.constant 256 : index
    %304 = vector.load %arg7[%c48, %c256_120] : memref<256x384xbf16, #tpu.memory_space<vmem>>, vector<16x32xbf16>
    %305 = arith.truncf %303 : vector<2x16xf32> to vector<2x16xbf16>
    %cst_121 = arith.constant dense<0.000000e+00> : vector<2x32xf32>
    %306 = tpu.matmul %305, %304, %cst_121 {dimension_numbers = #tpu.dot_dimension_numbers<[1], [0], [0], [1], [0, 0, 1, 1], [], []>} : vector<2x16xbf16>, vector<16x32xbf16>, vector<2x32xf32> -> vector<2x32xf32>
    %307 = arith.addf %298, %306 : vector<2x32xf32>
    %c8_i32_122 = arith.constant 8 : i32
    %308 = vector.broadcast %c8_i32_122 : i32 to vector<2x32xi32>
    %309 = arith.cmpi eq, %268, %308 : vector<2x32xi32>
    %310 = arith.extui %309 : vector<2x32xi1> to vector<2x32xi32>
    %311 = arith.sitofp %310 : vector<2x32xi32> to vector<2x32xf32>
    %cst_123 = arith.constant dense<0.000000e+00> : vector<2x16xf32>
    %312 = tpu.matmul %311, %265, %cst_123 {dimension_numbers = #tpu.dot_dimension_numbers<[1], [0], [0], [1], [0, 0, 1, 1], [], []>} : vector<2x32xf32>, vector<32x16xf32>, vector<2x16xf32> -> vector<2x16xf32>
    %c64 = arith.constant 64 : index
    %c256_124 = arith.constant 256 : index
    %313 = vector.load %arg7[%c64, %c256_124] : memref<256x384xbf16, #tpu.memory_space<vmem>>, vector<16x32xbf16>
    %314 = arith.truncf %312 : vector<2x16xf32> to vector<2x16xbf16>
    %cst_125 = arith.constant dense<0.000000e+00> : vector<2x32xf32>
    %315 = tpu.matmul %314, %313, %cst_125 {dimension_numbers = #tpu.dot_dimension_numbers<[1], [0], [0], [1], [0, 0, 1, 1], [], []>} : vector<2x16xbf16>, vector<16x32xbf16>, vector<2x32xf32> -> vector<2x32xf32>
    %316 = arith.addf %307, %315 : vector<2x32xf32>
    %c10_i32 = arith.constant 10 : i32
    %317 = vector.broadcast %c10_i32 : i32 to vector<2x32xi32>
    %318 = arith.cmpi eq, %268, %317 : vector<2x32xi32>
    %319 = arith.extui %318 : vector<2x32xi1> to vector<2x32xi32>
    %320 = arith.sitofp %319 : vector<2x32xi32> to vector<2x32xf32>
    %cst_126 = arith.constant dense<0.000000e+00> : vector<2x16xf32>
    %321 = tpu.matmul %320, %265, %cst_126 {dimension_numbers = #tpu.dot_dimension_numbers<[1], [0], [0], [1], [0, 0, 1, 1], [], []>} : vector<2x32xf32>, vector<32x16xf32>, vector<2x16xf32> -> vector<2x16xf32>
    %c80 = arith.constant 80 : index
    %c256_127 = arith.constant 256 : index
    %322 = vector.load %arg7[%c80, %c256_127] : memref<256x384xbf16, #tpu.memory_space<vmem>>, vector<16x32xbf16>
    %323 = arith.truncf %321 : vector<2x16xf32> to vector<2x16xbf16>
    %cst_128 = arith.constant dense<0.000000e+00> : vector<2x32xf32>
    %324 = tpu.matmul %323, %322, %cst_128 {dimension_numbers = #tpu.dot_dimension_numbers<[1], [0], [0], [1], [0, 0, 1, 1], [], []>} : vector<2x16xbf16>, vector<16x32xbf16>, vector<2x32xf32> -> vector<2x32xf32>
    %325 = arith.addf %316, %324 : vector<2x32xf32>
    %c12_i32 = arith.constant 12 : i32
    %326 = vector.broadcast %c12_i32 : i32 to vector<2x32xi32>
    %327 = arith.cmpi eq, %268, %326 : vector<2x32xi32>
    %328 = arith.extui %327 : vector<2x32xi1> to vector<2x32xi32>
    %329 = arith.sitofp %328 : vector<2x32xi32> to vector<2x32xf32>
    %cst_129 = arith.constant dense<0.000000e+00> : vector<2x16xf32>
    %330 = tpu.matmul %329, %265, %cst_129 {dimension_numbers = #tpu.dot_dimension_numbers<[1], [0], [0], [1], [0, 0, 1, 1], [], []>} : vector<2x32xf32>, vector<32x16xf32>, vector<2x16xf32> -> vector<2x16xf32>
    %c96 = arith.constant 96 : index
    %c256_130 = arith.constant 256 : index
    %331 = vector.load %arg7[%c96, %c256_130] : memref<256x384xbf16, #tpu.memory_space<vmem>>, vector<16x32xbf16>
    %332 = arith.truncf %330 : vector<2x16xf32> to vector<2x16xbf16>
    %cst_131 = arith.constant dense<0.000000e+00> : vector<2x32xf32>
    %333 = tpu.matmul %332, %331, %cst_131 {dimension_numbers = #tpu.dot_dimension_numbers<[1], [0], [0], [1], [0, 0, 1, 1], [], []>} : vector<2x16xbf16>, vector<16x32xbf16>, vector<2x32xf32> -> vector<2x32xf32>
    %334 = arith.addf %325, %333 : vector<2x32xf32>
    %c14_i32 = arith.constant 14 : i32
    %335 = vector.broadcast %c14_i32 : i32 to vector<2x32xi32>
    %336 = arith.cmpi eq, %268, %335 : vector<2x32xi32>
    %337 = arith.extui %336 : vector<2x32xi1> to vector<2x32xi32>
    %338 = arith.sitofp %337 : vector<2x32xi32> to vector<2x32xf32>
    %cst_132 = arith.constant dense<0.000000e+00> : vector<2x16xf32>
    %339 = tpu.matmul %338, %265, %cst_132 {dimension_numbers = #tpu.dot_dimension_numbers<[1], [0], [0], [1], [0, 0, 1, 1], [], []>} : vector<2x32xf32>, vector<32x16xf32>, vector<2x16xf32> -> vector<2x16xf32>
    %c112 = arith.constant 112 : index
    %c256_133 = arith.constant 256 : index
    %340 = vector.load %arg7[%c112, %c256_133] : memref<256x384xbf16, #tpu.memory_space<vmem>>, vector<16x32xbf16>
    %341 = arith.truncf %339 : vector<2x16xf32> to vector<2x16xbf16>
    %cst_134 = arith.constant dense<0.000000e+00> : vector<2x32xf32>
    %342 = tpu.matmul %341, %340, %cst_134 {dimension_numbers = #tpu.dot_dimension_numbers<[1], [0], [0], [1], [0, 0, 1, 1], [], []>} : vector<2x16xbf16>, vector<16x32xbf16>, vector<2x32xf32> -> vector<2x32xf32>
    %343 = arith.addf %334, %342 : vector<2x32xf32>
    %c16_i32 = arith.constant 16 : i32
    %344 = vector.broadcast %c16_i32 : i32 to vector<2x32xi32>
    %345 = arith.cmpi eq, %268, %344 : vector<2x32xi32>
    %346 = arith.extui %345 : vector<2x32xi1> to vector<2x32xi32>
    %347 = arith.sitofp %346 : vector<2x32xi32> to vector<2x32xf32>
    %cst_135 = arith.constant dense<0.000000e+00> : vector<2x16xf32>
    %348 = tpu.matmul %347, %265, %cst_135 {dimension_numbers = #tpu.dot_dimension_numbers<[1], [0], [0], [1], [0, 0, 1, 1], [], []>} : vector<2x32xf32>, vector<32x16xf32>, vector<2x16xf32> -> vector<2x16xf32>
    %c128_136 = arith.constant 128 : index
    %c256_137 = arith.constant 256 : index
    %349 = vector.load %arg7[%c128_136, %c256_137] : memref<256x384xbf16, #tpu.memory_space<vmem>>, vector<16x32xbf16>
    %350 = arith.truncf %348 : vector<2x16xf32> to vector<2x16xbf16>
    %cst_138 = arith.constant dense<0.000000e+00> : vector<2x32xf32>
    %351 = tpu.matmul %350, %349, %cst_138 {dimension_numbers = #tpu.dot_dimension_numbers<[1], [0], [0], [1], [0, 0, 1, 1], [], []>} : vector<2x16xbf16>, vector<16x32xbf16>, vector<2x32xf32> -> vector<2x32xf32>
    %352 = arith.addf %343, %351 : vector<2x32xf32>
    %c18_i32 = arith.constant 18 : i32
    %353 = vector.broadcast %c18_i32 : i32 to vector<2x32xi32>
    %354 = arith.cmpi eq, %268, %353 : vector<2x32xi32>
    %355 = arith.extui %354 : vector<2x32xi1> to vector<2x32xi32>
    %356 = arith.sitofp %355 : vector<2x32xi32> to vector<2x32xf32>
    %cst_139 = arith.constant dense<0.000000e+00> : vector<2x16xf32>
    %357 = tpu.matmul %356, %265, %cst_139 {dimension_numbers = #tpu.dot_dimension_numbers<[1], [0], [0], [1], [0, 0, 1, 1], [], []>} : vector<2x32xf32>, vector<32x16xf32>, vector<2x16xf32> -> vector<2x16xf32>
    %c144 = arith.constant 144 : index
    %c256_140 = arith.constant 256 : index
    %358 = vector.load %arg7[%c144, %c256_140] : memref<256x384xbf16, #tpu.memory_space<vmem>>, vector<16x32xbf16>
    %359 = arith.truncf %357 : vector<2x16xf32> to vector<2x16xbf16>
    %cst_141 = arith.constant dense<0.000000e+00> : vector<2x32xf32>
    %360 = tpu.matmul %359, %358, %cst_141 {dimension_numbers = #tpu.dot_dimension_numbers<[1], [0], [0], [1], [0, 0, 1, 1], [], []>} : vector<2x16xbf16>, vector<16x32xbf16>, vector<2x32xf32> -> vector<2x32xf32>
    %361 = arith.addf %352, %360 : vector<2x32xf32>
    %c20_i32 = arith.constant 20 : i32
    %362 = vector.broadcast %c20_i32 : i32 to vector<2x32xi32>
    %363 = arith.cmpi eq, %268, %362 : vector<2x32xi32>
    %364 = arith.extui %363 : vector<2x32xi1> to vector<2x32xi32>
    %365 = arith.sitofp %364 : vector<2x32xi32> to vector<2x32xf32>
    %cst_142 = arith.constant dense<0.000000e+00> : vector<2x16xf32>
    %366 = tpu.matmul %365, %265, %cst_142 {dimension_numbers = #tpu.dot_dimension_numbers<[1], [0], [0], [1], [0, 0, 1, 1], [], []>} : vector<2x32xf32>, vector<32x16xf32>, vector<2x16xf32> -> vector<2x16xf32>
    %c160 = arith.constant 160 : index
    %c256_143 = arith.constant 256 : index
    %367 = vector.load %arg7[%c160, %c256_143] : memref<256x384xbf16, #tpu.memory_space<vmem>>, vector<16x32xbf16>
    %368 = arith.truncf %366 : vector<2x16xf32> to vector<2x16xbf16>
    %cst_144 = arith.constant dense<0.000000e+00> : vector<2x32xf32>
    %369 = tpu.matmul %368, %367, %cst_144 {dimension_numbers = #tpu.dot_dimension_numbers<[1], [0], [0], [1], [0, 0, 1, 1], [], []>} : vector<2x16xbf16>, vector<16x32xbf16>, vector<2x32xf32> -> vector<2x32xf32>
    %370 = arith.addf %361, %369 : vector<2x32xf32>
    %c22_i32 = arith.constant 22 : i32
    %371 = vector.broadcast %c22_i32 : i32 to vector<2x32xi32>
    %372 = arith.cmpi eq, %268, %371 : vector<2x32xi32>
    %373 = arith.extui %372 : vector<2x32xi1> to vector<2x32xi32>
    %374 = arith.sitofp %373 : vector<2x32xi32> to vector<2x32xf32>
    %cst_145 = arith.constant dense<0.000000e+00> : vector<2x16xf32>
    %375 = tpu.matmul %374, %265, %cst_145 {dimension_numbers = #tpu.dot_dimension_numbers<[1], [0], [0], [1], [0, 0, 1, 1], [], []>} : vector<2x32xf32>, vector<32x16xf32>, vector<2x16xf32> -> vector<2x16xf32>
    %c176 = arith.constant 176 : index
    %c256_146 = arith.constant 256 : index
    %376 = vector.load %arg7[%c176, %c256_146] : memref<256x384xbf16, #tpu.memory_space<vmem>>, vector<16x32xbf16>
    %377 = arith.truncf %375 : vector<2x16xf32> to vector<2x16xbf16>
    %cst_147 = arith.constant dense<0.000000e+00> : vector<2x32xf32>
    %378 = tpu.matmul %377, %376, %cst_147 {dimension_numbers = #tpu.dot_dimension_numbers<[1], [0], [0], [1], [0, 0, 1, 1], [], []>} : vector<2x16xbf16>, vector<16x32xbf16>, vector<2x32xf32> -> vector<2x32xf32>
    %379 = arith.addf %370, %378 : vector<2x32xf32>
    %c24_i32 = arith.constant 24 : i32
    %380 = vector.broadcast %c24_i32 : i32 to vector<2x32xi32>
    %381 = arith.cmpi eq, %268, %380 : vector<2x32xi32>
    %382 = arith.extui %381 : vector<2x32xi1> to vector<2x32xi32>
    %383 = arith.sitofp %382 : vector<2x32xi32> to vector<2x32xf32>
    %cst_148 = arith.constant dense<0.000000e+00> : vector<2x16xf32>
    %384 = tpu.matmul %383, %265, %cst_148 {dimension_numbers = #tpu.dot_dimension_numbers<[1], [0], [0], [1], [0, 0, 1, 1], [], []>} : vector<2x32xf32>, vector<32x16xf32>, vector<2x16xf32> -> vector<2x16xf32>
    %c192 = arith.constant 192 : index
    %c256_149 = arith.constant 256 : index
    %385 = vector.load %arg7[%c192, %c256_149] : memref<256x384xbf16, #tpu.memory_space<vmem>>, vector<16x32xbf16>
    %386 = arith.truncf %384 : vector<2x16xf32> to vector<2x16xbf16>
    %cst_150 = arith.constant dense<0.000000e+00> : vector<2x32xf32>
    %387 = tpu.matmul %386, %385, %cst_150 {dimension_numbers = #tpu.dot_dimension_numbers<[1], [0], [0], [1], [0, 0, 1, 1], [], []>} : vector<2x16xbf16>, vector<16x32xbf16>, vector<2x32xf32> -> vector<2x32xf32>
    %388 = arith.addf %379, %387 : vector<2x32xf32>
    %c26_i32 = arith.constant 26 : i32
    %389 = vector.broadcast %c26_i32 : i32 to vector<2x32xi32>
    %390 = arith.cmpi eq, %268, %389 : vector<2x32xi32>
    %391 = arith.extui %390 : vector<2x32xi1> to vector<2x32xi32>
    %392 = arith.sitofp %391 : vector<2x32xi32> to vector<2x32xf32>
    %cst_151 = arith.constant dense<0.000000e+00> : vector<2x16xf32>
    %393 = tpu.matmul %392, %265, %cst_151 {dimension_numbers = #tpu.dot_dimension_numbers<[1], [0], [0], [1], [0, 0, 1, 1], [], []>} : vector<2x32xf32>, vector<32x16xf32>, vector<2x16xf32> -> vector<2x16xf32>
    %c208 = arith.constant 208 : index
    %c256_152 = arith.constant 256 : index
    %394 = vector.load %arg7[%c208, %c256_152] : memref<256x384xbf16, #tpu.memory_space<vmem>>, vector<16x32xbf16>
    %395 = arith.truncf %393 : vector<2x16xf32> to vector<2x16xbf16>
    %cst_153 = arith.constant dense<0.000000e+00> : vector<2x32xf32>
    %396 = tpu.matmul %395, %394, %cst_153 {dimension_numbers = #tpu.dot_dimension_numbers<[1], [0], [0], [1], [0, 0, 1, 1], [], []>} : vector<2x16xbf16>, vector<16x32xbf16>, vector<2x32xf32> -> vector<2x32xf32>
    %397 = arith.addf %388, %396 : vector<2x32xf32>
    %c28_i32 = arith.constant 28 : i32
    %398 = vector.broadcast %c28_i32 : i32 to vector<2x32xi32>
    %399 = arith.cmpi eq, %268, %398 : vector<2x32xi32>
    %400 = arith.extui %399 : vector<2x32xi1> to vector<2x32xi32>
    %401 = arith.sitofp %400 : vector<2x32xi32> to vector<2x32xf32>
    %cst_154 = arith.constant dense<0.000000e+00> : vector<2x16xf32>
    %402 = tpu.matmul %401, %265, %cst_154 {dimension_numbers = #tpu.dot_dimension_numbers<[1], [0], [0], [1], [0, 0, 1, 1], [], []>} : vector<2x32xf32>, vector<32x16xf32>, vector<2x16xf32> -> vector<2x16xf32>
    %c224 = arith.constant 224 : index
    %c256_155 = arith.constant 256 : index
    %403 = vector.load %arg7[%c224, %c256_155] : memref<256x384xbf16, #tpu.memory_space<vmem>>, vector<16x32xbf16>
    %404 = arith.truncf %402 : vector<2x16xf32> to vector<2x16xbf16>
    %cst_156 = arith.constant dense<0.000000e+00> : vector<2x32xf32>
    %405 = tpu.matmul %404, %403, %cst_156 {dimension_numbers = #tpu.dot_dimension_numbers<[1], [0], [0], [1], [0, 0, 1, 1], [], []>} : vector<2x16xbf16>, vector<16x32xbf16>, vector<2x32xf32> -> vector<2x32xf32>
    %406 = arith.addf %397, %405 : vector<2x32xf32>
    %c30_i32 = arith.constant 30 : i32
    %407 = vector.broadcast %c30_i32 : i32 to vector<2x32xi32>
    %408 = arith.cmpi eq, %268, %407 : vector<2x32xi32>
    %409 = arith.extui %408 : vector<2x32xi1> to vector<2x32xi32>
    %410 = arith.sitofp %409 : vector<2x32xi32> to vector<2x32xf32>
    %cst_157 = arith.constant dense<0.000000e+00> : vector<2x16xf32>
    %411 = tpu.matmul %410, %265, %cst_157 {dimension_numbers = #tpu.dot_dimension_numbers<[1], [0], [0], [1], [0, 0, 1, 1], [], []>} : vector<2x32xf32>, vector<32x16xf32>, vector<2x16xf32> -> vector<2x16xf32>
    %c240 = arith.constant 240 : index
    %c256_158 = arith.constant 256 : index
    %412 = vector.load %arg7[%c240, %c256_158] : memref<256x384xbf16, #tpu.memory_space<vmem>>, vector<16x32xbf16>
    %413 = arith.truncf %411 : vector<2x16xf32> to vector<2x16xbf16>
    %cst_159 = arith.constant dense<0.000000e+00> : vector<2x32xf32>
    %414 = tpu.matmul %413, %412, %cst_159 {dimension_numbers = #tpu.dot_dimension_numbers<[1], [0], [0], [1], [0, 0, 1, 1], [], []>} : vector<2x16xbf16>, vector<16x32xbf16>, vector<2x32xf32> -> vector<2x32xf32>
    %415 = arith.addf %406, %414 : vector<2x32xf32>
    %c0_160 = arith.constant 0 : index
    %c2048 = arith.constant 2048 : index
    %416 = vector.load %arg4[%c0_160, %c2048] : memref<1x4224xf32, #tpu.memory_space<vmem>>, vector<1x32xf32>
    %c0_161 = arith.constant 0 : index
    %c2176 = arith.constant 2176 : index
    %417 = vector.load %arg4[%c0_161, %c2176] : memref<1x4224xf32, #tpu.memory_space<vmem>>, vector<1x32xf32>
    %cst_162 = arith.constant dense<0.000000e+00> : vector<32xf32>
    %418 = vector.multi_reduction <add>, %415, %cst_162 [0] : vector<2x32xf32> to vector<32xf32>
    %419 = vector.shape_cast %418 : vector<32xf32> to vector<1x32xf32>
    %cst_163 = arith.constant 2.000000e+00 : f32
    %420 = vector.broadcast %cst_163 : f32 to vector<1x32xf32>
    %421 = arith.divf %419, %420 : vector<1x32xf32>
    %422 = vector.broadcast %421 : vector<1x32xf32> to vector<2x32xf32>
    %423 = arith.subf %415, %422 : vector<2x32xf32>
    %424 = arith.mulf %423, %423 : vector<2x32xf32>
    %cst_164 = arith.constant dense<0.000000e+00> : vector<32xf32>
    %425 = vector.multi_reduction <add>, %424, %cst_164 [0] : vector<2x32xf32> to vector<32xf32>
    %426 = vector.shape_cast %425 : vector<32xf32> to vector<1x32xf32>
    %cst_165 = arith.constant 2.000000e+00 : f32
    %427 = vector.broadcast %cst_165 : f32 to vector<1x32xf32>
    %428 = arith.divf %426, %427 : vector<1x32xf32>
    %429 = vector.broadcast %421 : vector<1x32xf32> to vector<2x32xf32>
    %430 = arith.subf %415, %429 : vector<2x32xf32>
    %cst_166 = arith.constant 9.99999974E-6 : f32
    %431 = vector.broadcast %cst_166 : f32 to vector<1x32xf32>
    %432 = arith.addf %428, %431 : vector<1x32xf32>
    %433 = math.rsqrt %432 : vector<1x32xf32>
    %434 = vector.broadcast %433 : vector<1x32xf32> to vector<2x32xf32>
    %435 = arith.mulf %430, %434 : vector<2x32xf32>
    %436 = vector.broadcast %416 : vector<1x32xf32> to vector<2x32xf32>
    %437 = arith.mulf %435, %436 : vector<2x32xf32>
    %438 = vector.broadcast %417 : vector<1x32xf32> to vector<2x32xf32>
    %439 = arith.addf %437, %438 : vector<2x32xf32>
    %cst_167 = arith.constant 0.000000e+00 : f32
    %440 = vector.broadcast %cst_167 : f32 to vector<2x32xf32>
    %441 = arith.maximumf %439, %440 : vector<2x32xf32>
    %c0_168 = arith.constant 0 : index
    %c768_169 = arith.constant 768 : index
    %442 = vector.load %arg6[%c0_168, %c768_169] : memref<32x1920xbf16, #tpu.memory_space<vmem>>, vector<32x96xbf16>
    %c0_170 = arith.constant 0 : index
    %c896 = arith.constant 896 : index
    %443 = vector.load %arg6[%c0_170, %c896] : memref<32x1920xbf16, #tpu.memory_space<vmem>>, vector<32x96xbf16>
    %c0_171 = arith.constant 0 : index
    %c2304 = arith.constant 2304 : index
    %444 = vector.load %arg4[%c0_171, %c2304] : memref<1x4224xf32, #tpu.memory_space<vmem>>, vector<1x128xf32>
    %445 = arith.truncf %441 : vector<2x32xf32> to vector<2x32xbf16>
    %cst_172 = arith.constant dense<0.000000e+00> : vector<2x96xf32>
    %446 = tpu.matmul %445, %442, %cst_172 {dimension_numbers = #tpu.dot_dimension_numbers<[1], [0], [0], [1], [0, 0, 1, 1], [], []>} : vector<2x32xbf16>, vector<32x96xbf16>, vector<2x96xf32> -> vector<2x96xf32>
    %447 = arith.truncf %1 : vector<2x32xf32> to vector<2x32xbf16>
    %cst_173 = arith.constant dense<0.000000e+00> : vector<2x96xf32>
    %448 = tpu.matmul %447, %443, %cst_173 {dimension_numbers = #tpu.dot_dimension_numbers<[1], [0], [0], [1], [0, 0, 1, 1], [], []>} : vector<2x32xbf16>, vector<32x96xbf16>, vector<2x96xf32> -> vector<2x96xf32>
    %449 = vector.extract_strided_slice %444 {offsets = [0, 0], sizes = [1, 64], strides = [1, 1]} : vector<1x128xf32> to vector<1x64xf32>
    %450 = vector.extract_strided_slice %444 {offsets = [0, 64], sizes = [1, 32], strides = [1, 1]} : vector<1x128xf32> to vector<1x32xf32>
    %451 = vector.extract_strided_slice %444 {offsets = [0, 96], sizes = [1, 32], strides = [1, 1]} : vector<1x128xf32> to vector<1x32xf32>
    %452 = vector.extract_strided_slice %446 {offsets = [0, 0], sizes = [2, 64], strides = [1, 1]} : vector<2x96xf32> to vector<2x64xf32>
    %453 = vector.extract_strided_slice %448 {offsets = [0, 0], sizes = [2, 64], strides = [1, 1]} : vector<2x96xf32> to vector<2x64xf32>
    %454 = arith.addf %452, %453 : vector<2x64xf32>
    %455 = vector.broadcast %449 : vector<1x64xf32> to vector<2x64xf32>
    %456 = arith.addf %454, %455 : vector<2x64xf32>
    %457 = arith.negf %456 : vector<2x64xf32>
    %458 = math.exp %457 : vector<2x64xf32>
    %cst_174 = arith.constant 1.000000e+00 : f32
    %459 = vector.broadcast %cst_174 : f32 to vector<2x64xf32>
    %460 = arith.addf %459, %458 : vector<2x64xf32>
    %461 = arith.divf %459, %460 : vector<2x64xf32>
    %462 = vector.extract_strided_slice %461 {offsets = [0, 0], sizes = [2, 32], strides = [1, 1]} : vector<2x64xf32> to vector<2x32xf32>
    %463 = vector.extract_strided_slice %461 {offsets = [0, 32], sizes = [2, 32], strides = [1, 1]} : vector<2x64xf32> to vector<2x32xf32>
    %464 = vector.extract_strided_slice %446 {offsets = [0, 64], sizes = [2, 32], strides = [1, 1]} : vector<2x96xf32> to vector<2x32xf32>
    %465 = vector.broadcast %450 : vector<1x32xf32> to vector<2x32xf32>
    %466 = arith.addf %464, %465 : vector<2x32xf32>
    %467 = vector.extract_strided_slice %448 {offsets = [0, 64], sizes = [2, 32], strides = [1, 1]} : vector<2x96xf32> to vector<2x32xf32>
    %468 = vector.broadcast %451 : vector<1x32xf32> to vector<2x32xf32>
    %469 = arith.addf %467, %468 : vector<2x32xf32>
    %470 = arith.mulf %462, %469 : vector<2x32xf32>
    %471 = arith.addf %466, %470 : vector<2x32xf32>
    %472 = math.tanh %471 : vector<2x32xf32>
    %cst_175 = arith.constant 1.000000e+00 : f32
    %473 = vector.broadcast %cst_175 : f32 to vector<2x32xf32>
    %474 = arith.subf %473, %463 : vector<2x32xf32>
    %475 = arith.mulf %474, %472 : vector<2x32xf32>
    %476 = arith.mulf %463, %1 : vector<2x32xf32>
    %477 = arith.addf %475, %476 : vector<2x32xf32>
    %c0_176 = arith.constant 0 : index
    %c1024_177 = arith.constant 1024 : index
    %478 = vector.load %arg6[%c0_176, %c1024_177] : memref<32x1920xbf16, #tpu.memory_space<vmem>>, vector<32x32xbf16>
    %479 = arith.truncf %441 : vector<2x32xf32> to vector<2x32xbf16>
    %cst_178 = arith.constant dense<0.000000e+00> : vector<2x32xf32>
    %480 = tpu.matmul %479, %478, %cst_178 {dimension_numbers = #tpu.dot_dimension_numbers<[1], [0], [0], [1], [0, 0, 1, 1], [], []>} : vector<2x32xbf16>, vector<32x32xbf16>, vector<2x32xf32> -> vector<2x32xf32>
    %c0_179 = arith.constant 0 : index
    %c1152_180 = arith.constant 1152 : index
    %481 = vector.load %arg6[%c0_179, %c1152_180] : memref<32x1920xbf16, #tpu.memory_space<vmem>>, vector<32x32xbf16>
    %482 = arith.truncf %1 : vector<2x32xf32> to vector<2x32xbf16>
    %cst_181 = arith.constant dense<0.000000e+00> : vector<2x32xf32>
    %483 = tpu.matmul %482, %481, %cst_181 {dimension_numbers = #tpu.dot_dimension_numbers<[1], [0], [0], [1], [0, 0, 1, 1], [], []>} : vector<2x32xbf16>, vector<32x32xbf16>, vector<2x32xf32> -> vector<2x32xf32>
    %484 = arith.addf %480, %483 : vector<2x32xf32>
    %c0_182 = arith.constant 0 : index
    %c2432 = arith.constant 2432 : index
    %485 = vector.load %arg4[%c0_182, %c2432] : memref<1x4224xf32, #tpu.memory_space<vmem>>, vector<1x32xf32>
    %c0_183 = arith.constant 0 : index
    %c2560 = arith.constant 2560 : index
    %486 = vector.load %arg4[%c0_183, %c2560] : memref<1x4224xf32, #tpu.memory_space<vmem>>, vector<1x32xf32>
    %cst_184 = arith.constant dense<0.000000e+00> : vector<32xf32>
    %487 = vector.multi_reduction <add>, %484, %cst_184 [0] : vector<2x32xf32> to vector<32xf32>
    %488 = vector.shape_cast %487 : vector<32xf32> to vector<1x32xf32>
    %cst_185 = arith.constant 2.000000e+00 : f32
    %489 = vector.broadcast %cst_185 : f32 to vector<1x32xf32>
    %490 = arith.divf %488, %489 : vector<1x32xf32>
    %491 = vector.broadcast %490 : vector<1x32xf32> to vector<2x32xf32>
    %492 = arith.subf %484, %491 : vector<2x32xf32>
    %493 = arith.mulf %492, %492 : vector<2x32xf32>
    %cst_186 = arith.constant dense<0.000000e+00> : vector<32xf32>
    %494 = vector.multi_reduction <add>, %493, %cst_186 [0] : vector<2x32xf32> to vector<32xf32>
    %495 = vector.shape_cast %494 : vector<32xf32> to vector<1x32xf32>
    %cst_187 = arith.constant 2.000000e+00 : f32
    %496 = vector.broadcast %cst_187 : f32 to vector<1x32xf32>
    %497 = arith.divf %495, %496 : vector<1x32xf32>
    %498 = vector.broadcast %490 : vector<1x32xf32> to vector<2x32xf32>
    %499 = arith.subf %484, %498 : vector<2x32xf32>
    %cst_188 = arith.constant 9.99999974E-6 : f32
    %500 = vector.broadcast %cst_188 : f32 to vector<1x32xf32>
    %501 = arith.addf %497, %500 : vector<1x32xf32>
    %502 = math.rsqrt %501 : vector<1x32xf32>
    %503 = vector.broadcast %502 : vector<1x32xf32> to vector<2x32xf32>
    %504 = arith.mulf %499, %503 : vector<2x32xf32>
    %505 = vector.broadcast %485 : vector<1x32xf32> to vector<2x32xf32>
    %506 = arith.mulf %504, %505 : vector<2x32xf32>
    %507 = vector.broadcast %486 : vector<1x32xf32> to vector<2x32xf32>
    %508 = arith.addf %506, %507 : vector<2x32xf32>
    %cst_189 = arith.constant 0.000000e+00 : f32
    %509 = vector.broadcast %cst_189 : f32 to vector<2x32xf32>
    %510 = arith.maximumf %508, %509 : vector<2x32xf32>
    %c0_190 = arith.constant 0 : index
    %c1280_191 = arith.constant 1280 : index
    %511 = vector.load %arg6[%c0_190, %c1280_191] : memref<32x1920xbf16, #tpu.memory_space<vmem>>, vector<32x32xbf16>
    %512 = arith.truncf %510 : vector<2x32xf32> to vector<2x32xbf16>
    %cst_192 = arith.constant dense<0.000000e+00> : vector<2x32xf32>
    %513 = tpu.matmul %512, %511, %cst_192 {dimension_numbers = #tpu.dot_dimension_numbers<[1], [0], [0], [1], [0, 0, 1, 1], [], []>} : vector<2x32xbf16>, vector<32x32xbf16>, vector<2x32xf32> -> vector<2x32xf32>
    %c0_193 = arith.constant 0 : index
    %c2688 = arith.constant 2688 : index
    %514 = vector.load %arg4[%c0_193, %c2688] : memref<1x4224xf32, #tpu.memory_space<vmem>>, vector<1x32xf32>
    %515 = vector.broadcast %514 : vector<1x32xf32> to vector<2x32xf32>
    %516 = arith.addf %513, %515 : vector<2x32xf32>
    %cst_194 = arith.constant -5.000000e+00 : f32
    %cst_195 = arith.constant 2.000000e+00 : f32
    %517 = vector.broadcast %cst_194 : f32 to vector<2x32xf32>
    %518 = arith.maximumf %517, %516 : vector<2x32xf32>
    %519 = vector.broadcast %cst_195 : f32 to vector<2x32xf32>
    %520 = arith.minimumf %519, %518 : vector<2x32xf32>
    %cst_196 = arith.constant 5.000000e-01 : f32
    %521 = vector.broadcast %cst_196 : f32 to vector<2x32xf32>
    %522 = arith.mulf %521, %520 : vector<2x32xf32>
    %523 = math.exp %522 : vector<2x32xf32>
    %524 = arith.mulf %2, %523 : vector<2x32xf32>
    %525 = arith.addf %477, %524 : vector<2x32xf32>
    %c0_197 = arith.constant 0 : index
    %c0_198 = arith.constant 0 : index
    %526 = vector.load %arg9[%c0_197, %c0_198] : memref<2x160xf32, #tpu.memory_space<vmem>>, vector<2x32xf32>
    tpu.vector_store %arg9[%c0_197, %c0_198], %125 {strides = array<i32>} : memref<2x160xf32, #tpu.memory_space<vmem>>, vector<2x32xf32>,
    %c0_199 = arith.constant 0 : index
    %c32_200 = arith.constant 32 : index
    %527 = vector.load %arg9[%c0_199, %c32_200] : memref<2x160xf32, #tpu.memory_space<vmem>>, vector<2x32xf32>
    tpu.vector_store %arg9[%c0_199, %c32_200], %164 {strides = array<i32>} : memref<2x160xf32, #tpu.memory_space<vmem>>, vector<2x32xf32>,
    %c0_201 = arith.constant 0 : index
    %c64_202 = arith.constant 64 : index
    %528 = vector.load %arg9[%c0_201, %c64_202] : memref<2x160xf32, #tpu.memory_space<vmem>>, vector<2x32xf32>
    tpu.vector_store %arg9[%c0_201, %c64_202], %477 {strides = array<i32>} : memref<2x160xf32, #tpu.memory_space<vmem>>, vector<2x32xf32>,
    %c0_203 = arith.constant 0 : index
    %c96_204 = arith.constant 96 : index
    %529 = vector.load %arg9[%c0_203, %c96_204] : memref<2x160xf32, #tpu.memory_space<vmem>>, vector<2x32xf32>
    tpu.vector_store %arg9[%c0_203, %c96_204], %520 {strides = array<i32>} : memref<2x160xf32, #tpu.memory_space<vmem>>, vector<2x32xf32>,
    %c0_205 = arith.constant 0 : index
    %c128_206 = arith.constant 128 : index
    %530 = vector.load %arg9[%c0_205, %c128_206] : memref<2x160xf32, #tpu.memory_space<vmem>>, vector<2x32xf32>
    tpu.vector_store %arg9[%c0_205, %c128_206], %525 {strides = array<i32>} : memref<2x160xf32, #tpu.memory_space<vmem>>, vector<2x32xf32>,
    %c0_207 = arith.constant 0 : index
    %c1408_208 = arith.constant 1408 : index
    %531 = vector.load %arg6[%c0_207, %c1408_208] : memref<32x1920xbf16, #tpu.memory_space<vmem>>, vector<32x256xbf16>
    %532 = arith.truncf %525 : vector<2x32xf32> to vector<2x32xbf16>
    %cst_209 = arith.constant dense<0.000000e+00> : vector<2x256xf32>
    %533 = tpu.matmul %532, %531, %cst_209 {dimension_numbers = #tpu.dot_dimension_numbers<[1], [0], [0], [1], [0, 0, 1, 1], [], []>} : vector<2x32xbf16>, vector<32x256xbf16>, vector<2x256xf32> -> vector<2x256xf32>
    %c0_210 = arith.constant 0 : index
    %c2816 = arith.constant 2816 : index
    %534 = vector.load %arg4[%c0_210, %c2816] : memref<1x4224xf32, #tpu.memory_space<vmem>>, vector<1x256xf32>
    %c0_211 = arith.constant 0 : index
    %c3072 = arith.constant 3072 : index
    %535 = vector.load %arg4[%c0_211, %c3072] : memref<1x4224xf32, #tpu.memory_space<vmem>>, vector<1x256xf32>
    %cst_212 = arith.constant dense<0.000000e+00> : vector<256xf32>
    %536 = vector.multi_reduction <add>, %533, %cst_212 [0] : vector<2x256xf32> to vector<256xf32>
    %537 = vector.shape_cast %536 : vector<256xf32> to vector<1x256xf32>
    %cst_213 = arith.constant 2.000000e+00 : f32
    %538 = vector.broadcast %cst_213 : f32 to vector<1x256xf32>
    %539 = arith.divf %537, %538 : vector<1x256xf32>
    %540 = vector.broadcast %539 : vector<1x256xf32> to vector<2x256xf32>
    %541 = arith.subf %533, %540 : vector<2x256xf32>
    %542 = arith.mulf %541, %541 : vector<2x256xf32>
    %cst_214 = arith.constant dense<0.000000e+00> : vector<256xf32>
    %543 = vector.multi_reduction <add>, %542, %cst_214 [0] : vector<2x256xf32> to vector<256xf32>
    %544 = vector.shape_cast %543 : vector<256xf32> to vector<1x256xf32>
    %cst_215 = arith.constant 2.000000e+00 : f32
    %545 = vector.broadcast %cst_215 : f32 to vector<1x256xf32>
    %546 = arith.divf %544, %545 : vector<1x256xf32>
    %547 = vector.broadcast %539 : vector<1x256xf32> to vector<2x256xf32>
    %548 = arith.subf %533, %547 : vector<2x256xf32>
    %cst_216 = arith.constant 9.99999974E-6 : f32
    %549 = vector.broadcast %cst_216 : f32 to vector<1x256xf32>
    %550 = arith.addf %546, %549 : vector<1x256xf32>
    %551 = math.rsqrt %550 : vector<1x256xf32>
    %552 = vector.broadcast %551 : vector<1x256xf32> to vector<2x256xf32>
    %553 = arith.mulf %548, %552 : vector<2x256xf32>
    %554 = vector.broadcast %534 : vector<1x256xf32> to vector<2x256xf32>
    %555 = arith.mulf %553, %554 : vector<2x256xf32>
    %556 = vector.broadcast %535 : vector<1x256xf32> to vector<2x256xf32>
    %557 = arith.addf %555, %556 : vector<2x256xf32>
    %cst_217 = arith.constant 0.000000e+00 : f32
    %558 = vector.broadcast %cst_217 : f32 to vector<2x256xf32>
    %559 = arith.maximumf %557, %558 : vector<2x256xf32>
    %560 = tpu.iota {dimensions = array<i32: 0>} : vector<32x2xi32>
    %561 = tpu.iota {dimensions = array<i32: 1>} : vector<32x2xi32>
    %562 = arith.subi %560, %561 : vector<32x2xi32>
    %cst_218 = arith.constant 0.000000e+00 : f32
    %563 = vector.broadcast %cst_218 : f32 to vector<32x16xf32>
    %c0_i32_219 = arith.constant 0 : i32
    %564 = vector.broadcast %c0_i32_219 : i32 to vector<32x2xi32>
    %565 = arith.cmpi eq, %562, %564 : vector<32x2xi32>
    %566 = arith.extui %565 : vector<32x2xi1> to vector<32x2xi32>
    %567 = arith.sitofp %566 : vector<32x2xi32> to vector<32x2xf32>
    %568 = vector.extract_strided_slice %559 {offsets = [0, 0], sizes = [2, 16], strides = [1, 1]} : vector<2x256xf32> to vector<2x16xf32>
    %cst_220 = arith.constant dense<0.000000e+00> : vector<32x16xf32>
    %569 = tpu.matmul %567, %568, %cst_220 {dimension_numbers = #tpu.dot_dimension_numbers<[1], [0], [0], [1], [0, 0, 1, 1], [], []>} : vector<32x2xf32>, vector<2x16xf32>, vector<32x16xf32> -> vector<32x16xf32>
    %570 = arith.addf %563, %569 : vector<32x16xf32>
    %c2_i32_221 = arith.constant 2 : i32
    %571 = vector.broadcast %c2_i32_221 : i32 to vector<32x2xi32>
    %572 = arith.cmpi eq, %562, %571 : vector<32x2xi32>
    %573 = arith.extui %572 : vector<32x2xi1> to vector<32x2xi32>
    %574 = arith.sitofp %573 : vector<32x2xi32> to vector<32x2xf32>
    %575 = vector.extract_strided_slice %559 {offsets = [0, 16], sizes = [2, 16], strides = [1, 1]} : vector<2x256xf32> to vector<2x16xf32>
    %cst_222 = arith.constant dense<0.000000e+00> : vector<32x16xf32>
    %576 = tpu.matmul %574, %575, %cst_222 {dimension_numbers = #tpu.dot_dimension_numbers<[1], [0], [0], [1], [0, 0, 1, 1], [], []>} : vector<32x2xf32>, vector<2x16xf32>, vector<32x16xf32> -> vector<32x16xf32>
    %577 = arith.addf %570, %576 : vector<32x16xf32>
    %c4_i32_223 = arith.constant 4 : i32
    %578 = vector.broadcast %c4_i32_223 : i32 to vector<32x2xi32>
    %579 = arith.cmpi eq, %562, %578 : vector<32x2xi32>
    %580 = arith.extui %579 : vector<32x2xi1> to vector<32x2xi32>
    %581 = arith.sitofp %580 : vector<32x2xi32> to vector<32x2xf32>
    %582 = vector.extract_strided_slice %559 {offsets = [0, 32], sizes = [2, 16], strides = [1, 1]} : vector<2x256xf32> to vector<2x16xf32>
    %cst_224 = arith.constant dense<0.000000e+00> : vector<32x16xf32>
    %583 = tpu.matmul %581, %582, %cst_224 {dimension_numbers = #tpu.dot_dimension_numbers<[1], [0], [0], [1], [0, 0, 1, 1], [], []>} : vector<32x2xf32>, vector<2x16xf32>, vector<32x16xf32> -> vector<32x16xf32>
    %584 = arith.addf %577, %583 : vector<32x16xf32>
    %c6_i32_225 = arith.constant 6 : i32
    %585 = vector.broadcast %c6_i32_225 : i32 to vector<32x2xi32>
    %586 = arith.cmpi eq, %562, %585 : vector<32x2xi32>
    %587 = arith.extui %586 : vector<32x2xi1> to vector<32x2xi32>
    %588 = arith.sitofp %587 : vector<32x2xi32> to vector<32x2xf32>
    %589 = vector.extract_strided_slice %559 {offsets = [0, 48], sizes = [2, 16], strides = [1, 1]} : vector<2x256xf32> to vector<2x16xf32>
    %cst_226 = arith.constant dense<0.000000e+00> : vector<32x16xf32>
    %590 = tpu.matmul %588, %589, %cst_226 {dimension_numbers = #tpu.dot_dimension_numbers<[1], [0], [0], [1], [0, 0, 1, 1], [], []>} : vector<32x2xf32>, vector<2x16xf32>, vector<32x16xf32> -> vector<32x16xf32>
    %591 = arith.addf %584, %590 : vector<32x16xf32>
    %c8_i32_227 = arith.constant 8 : i32
    %592 = vector.broadcast %c8_i32_227 : i32 to vector<32x2xi32>
    %593 = arith.cmpi eq, %562, %592 : vector<32x2xi32>
    %594 = arith.extui %593 : vector<32x2xi1> to vector<32x2xi32>
    %595 = arith.sitofp %594 : vector<32x2xi32> to vector<32x2xf32>
    %596 = vector.extract_strided_slice %559 {offsets = [0, 64], sizes = [2, 16], strides = [1, 1]} : vector<2x256xf32> to vector<2x16xf32>
    %cst_228 = arith.constant dense<0.000000e+00> : vector<32x16xf32>
    %597 = tpu.matmul %595, %596, %cst_228 {dimension_numbers = #tpu.dot_dimension_numbers<[1], [0], [0], [1], [0, 0, 1, 1], [], []>} : vector<32x2xf32>, vector<2x16xf32>, vector<32x16xf32> -> vector<32x16xf32>
    %598 = arith.addf %591, %597 : vector<32x16xf32>
    %c10_i32_229 = arith.constant 10 : i32
    %599 = vector.broadcast %c10_i32_229 : i32 to vector<32x2xi32>
    %600 = arith.cmpi eq, %562, %599 : vector<32x2xi32>
    %601 = arith.extui %600 : vector<32x2xi1> to vector<32x2xi32>
    %602 = arith.sitofp %601 : vector<32x2xi32> to vector<32x2xf32>
    %603 = vector.extract_strided_slice %559 {offsets = [0, 80], sizes = [2, 16], strides = [1, 1]} : vector<2x256xf32> to vector<2x16xf32>
    %cst_230 = arith.constant dense<0.000000e+00> : vector<32x16xf32>
    %604 = tpu.matmul %602, %603, %cst_230 {dimension_numbers = #tpu.dot_dimension_numbers<[1], [0], [0], [1], [0, 0, 1, 1], [], []>} : vector<32x2xf32>, vector<2x16xf32>, vector<32x16xf32> -> vector<32x16xf32>
    %605 = arith.addf %598, %604 : vector<32x16xf32>
    %c12_i32_231 = arith.constant 12 : i32
    %606 = vector.broadcast %c12_i32_231 : i32 to vector<32x2xi32>
    %607 = arith.cmpi eq, %562, %606 : vector<32x2xi32>
    %608 = arith.extui %607 : vector<32x2xi1> to vector<32x2xi32>
    %609 = arith.sitofp %608 : vector<32x2xi32> to vector<32x2xf32>
    %610 = vector.extract_strided_slice %559 {offsets = [0, 96], sizes = [2, 16], strides = [1, 1]} : vector<2x256xf32> to vector<2x16xf32>
    %cst_232 = arith.constant dense<0.000000e+00> : vector<32x16xf32>
    %611 = tpu.matmul %609, %610, %cst_232 {dimension_numbers = #tpu.dot_dimension_numbers<[1], [0], [0], [1], [0, 0, 1, 1], [], []>} : vector<32x2xf32>, vector<2x16xf32>, vector<32x16xf32> -> vector<32x16xf32>
    %612 = arith.addf %605, %611 : vector<32x16xf32>
    %c14_i32_233 = arith.constant 14 : i32
    %613 = vector.broadcast %c14_i32_233 : i32 to vector<32x2xi32>
    %614 = arith.cmpi eq, %562, %613 : vector<32x2xi32>
    %615 = arith.extui %614 : vector<32x2xi1> to vector<32x2xi32>
    %616 = arith.sitofp %615 : vector<32x2xi32> to vector<32x2xf32>
    %617 = vector.extract_strided_slice %559 {offsets = [0, 112], sizes = [2, 16], strides = [1, 1]} : vector<2x256xf32> to vector<2x16xf32>
    %cst_234 = arith.constant dense<0.000000e+00> : vector<32x16xf32>
    %618 = tpu.matmul %616, %617, %cst_234 {dimension_numbers = #tpu.dot_dimension_numbers<[1], [0], [0], [1], [0, 0, 1, 1], [], []>} : vector<32x2xf32>, vector<2x16xf32>, vector<32x16xf32> -> vector<32x16xf32>
    %619 = arith.addf %612, %618 : vector<32x16xf32>
    %c16_i32_235 = arith.constant 16 : i32
    %620 = vector.broadcast %c16_i32_235 : i32 to vector<32x2xi32>
    %621 = arith.cmpi eq, %562, %620 : vector<32x2xi32>
    %622 = arith.extui %621 : vector<32x2xi1> to vector<32x2xi32>
    %623 = arith.sitofp %622 : vector<32x2xi32> to vector<32x2xf32>
    %624 = vector.extract_strided_slice %559 {offsets = [0, 128], sizes = [2, 16], strides = [1, 1]} : vector<2x256xf32> to vector<2x16xf32>
    %cst_236 = arith.constant dense<0.000000e+00> : vector<32x16xf32>
    %625 = tpu.matmul %623, %624, %cst_236 {dimension_numbers = #tpu.dot_dimension_numbers<[1], [0], [0], [1], [0, 0, 1, 1], [], []>} : vector<32x2xf32>, vector<2x16xf32>, vector<32x16xf32> -> vector<32x16xf32>
    %626 = arith.addf %619, %625 : vector<32x16xf32>
    %c18_i32_237 = arith.constant 18 : i32
    %627 = vector.broadcast %c18_i32_237 : i32 to vector<32x2xi32>
    %628 = arith.cmpi eq, %562, %627 : vector<32x2xi32>
    %629 = arith.extui %628 : vector<32x2xi1> to vector<32x2xi32>
    %630 = arith.sitofp %629 : vector<32x2xi32> to vector<32x2xf32>
    %631 = vector.extract_strided_slice %559 {offsets = [0, 144], sizes = [2, 16], strides = [1, 1]} : vector<2x256xf32> to vector<2x16xf32>
    %cst_238 = arith.constant dense<0.000000e+00> : vector<32x16xf32>
    %632 = tpu.matmul %630, %631, %cst_238 {dimension_numbers = #tpu.dot_dimension_numbers<[1], [0], [0], [1], [0, 0, 1, 1], [], []>} : vector<32x2xf32>, vector<2x16xf32>, vector<32x16xf32> -> vector<32x16xf32>
    %633 = arith.addf %626, %632 : vector<32x16xf32>
    %c20_i32_239 = arith.constant 20 : i32
    %634 = vector.broadcast %c20_i32_239 : i32 to vector<32x2xi32>
    %635 = arith.cmpi eq, %562, %634 : vector<32x2xi32>
    %636 = arith.extui %635 : vector<32x2xi1> to vector<32x2xi32>
    %637 = arith.sitofp %636 : vector<32x2xi32> to vector<32x2xf32>
    %638 = vector.extract_strided_slice %559 {offsets = [0, 160], sizes = [2, 16], strides = [1, 1]} : vector<2x256xf32> to vector<2x16xf32>
    %cst_240 = arith.constant dense<0.000000e+00> : vector<32x16xf32>
    %639 = tpu.matmul %637, %638, %cst_240 {dimension_numbers = #tpu.dot_dimension_numbers<[1], [0], [0], [1], [0, 0, 1, 1], [], []>} : vector<32x2xf32>, vector<2x16xf32>, vector<32x16xf32> -> vector<32x16xf32>
    %640 = arith.addf %633, %639 : vector<32x16xf32>
    %c22_i32_241 = arith.constant 22 : i32
    %641 = vector.broadcast %c22_i32_241 : i32 to vector<32x2xi32>
    %642 = arith.cmpi eq, %562, %641 : vector<32x2xi32>
    %643 = arith.extui %642 : vector<32x2xi1> to vector<32x2xi32>
    %644 = arith.sitofp %643 : vector<32x2xi32> to vector<32x2xf32>
    %645 = vector.extract_strided_slice %559 {offsets = [0, 176], sizes = [2, 16], strides = [1, 1]} : vector<2x256xf32> to vector<2x16xf32>
    %cst_242 = arith.constant dense<0.000000e+00> : vector<32x16xf32>
    %646 = tpu.matmul %644, %645, %cst_242 {dimension_numbers = #tpu.dot_dimension_numbers<[1], [0], [0], [1], [0, 0, 1, 1], [], []>} : vector<32x2xf32>, vector<2x16xf32>, vector<32x16xf32> -> vector<32x16xf32>
    %647 = arith.addf %640, %646 : vector<32x16xf32>
    %c24_i32_243 = arith.constant 24 : i32
    %648 = vector.broadcast %c24_i32_243 : i32 to vector<32x2xi32>
    %649 = arith.cmpi eq, %562, %648 : vector<32x2xi32>
    %650 = arith.extui %649 : vector<32x2xi1> to vector<32x2xi32>
    %651 = arith.sitofp %650 : vector<32x2xi32> to vector<32x2xf32>
    %652 = vector.extract_strided_slice %559 {offsets = [0, 192], sizes = [2, 16], strides = [1, 1]} : vector<2x256xf32> to vector<2x16xf32>
    %cst_244 = arith.constant dense<0.000000e+00> : vector<32x16xf32>
    %653 = tpu.matmul %651, %652, %cst_244 {dimension_numbers = #tpu.dot_dimension_numbers<[1], [0], [0], [1], [0, 0, 1, 1], [], []>} : vector<32x2xf32>, vector<2x16xf32>, vector<32x16xf32> -> vector<32x16xf32>
    %654 = arith.addf %647, %653 : vector<32x16xf32>
    %c26_i32_245 = arith.constant 26 : i32
    %655 = vector.broadcast %c26_i32_245 : i32 to vector<32x2xi32>
    %656 = arith.cmpi eq, %562, %655 : vector<32x2xi32>
    %657 = arith.extui %656 : vector<32x2xi1> to vector<32x2xi32>
    %658 = arith.sitofp %657 : vector<32x2xi32> to vector<32x2xf32>
    %659 = vector.extract_strided_slice %559 {offsets = [0, 208], sizes = [2, 16], strides = [1, 1]} : vector<2x256xf32> to vector<2x16xf32>
    %cst_246 = arith.constant dense<0.000000e+00> : vector<32x16xf32>
    %660 = tpu.matmul %658, %659, %cst_246 {dimension_numbers = #tpu.dot_dimension_numbers<[1], [0], [0], [1], [0, 0, 1, 1], [], []>} : vector<32x2xf32>, vector<2x16xf32>, vector<32x16xf32> -> vector<32x16xf32>
    %661 = arith.addf %654, %660 : vector<32x16xf32>
    %c28_i32_247 = arith.constant 28 : i32
    %662 = vector.broadcast %c28_i32_247 : i32 to vector<32x2xi32>
    %663 = arith.cmpi eq, %562, %662 : vector<32x2xi32>
    %664 = arith.extui %663 : vector<32x2xi1> to vector<32x2xi32>
    %665 = arith.sitofp %664 : vector<32x2xi32> to vector<32x2xf32>
    %666 = vector.extract_strided_slice %559 {offsets = [0, 224], sizes = [2, 16], strides = [1, 1]} : vector<2x256xf32> to vector<2x16xf32>
    %cst_248 = arith.constant dense<0.000000e+00> : vector<32x16xf32>
    %667 = tpu.matmul %665, %666, %cst_248 {dimension_numbers = #tpu.dot_dimension_numbers<[1], [0], [0], [1], [0, 0, 1, 1], [], []>} : vector<32x2xf32>, vector<2x16xf32>, vector<32x16xf32> -> vector<32x16xf32>
    %668 = arith.addf %661, %667 : vector<32x16xf32>
    %c30_i32_249 = arith.constant 30 : i32
    %669 = vector.broadcast %c30_i32_249 : i32 to vector<32x2xi32>
    %670 = arith.cmpi eq, %562, %669 : vector<32x2xi32>
    %671 = arith.extui %670 : vector<32x2xi1> to vector<32x2xi32>
    %672 = arith.sitofp %671 : vector<32x2xi32> to vector<32x2xf32>
    %673 = vector.extract_strided_slice %559 {offsets = [0, 240], sizes = [2, 16], strides = [1, 1]} : vector<2x256xf32> to vector<2x16xf32>
    %cst_250 = arith.constant dense<0.000000e+00> : vector<32x16xf32>
    %674 = tpu.matmul %672, %673, %cst_250 {dimension_numbers = #tpu.dot_dimension_numbers<[1], [0], [0], [1], [0, 0, 1, 1], [], []>} : vector<32x2xf32>, vector<2x16xf32>, vector<32x16xf32> -> vector<32x16xf32>
    %675 = arith.addf %668, %674 : vector<32x16xf32>
    %c0_251 = arith.constant 0 : index
    %c512_252 = arith.constant 512 : index
    %676 = vector.load %arg5[%c0_251, %c512_252] : memref<16x640xbf16, #tpu.memory_space<vmem>>, vector<16x32xbf16>
    %677 = arith.truncf %675 : vector<32x16xf32> to vector<32x16xbf16>
    %cst_253 = arith.constant dense<0.000000e+00> : vector<32x32xf32>
    %678 = tpu.matmul %677, %676, %cst_253 {dimension_numbers = #tpu.dot_dimension_numbers<[1], [0], [0], [1], [0, 0, 1, 1], [], []>} : vector<32x16xbf16>, vector<16x32xbf16>, vector<32x32xf32> -> vector<32x32xf32>
    %c0_254 = arith.constant 0 : index
    %c3328 = arith.constant 3328 : index
    %679 = vector.load %arg4[%c0_254, %c3328] : memref<1x4224xf32, #tpu.memory_space<vmem>>, vector<1x32xf32>
    %680 = vector.broadcast %679 : vector<1x32xf32> to vector<32x32xf32>
    %681 = arith.addf %678, %680 : vector<32x32xf32>
    %c0_255 = arith.constant 0 : index
    %c3456 = arith.constant 3456 : index
    %682 = vector.load %arg4[%c0_255, %c3456] : memref<1x4224xf32, #tpu.memory_space<vmem>>, vector<1x32xf32>
    %c0_256 = arith.constant 0 : index
    %c3584 = arith.constant 3584 : index
    %683 = vector.load %arg4[%c0_256, %c3584] : memref<1x4224xf32, #tpu.memory_space<vmem>>, vector<1x32xf32>
    %684 = tpu.iota {dimensions = array<i32: 0>} : vector<32x32xi32>
    %685 = tpu.iota {dimensions = array<i32: 1>} : vector<32x32xi32>
    %c8_i32_257 = arith.constant 8 : i32
    %c0_i32_258 = arith.constant 0 : i32
    %686 = arith.cmpi eq, %c8_i32_257, %c0_i32_258 : i32
    %c1_i32_259 = arith.constant 1 : i32
    %687 = arith.select %686, %c1_i32_259, %c8_i32_257 : i32
    %688 = vector.broadcast %687 : i32 to vector<32x32xi32>
    %689 = arith.remsi %684, %688 : vector<32x32xi32>
    %c0_i32_260 = arith.constant 0 : i32
    %690 = vector.broadcast %c0_i32_260 : i32 to vector<32x32xi32>
    %691 = arith.cmpi ne, %689, %690 : vector<32x32xi32>
    %c0_i32_261 = arith.constant 0 : i32
    %692 = vector.broadcast %c0_i32_261 : i32 to vector<32x32xi32>
    %693 = arith.cmpi slt, %689, %692 : vector<32x32xi32>
    %c0_i32_262 = arith.constant 0 : i32
    %694 = arith.cmpi slt, %687, %c0_i32_262 : i32
    %695 = vector.broadcast %694 : i1 to vector<32x32xi1>
    %696 = vector.broadcast %695 : vector<32x32xi1> to vector<32x32xi1>
    %697 = arith.xori %693, %696 : vector<32x32xi1>
    %698 = arith.andi %697, %691 : vector<32x32xi1>
    %699 = vector.broadcast %687 : i32 to vector<32x32xi32>
    %700 = arith.addi %689, %699 : vector<32x32xi32>
    %701 = arith.select %698, %700, %689 : vector<32x32xi1>, vector<32x32xi32>
    %c8_i32_263 = arith.constant 8 : i32
    %c0_i32_264 = arith.constant 0 : i32
    %702 = arith.cmpi eq, %c8_i32_263, %c0_i32_264 : i32
    %c1_i32_265 = arith.constant 1 : i32
    %703 = arith.select %702, %c1_i32_265, %c8_i32_263 : i32
    %704 = vector.broadcast %703 : i32 to vector<32x32xi32>
    %705 = arith.remsi %685, %704 : vector<32x32xi32>
    %c0_i32_266 = arith.constant 0 : i32
    %706 = vector.broadcast %c0_i32_266 : i32 to vector<32x32xi32>
    %707 = arith.cmpi ne, %705, %706 : vector<32x32xi32>
    %c0_i32_267 = arith.constant 0 : i32
    %708 = vector.broadcast %c0_i32_267 : i32 to vector<32x32xi32>
    %709 = arith.cmpi slt, %705, %708 : vector<32x32xi32>
    %c0_i32_268 = arith.constant 0 : i32
    %710 = arith.cmpi slt, %703, %c0_i32_268 : i32
    %711 = vector.broadcast %710 : i1 to vector<32x32xi1>
    %712 = vector.broadcast %711 : vector<32x32xi1> to vector<32x32xi1>
    %713 = arith.xori %709, %712 : vector<32x32xi1>
    %714 = arith.andi %713, %707 : vector<32x32xi1>
    %715 = vector.broadcast %703 : i32 to vector<32x32xi32>
    %716 = arith.addi %705, %715 : vector<32x32xi32>
    %717 = arith.select %714, %716, %705 : vector<32x32xi1>, vector<32x32xi32>
    %718 = arith.cmpi eq, %701, %717 : vector<32x32xi32>
    %cst_269 = arith.constant 2.500000e-01 : f32
    %cst_270 = arith.constant 0.000000e+00 : f32
    %719 = vector.broadcast %cst_269 : f32 to vector<32x32xf32>
    %720 = vector.broadcast %cst_270 : f32 to vector<32x32xf32>
    %721 = arith.select %718, %719, %720 : vector<32x32xi1>, vector<32x32xf32>
    %cst_271 = arith.constant dense<0.000000e+00> : vector<32xf32>
    %722 = vector.multi_reduction <add>, %681, %cst_271 [0] : vector<32x32xf32> to vector<32xf32>
    %723 = vector.shape_cast %722 : vector<32xf32> to vector<1x32xf32>
    %cst_272 = arith.constant 3.200000e+01 : f32
    %724 = vector.broadcast %cst_272 : f32 to vector<1x32xf32>
    %725 = arith.divf %723, %724 : vector<1x32xf32>
    %726 = arith.mulf %681, %681 : vector<32x32xf32>
    %cst_273 = arith.constant dense<0.000000e+00> : vector<32xf32>
    %727 = vector.multi_reduction <add>, %726, %cst_273 [0] : vector<32x32xf32> to vector<32xf32>
    %728 = vector.shape_cast %727 : vector<32xf32> to vector<1x32xf32>
    %cst_274 = arith.constant 3.200000e+01 : f32
    %729 = vector.broadcast %cst_274 : f32 to vector<1x32xf32>
    %730 = arith.divf %728, %729 : vector<1x32xf32>
    %cst_275 = arith.constant dense<0.000000e+00> : vector<1x32xf32>
    %731 = tpu.matmul %725, %721, %cst_275 {dimension_numbers = #tpu.dot_dimension_numbers<[1], [0], [0], [1], [0, 0, 1, 1], [], []>} : vector<1x32xf32>, vector<32x32xf32>, vector<1x32xf32> -> vector<1x32xf32>
    %cst_276 = arith.constant dense<0.000000e+00> : vector<1x32xf32>
    %732 = tpu.matmul %730, %721, %cst_276 {dimension_numbers = #tpu.dot_dimension_numbers<[1], [0], [0], [1], [0, 0, 1, 1], [], []>} : vector<1x32xf32>, vector<32x32xf32>, vector<1x32xf32> -> vector<1x32xf32>
    %733 = arith.mulf %731, %731 : vector<1x32xf32>
    %734 = arith.subf %732, %733 : vector<1x32xf32>
    %cst_277 = arith.constant 0.000000e+00 : f32
    %735 = vector.broadcast %cst_277 : f32 to vector<1x32xf32>
    %736 = arith.maximumf %734, %735 : vector<1x32xf32>
    %737 = vector.broadcast %731 : vector<1x32xf32> to vector<32x32xf32>
    %738 = arith.subf %681, %737 : vector<32x32xf32>
    %cst_278 = arith.constant 9.99999974E-6 : f32
    %739 = vector.broadcast %cst_278 : f32 to vector<1x32xf32>
    %740 = arith.addf %736, %739 : vector<1x32xf32>
    %741 = math.rsqrt %740 : vector<1x32xf32>
    %742 = vector.broadcast %741 : vector<1x32xf32> to vector<32x32xf32>
    %743 = arith.mulf %738, %742 : vector<32x32xf32>
    %744 = vector.broadcast %682 : vector<1x32xf32> to vector<32x32xf32>
    %745 = arith.mulf %743, %744 : vector<32x32xf32>
    %746 = vector.broadcast %683 : vector<1x32xf32> to vector<32x32xf32>
    %747 = arith.addf %745, %746 : vector<32x32xf32>
    %cst_279 = arith.constant 0.000000e+00 : f32
    %748 = vector.broadcast %cst_279 : f32 to vector<32x32xf32>
    %749 = arith.maximumf %747, %748 : vector<32x32xf32>
    %c0_280 = arith.constant 0 : index
    %c1792_281 = arith.constant 1792 : index
    %750 = vector.load %arg6[%c0_280, %c1792_281] : memref<32x1920xbf16, #tpu.memory_space<vmem>>, vector<32x128xbf16>
    %751 = arith.truncf %749 : vector<32x32xf32> to vector<32x32xbf16>
    %cst_282 = arith.constant dense<0.000000e+00> : vector<32x128xf32>
    %752 = tpu.matmul %751, %750, %cst_282 {dimension_numbers = #tpu.dot_dimension_numbers<[1], [0], [0], [1], [0, 0, 1, 1], [], []>} : vector<32x32xbf16>, vector<32x128xbf16>, vector<32x128xf32> -> vector<32x128xf32>
    %c0_283 = arith.constant 0 : index
    %c3712 = arith.constant 3712 : index
    %753 = vector.load %arg4[%c0_283, %c3712] : memref<1x4224xf32, #tpu.memory_space<vmem>>, vector<1x128xf32>
    %754 = vector.broadcast %753 : vector<1x128xf32> to vector<32x128xf32>
    %755 = arith.addf %752, %754 : vector<32x128xf32>
    %c0_284 = arith.constant 0 : index
    %c3840 = arith.constant 3840 : index
    %756 = vector.load %arg4[%c0_284, %c3840] : memref<1x4224xf32, #tpu.memory_space<vmem>>, vector<1x128xf32>
    %c0_285 = arith.constant 0 : index
    %c3968 = arith.constant 3968 : index
    %757 = vector.load %arg4[%c0_285, %c3968] : memref<1x4224xf32, #tpu.memory_space<vmem>>, vector<1x128xf32>
    %758 = tpu.iota {dimensions = array<i32: 0>} : vector<128x128xi32>
    %759 = tpu.iota {dimensions = array<i32: 1>} : vector<128x128xi32>
    %c8_i32_286 = arith.constant 8 : i32
    %c0_i32_287 = arith.constant 0 : i32
    %760 = arith.cmpi eq, %c8_i32_286, %c0_i32_287 : i32
    %c1_i32_288 = arith.constant 1 : i32
    %761 = arith.select %760, %c1_i32_288, %c8_i32_286 : i32
    %762 = vector.broadcast %761 : i32 to vector<128x128xi32>
    %763 = arith.remsi %758, %762 : vector<128x128xi32>
    %c0_i32_289 = arith.constant 0 : i32
    %764 = vector.broadcast %c0_i32_289 : i32 to vector<128x128xi32>
    %765 = arith.cmpi ne, %763, %764 : vector<128x128xi32>
    %c0_i32_290 = arith.constant 0 : i32
    %766 = vector.broadcast %c0_i32_290 : i32 to vector<128x128xi32>
    %767 = arith.cmpi slt, %763, %766 : vector<128x128xi32>
    %c0_i32_291 = arith.constant 0 : i32
    %768 = arith.cmpi slt, %761, %c0_i32_291 : i32
    %769 = vector.broadcast %768 : i1 to vector<128x128xi1>
    %770 = vector.broadcast %769 : vector<128x128xi1> to vector<128x128xi1>
    %771 = arith.xori %767, %770 : vector<128x128xi1>
    %772 = arith.andi %771, %765 : vector<128x128xi1>
    %773 = vector.broadcast %761 : i32 to vector<128x128xi32>
    %774 = arith.addi %763, %773 : vector<128x128xi32>
    %775 = arith.select %772, %774, %763 : vector<128x128xi1>, vector<128x128xi32>
    %c8_i32_292 = arith.constant 8 : i32
    %c0_i32_293 = arith.constant 0 : i32
    %776 = arith.cmpi eq, %c8_i32_292, %c0_i32_293 : i32
    %c1_i32_294 = arith.constant 1 : i32
    %777 = arith.select %776, %c1_i32_294, %c8_i32_292 : i32
    %778 = vector.broadcast %777 : i32 to vector<128x128xi32>
    %779 = arith.remsi %759, %778 : vector<128x128xi32>
    %c0_i32_295 = arith.constant 0 : i32
    %780 = vector.broadcast %c0_i32_295 : i32 to vector<128x128xi32>
    %781 = arith.cmpi ne, %779, %780 : vector<128x128xi32>
    %c0_i32_296 = arith.constant 0 : i32
    %782 = vector.broadcast %c0_i32_296 : i32 to vector<128x128xi32>
    %783 = arith.cmpi slt, %779, %782 : vector<128x128xi32>
    %c0_i32_297 = arith.constant 0 : i32
    %784 = arith.cmpi slt, %777, %c0_i32_297 : i32
    %785 = vector.broadcast %784 : i1 to vector<128x128xi1>
    %786 = vector.broadcast %785 : vector<128x128xi1> to vector<128x128xi1>
    %787 = arith.xori %783, %786 : vector<128x128xi1>
    %788 = arith.andi %787, %781 : vector<128x128xi1>
    %789 = vector.broadcast %777 : i32 to vector<128x128xi32>
    %790 = arith.addi %779, %789 : vector<128x128xi32>
    %791 = arith.select %788, %790, %779 : vector<128x128xi1>, vector<128x128xi32>
    %792 = arith.cmpi eq, %775, %791 : vector<128x128xi32>
    %cst_298 = arith.constant 6.250000e-02 : f32
    %cst_299 = arith.constant 0.000000e+00 : f32
    %793 = vector.broadcast %cst_298 : f32 to vector<128x128xf32>
    %794 = vector.broadcast %cst_299 : f32 to vector<128x128xf32>
    %795 = arith.select %792, %793, %794 : vector<128x128xi1>, vector<128x128xf32>
    %cst_300 = arith.constant dense<0.000000e+00> : vector<128xf32>
    %796 = vector.multi_reduction <add>, %755, %cst_300 [0] : vector<32x128xf32> to vector<128xf32>
    %797 = vector.shape_cast %796 : vector<128xf32> to vector<1x128xf32>
    %cst_301 = arith.constant 3.200000e+01 : f32
    %798 = vector.broadcast %cst_301 : f32 to vector<1x128xf32>
    %799 = arith.divf %797, %798 : vector<1x128xf32>
    %800 = arith.mulf %755, %755 : vector<32x128xf32>
    %cst_302 = arith.constant dense<0.000000e+00> : vector<128xf32>
    %801 = vector.multi_reduction <add>, %800, %cst_302 [0] : vector<32x128xf32> to vector<128xf32>
    %802 = vector.shape_cast %801 : vector<128xf32> to vector<1x128xf32>
    %cst_303 = arith.constant 3.200000e+01 : f32
    %803 = vector.broadcast %cst_303 : f32 to vector<1x128xf32>
    %804 = arith.divf %802, %803 : vector<1x128xf32>
    %cst_304 = arith.constant dense<0.000000e+00> : vector<1x128xf32>
    %805 = tpu.matmul %799, %795, %cst_304 {dimension_numbers = #tpu.dot_dimension_numbers<[1], [0], [0], [1], [0, 0, 1, 1], [], []>} : vector<1x128xf32>, vector<128x128xf32>, vector<1x128xf32> -> vector<1x128xf32>
    %cst_305 = arith.constant dense<0.000000e+00> : vector<1x128xf32>
    %806 = tpu.matmul %804, %795, %cst_305 {dimension_numbers = #tpu.dot_dimension_numbers<[1], [0], [0], [1], [0, 0, 1, 1], [], []>} : vector<1x128xf32>, vector<128x128xf32>, vector<1x128xf32> -> vector<1x128xf32>
    %807 = arith.mulf %805, %805 : vector<1x128xf32>
    %808 = arith.subf %806, %807 : vector<1x128xf32>
    %cst_306 = arith.constant 0.000000e+00 : f32
    %809 = vector.broadcast %cst_306 : f32 to vector<1x128xf32>
    %810 = arith.maximumf %808, %809 : vector<1x128xf32>
    %811 = vector.broadcast %805 : vector<1x128xf32> to vector<32x128xf32>
    %812 = arith.subf %755, %811 : vector<32x128xf32>
    %cst_307 = arith.constant 9.99999974E-6 : f32
    %813 = vector.broadcast %cst_307 : f32 to vector<1x128xf32>
    %814 = arith.addf %810, %813 : vector<1x128xf32>
    %815 = math.rsqrt %814 : vector<1x128xf32>
    %816 = vector.broadcast %815 : vector<1x128xf32> to vector<32x128xf32>
    %817 = arith.mulf %812, %816 : vector<32x128xf32>
    %818 = vector.broadcast %756 : vector<1x128xf32> to vector<32x128xf32>
    %819 = arith.mulf %817, %818 : vector<32x128xf32>
    %820 = vector.broadcast %757 : vector<1x128xf32> to vector<32x128xf32>
    %821 = arith.addf %819, %820 : vector<32x128xf32>
    %cst_308 = arith.constant 0.000000e+00 : f32
    %822 = vector.broadcast %cst_308 : f32 to vector<32x128xf32>
    %823 = arith.maximumf %821, %822 : vector<32x128xf32>
    %c64_309 = arith.constant 64 : index
    %c0_310 = arith.constant 0 : index
    %824 = vector.load %arg8[%c64_309, %c0_310] : memref<192x128xbf16, #tpu.memory_space<vmem>>, vector<128x128xbf16>
    %825 = arith.truncf %823 : vector<32x128xf32> to vector<32x128xbf16>
    %cst_311 = arith.constant dense<0.000000e+00> : vector<32x128xf32>
    %826 = tpu.matmul %825, %824, %cst_311 {dimension_numbers = #tpu.dot_dimension_numbers<[1], [0], [0], [1], [0, 0, 1, 1], [], []>} : vector<32x128xbf16>, vector<128x128xbf16>, vector<32x128xf32> -> vector<32x128xf32>
    %c0_312 = arith.constant 0 : index
    %c4096 = arith.constant 4096 : index
    %827 = vector.load %arg4[%c0_312, %c4096] : memref<1x4224xf32, #tpu.memory_space<vmem>>, vector<1x128xf32>
    %828 = vector.broadcast %827 : vector<1x128xf32> to vector<32x128xf32>
    %829 = arith.addf %826, %828 : vector<32x128xf32>
    %830 = tpu.iota {dimensions = array<i32: 1>} : vector<32x128xi32>
    %c8_i32_313 = arith.constant 8 : i32
    %c0_i32_314 = arith.constant 0 : i32
    %831 = arith.cmpi eq, %c8_i32_313, %c0_i32_314 : i32
    %c1_i32_315 = arith.constant 1 : i32
    %832 = arith.select %831, %c1_i32_315, %c8_i32_313 : i32
    %833 = vector.broadcast %832 : i32 to vector<32x128xi32>
    %834 = arith.remsi %830, %833 : vector<32x128xi32>
    %c0_i32_316 = arith.constant 0 : i32
    %835 = vector.broadcast %c0_i32_316 : i32 to vector<32x128xi32>
    %836 = arith.cmpi ne, %834, %835 : vector<32x128xi32>
    %c0_i32_317 = arith.constant 0 : i32
    %837 = vector.broadcast %c0_i32_317 : i32 to vector<32x128xi32>
    %838 = arith.cmpi slt, %834, %837 : vector<32x128xi32>
    %c0_i32_318 = arith.constant 0 : i32
    %839 = arith.cmpi slt, %832, %c0_i32_318 : i32
    %840 = vector.broadcast %839 : i1 to vector<32x128xi1>
    %841 = vector.broadcast %840 : vector<32x128xi1> to vector<32x128xi1>
    %842 = arith.xori %838, %841 : vector<32x128xi1>
    %843 = arith.andi %842, %836 : vector<32x128xi1>
    %844 = vector.broadcast %832 : i32 to vector<32x128xi32>
    %845 = arith.addi %834, %844 : vector<32x128xi32>
    %846 = arith.select %843, %845, %834 : vector<32x128xi1>, vector<32x128xi32>
    %c3_i32 = arith.constant 3 : i32
    %847 = vector.broadcast %c3_i32 : i32 to vector<32x128xi32>
    %848 = arith.cmpi slt, %846, %847 : vector<32x128xi32>
    %849 = arith.negf %829 : vector<32x128xf32>
    %850 = math.exp %849 : vector<32x128xf32>
    %cst_319 = arith.constant 1.000000e+00 : f32
    %851 = vector.broadcast %cst_319 : f32 to vector<32x128xf32>
    %852 = arith.addf %851, %850 : vector<32x128xf32>
    %853 = arith.divf %851, %852 : vector<32x128xf32>
    %cst_320 = arith.constant -5.000000e+00 : f32
    %cst_321 = arith.constant 2.000000e+00 : f32
    %854 = vector.broadcast %cst_320 : f32 to vector<32x128xf32>
    %855 = arith.maximumf %854, %829 : vector<32x128xf32>
    %856 = vector.broadcast %cst_321 : f32 to vector<32x128xf32>
    %857 = arith.minimumf %856, %855 : vector<32x128xf32>
    %858 = arith.select %848, %853, %857 : vector<32x128xi1>, vector<32x128xf32>
    %c0_322 = arith.constant 0 : index
    %c0_323 = arith.constant 0 : index
    %859 = vector.load %arg10[%c0_322, %c0_323] : memref<32x128xf32, #tpu.memory_space<vmem>>, vector<32x128xf32>
    tpu.vector_store %arg10[%c0_322, %c0_323], %858 {strides = array<i32>} : memref<32x128xf32, #tpu.memory_space<vmem>>, vector<32x128xf32>,
    return
  }
}

</mosaic_0001>

<bundles_post_ra>
// kernel: vrnn_forward.1
= control target key start
LH: loop header
LB: loop body
LE: loop exit
PB: predicated region body
PF: predicated region fallthrough
CT: control target
= control target key end

     0   :  { %vm51_vm0 = vcmask 1041408   ;;  %v8671_v0 = vmov 0.0   ;;  %vm8672_vm1 = vmmov 0   ;;  %vm47_vm2 = vcmask 31744   ;;  %s8674_s30 = smov 80   ;;  %s8675_s11 = smov 112   ;;  %s10202_s8 = inlined_call_operand.vmem [shape: bf16[192,128], index: 8, kind: input, shape index: {}]   ;;  %s10203_s0 = inlined_call_operand.vmem [shape: f32[2,4], index: 0, kind: input, shape index: {}]   ;;  %s10204_s6 = inlined_call_operand.vmem [shape: bf16[32,1920], index: 6, kind: input, shape index: {}]   ;;  %s10205_s1 = inlined_call_operand.vmem [shape: f32[2,32], index: 1, kind: input, shape index: {}]   ;;  %s10206_s5 = inlined_call_operand.vmem [shape: bf16[16,640], index: 5, kind: input, shape index: {}]   ;;  %s10207_s4 = inlined_call_operand.vmem [shape: f32[1,4224], index: 4, kind: input, shape index: {}]   ;;  %s10208_s7 = inlined_call_operand.vmem [shape: bf16[256,384], index: 7, kind: input, shape index: {}]   ;;  %s10209_s3 = inlined_call_operand.vmem [shape: f32[32,48], index: 3, kind: input, shape index: {}]   ;;  %s10210_s2 = inlined_call_operand.vmem [shape: f32[2,32], index: 2, kind: input, shape index: {}]   ;;  %s10211_s9 = inlined_call_operand.vmem [shape: f32[2,160], index: 9, kind: output, shape index: {0}]   ;;  %s10212_s10 = inlined_call_operand.vmem [shape: f32[32,128], index: 10, kind: output, shape index: {1}]  }
   0x1   :  { %7844 = vmatprep.subr.bf16.mxu0 %v8671_v0  ;;  %v38_v1 = vld [vmem:[%s10202_s8] sm:$0x3]  ;;  %7846 = vmatprep.mubr.msk.bf16.mxu0 %vm8672_vm1, %v8671_v0  ;;  %v8513_v5 = vld [vmem:[%s10204_s6 + $0x78] ss:$60 sps:$4 sm:$0xff]   ;;  %vm168_vm3 = vcmask 261120   ;;  %v8673_v11 = vmov 0  }
   0x2   :  { %v35_v2 = vld [vmem:[%s10203_s0] sm:$0x3]  ;;  %v53_v3 = vsel %vm51_vm0, %v38_v1, 0  ;;  %7850 = vmatprep.subr.bf16.mxu1 %v8671_v0  ;;  %7852 = vmatprep.mubr.msk.bf16.mxu1 %vm8672_vm1, %v8671_v0  ;;  %v8517_v9 = vld [vmem:[%s10206_s5 + $0x8] ss:$20 sps:$4 sm:$0xff]   ;;  %vm112_vm4 = vcmask 130048  }
   0x3   :  { %v39_v4 = vpack.c.bf16 %v35_v2, %v35_v2  ;;  %7845 = vmatpush3.bf16.msra.mxu0 %v53_v3  ;;  %v8514_v6 = vld [vmem:[%s10204_s6] ss:$60 sps:$4 sm:$0xff]   ;;  %v8515_v10 = vld [vmem:[%s10206_s5 + $0x4] ss:$20 sps:$4 sm:$0xff]   ;;  %vm10213_vm5 = vcmask 254976   ;;  %vm1097_vm6 = vcmask 392192  }
   0x4   :  { %7856 = vmatprep.subr.bf16.mxu0 %v8671_v0  ;;  %v8762_v7 = vld [vmem:[%s10205_s1] sm:$0x3]  ;;  %v8519_v29 = vld [vmem:[%s10204_s6 + $0x7c] ss:$60 sps:$4 sm:$0xff]   ;;  %v7158_v58 = vld [vmem:[%s10207_s4 + $0x2] ss:$0 sm:$0xff] }
   0x5   :  { %v8769_v8 = vpack.c.bf16 %v8762_v7, %v8762_v7  ;;  %v8518_v12 = vld [vmem:[%s10206_s5] ss:$20 sps:$4 sm:$0xff]   ;;  %v8526_v2 = vld [vmem:[%s10204_s6 + $0xc] ss:$60 sps:$4 sm:$0xff]   ;;  %s8677_s29 = smov 96   ;;  %s8678_s28 = smov 64  }
   0x6   :  { %7847 = vmatmul.mubr.msk.bf16.vlgmr.msra.gmra.mxu0 %vm47_vm2, %v39_v4  ;;  %7851 = vmatpush3.bf16.msra.mxu1 %v8518_v12  ;;  %v7150_v13 = vld [vmem:[%s10207_s4] ss:$0 sm:$0xff]  ;;  %v7157_v56 = vld [vmem:[%s10207_s4 + $0x1] ss:$0 sm:$0xff]  ;;  %v8524_v3 = vld [vmem:[%s10204_s6 + $0x8] ss:$60 sps:$4 sm:$0xff]  }
   0x7   :  { %7857 = vmatpush3.bf16.msra.mxu0 %v8513_v5  ;;  %7860 = vmatprep.mubr.msk.bf16.mxu0 %vm8672_vm1, %v8671_v0  ;;  %v8520_v30 = vld [vmem:[%s10204_s6 + $0x4] ss:$60 sps:$4 sm:$0xff]   ;;  %s8679_s14 = smov 32   ;;  %s8680_s23 = smov 48  }
   0x8   :  { %7858 = vmatprep.subr.bf16.mxu0 %v8671_v0  ;;  %7864 = vmatprep.subr.bf16.mxu1 %v8671_v0  ;;  %v8521_v63 = vld [vmem:[%s10204_s6 + $0x80] ss:$60 sps:$4 sm:$0xff]   ;;  %s8681_s24 = smov 16  }
   0x9   :  { %v8523_v1 = vld [vmem:[%s10204_s6 + $0x84] ss:$60 sps:$4 sm:$0xff]  }
   0xa   :  { %v7159_v4 = vld [vmem:[%s10207_s4 + $0x3] ss:$0 sm:$0xff] }
   0xb   :  { %7859 = vmatpush3.bf16.msra.mxu0 %v8514_v6 }
   0xc   :  { %360 = vmatprep.subr.bf16.mxu0 %v8517_v9 }
   0xe   :  { %7861 = vmatmul.mubr.msk.bf16.vlgmr.msra.gmra.mxu0 %vm168_vm3, %v8769_v8 }
   0xf   :  { %361 = vmatpush1.bf16.msra.mxu0 %v8515_v10  ;;  %378 = vmatprep.mubr.bf16.mxu0 %v8673_v11 }
  0xc6   :  { %v89_v14 = vpop.f32.mrf.mxu0 }
  0xc7   :  { %v90_v15 = vadd.f32 %v7150_v13, %v89_v14 }
  0xc8   :  { %v7848_v16 = vpop.f32.mrf.mxu0 }
  0xc9   :  { %v102_v17 = vpack.c.bf16 %v90_v15, %v90_v15 }
  0xca   :  { %v92_v18 = vpop.f32.mrf.mxu0 }
  0xcb   :  { %104 = vrot.lane.b32.xlu0 %v102_v17, %s8674_s30  ;;  %7166 = vmatmul.mubr.msk.bf16.vlgmr.msra.gmra.mxu0 %vm112_vm4, %v102_v17 }
  0xcc   :  { %v7849_v19 = vpop.f32.mrf.mxu0 }
  0xcd   :  { %v8527_v19 = vld [vmem:[%s10204_s6 + $0x88] ss:$60 sps:$4 sm:$0xff]  }
  0xce   :  { %v206_v20 = vpop.f32.mrf.mxu0 }
  0xcf   :  { %1726 = vrot.lane.b32.xlu0 %v102_v17, %s8675_s11 }
  0xd0   :  { %v7862_v21 = vpop.f32.mrf.mxu0 }
  0xd1   :  { %v8530_v21 = vld [vmem:[%s10208_s7 + $0x168] ss:$12 sps:$4 sm:$0xff]  }
  0xd2   :  { %v209_v22 = vpop.f32.mrf.mxu0  ;;  %7505 = vmatprep.subr.bf16.mxu0 %v8530_v21 }
  0xd3   :  { %v8531_v22 = vld [vmem:[%s10208_s7 + $0xac] ss:$12 sps:$4 sm:$0xff]  }
  0xd4   :  { %v7863_v23 = vpop.f32.mrf.mxu0 }
  0xd5   :  { %v8532_v23 = vld [vmem:[%s10208_s7 + $0xa8] ss:$12 sps:$4 sm:$0xff]  }
  0xd6   :  { %7506 = vmatpush3.bf16.msra.mxu0 %v8532_v23 }
 0x13d   :  { %v105_v24 = vpop.permute.xlu0 %104 }
 0x13e   :  { %7853 = vmatmul.mubr.msk.bf16.vlgmr.msra.gmra.mxu1 %vm112_vm4, %v105_v24  ;;  %v8533_v24 = vld [vmem:[%s10208_s7 + $0x154] ss:$12 sps:$4 sm:$0xff]  }
 0x13f   :  { %7868 = vmatprep.mubr.msk.bf16.mxu1 %vm8672_vm1, %v8671_v0  ;;  %7865 = vmatpush3.bf16.msra.mxu1 %v8519_v29  ;;  %v8536_v29 = vld [vmem:[%s10208_s7 + $0x90] ss:$12 sps:$4 sm:$0xff]  }
 0x140   :  { %7866 = vmatprep.subr.bf16.mxu1 %v8671_v0 }
 0x143   :  { %7867 = vmatpush3.bf16.msra.mxu1 %v8520_v30  ;;  %v8537_v30 = vld [vmem:[%s10208_s7 + $0x13c] ss:$12 sps:$4 sm:$0xff]  }
 0x144   :  { %422 = vmatprep.subr.bf16.mxu1 %v8523_v1 }
 0x18b   :  { %v8793_v25 = vpop.f32.mrf.mxu0 }
 0x18d   :  { %v8795_v26 = vpop.f32.mrf.mxu0 }
 0x18f   :  { %v384_v27 = vpop.f32.mrf.mxu0 }
 0x190   :  { %v8534_v27 = vld [vmem:[%s10208_s7 + $0x150] ss:$12 sps:$4 sm:$0xff]  }
 0x191   :  { %v385_v28 = vpop.f32.mrf.mxu0  ;;  %7507 = vmatprep.subr.bf16.mxu0 %v8534_v27 }
 0x192   :  { %v8535_v28 = vld [vmem:[%s10208_s7 + $0x94] ss:$12 sps:$4 sm:$0xff]   ;;  %7508 = vmatpush3.bf16.msra.mxu0 %v8536_v29 }
 0x1fe   :  { %v150_v31 = vpop.f32.mrf.mxu1 }
 0x1ff   :  { %v207_v32 = vadd.f32 %v206_v20, %v150_v31  ;;  %v8528_v20 = vld [vmem:[%s10204_s6 + $0x10] ss:$60 sps:$4 sm:$0xff]   ;;  %v8538_v31 = vld [vmem:[%s10208_s7 + $0x138] ss:$12 sps:$4 sm:$0xff]  }
 0x200   :  { %v7854_v33 = vpop.f32.mrf.mxu1  ;;  %7509 = vmatprep.subr.bf16.mxu0 %v8538_v31 }
 0x201   :  { %v215_v34 = vsel %vm10213_vm5, %v207_v32, 0.0  ;;  %v8540_v33 = vld [vmem:[%s10208_s7 + $0x78] ss:$12 sps:$4 sm:$0xff]  }
 0x202   :  { %v216_v35 = vrot.slane %v215_v34, 4  ;;  %v153_v36 = vpop.f32.mrf.mxu1  ;;  %7510 = vmatpush3.bf16.msra.mxu0 %v8540_v33 }
 0x203   :  { %v8543_v36 = vld [vmem:[%s10208_s7 + $0x64] ss:$12 sps:$4 sm:$0xff]  }
 0x204   :  { %v217_v37 = vadd.f32 %v216_v35, %v215_v34  ;;  %v7855_v38 = vpop.f32.mrf.mxu1  ;;  %v8541_v34 = vld [vmem:[%s10208_s7 + $0x124] ss:$12 sps:$4 sm:$0xff]   ;;  %v8542_v35 = vld [vmem:[%s10208_s7 + $0x120] ss:$12 sps:$4 sm:$0xff]  }
 0x205   :  { %7511 = vmatprep.subr.bf16.mxu0 %v8542_v35  ;;  %v8545_v38 = vld [vmem:[%s10208_s7 + $0x10c] ss:$12 sps:$4 sm:$0xff]  }
 0x206   :  { %v218_v39 = vrot.slane %v217_v37, 2 }
 0x208   :  { %v219_v40 = vadd.f32 %v218_v39, %v217_v37  ;;  %v8544_v37 = vld [vmem:[%s10208_s7 + $0x60] ss:$12 sps:$4 sm:$0xff]   ;;  %v8546_v39 = vld [vmem:[%s10208_s7 + $0x108] ss:$12 sps:$4 sm:$0xff]  }
 0x209   :  { %7512 = vmatpush3.bf16.msra.mxu0 %v8544_v37  ;;  %v496_v37 = vlaneseq }
 0x20a   :  { %v220_v41 = vrot.slane %v219_v40, 1  ;;  %7513 = vmatprep.subr.bf16.mxu0 %v8546_v39 }
 0x20b   :  { %v8952_v39 = vshrl.u32 %v496_v37, 7 }
 0x20c   :  { %v221_v42 = vadd.f32 %v220_v41, %v219_v40  ;;  %v8547_v40 = vld [vmem:[%s10208_s7 + $0x4c] ss:$12 sps:$4 sm:$0xff]   ;;  %v8548_v41 = vld [vmem:[%s10208_s7 + $0x48] ss:$12 sps:$4 sm:$0xff]  }
 0x20d   :  { %7514 = vmatpush3.bf16.msra.mxu0 %v8548_v41  ;;  %v451_v41 = vld [vmem:[%s10207_s4 + $0x4] sm:$0x3] }
 0x20e   :  { %v223_v43 = vmul.f32 0.5, %v221_v42  ;;  %v8549_v42 = vld [vmem:[%s10208_s7 + $0xf4] ss:$12 sps:$4 sm:$0xff]  }
 0x210   :  { %v224_v44 = vsub.f32 %v207_v32, %v223_v43  ;;  %v8539_v32 = vld [vmem:[%s10208_s7 + $0x7c] ss:$12 sps:$4 sm:$0xff]  }
 0x211   :  { %v8550_v43 = vld [vmem:[%s10208_s7 + $0xf0] ss:$12 sps:$4 sm:$0xff]  }
 0x212   :  { %v225_v45 = vmul.f32 %v224_v44, %v224_v44  ;;  %7515 = vmatprep.subr.bf16.mxu0 %v8550_v43  ;;  %v452_v43 = vld [vmem:[%s10207_s4 + $0x6] sm:$0x3] }
 0x214   :  { %v226_v46 = vsel %vm10213_vm5, %v225_v45, 0.0  ;;  %v8552_v45 = vld [vmem:[%s10208_s7 + $0x30] ss:$12 sps:$4 sm:$0xff]  }
 0x215   :  { %v227_v47 = vrot.slane %v226_v46, 4  ;;  %7516 = vmatpush3.bf16.msra.mxu0 %v8552_v45 }
 0x217   :  { %v228_v48 = vadd.f32 %v227_v47, %v226_v46  ;;  %v8553_v46 = vld [vmem:[%s10208_s7 + $0xdc] ss:$12 sps:$4 sm:$0xff]   ;;  %v8554_v47 = vld [vmem:[%s10208_s7 + $0xd8] ss:$12 sps:$4 sm:$0xff]  }
 0x218   :  { %7517 = vmatprep.subr.bf16.mxu0 %v8554_v47 }
 0x219   :  { %v229_v49 = vrot.slane %v228_v48, 2 }
 0x21b   :  { %v230_v50 = vadd.f32 %v229_v49, %v228_v48  ;;  %v8555_v48 = vld [vmem:[%s10208_s7 + $0x1c] ss:$12 sps:$4 sm:$0xff]   ;;  %v8556_v49 = vld [vmem:[%s10208_s7 + $0x18] ss:$12 sps:$4 sm:$0xff]  }
 0x21c   :  { %7518 = vmatpush3.bf16.msra.mxu0 %v8556_v49 }
 0x21d   :  { %v231_v51 = vrot.slane %v230_v50, 1 }
 0x21f   :  { %v232_v52 = vadd.f32 %v231_v51, %v230_v50  ;;  %v8557_v50 = vld [vmem:[%s10208_s7 + $0xc4] ss:$12 sps:$4 sm:$0xff]   ;;  %v8558_v51 = vld [vmem:[%s10208_s7 + $0xc0] ss:$12 sps:$4 sm:$0xff]  }
 0x220   :  { %7519 = vmatprep.subr.bf16.mxu0 %v8558_v51 }
 0x221   :  { %v233_v53 = vmul.f32 0.5, %v232_v52  ;;  %v8559_v52 = vld [vmem:[%s10208_s7 + $0x4] ss:$12 sps:$4 sm:$0xff]  }
 0x223   :  { %v234_v54 = vadd.f32 1e-05, %v233_v53  ;;  %v8560_v53 = vld [vmem:[%s10208_s7] ss:$12 sps:$4 sm:$0xff]  }
 0x224   :  { %7520 = vmatpush3.bf16.msra.mxu0 %v8560_v53 }
 0x225   :  { %8612 = vrsqrt.f32 %v234_v54  ;;  %v8942_v54 = vld [vmem:[%s10202_s8 + $0x18] sm:$0xff]   ;;  %7880 = vmatprep.subr.bf16.mxu0 %v8671_v0 }
 0x232   :  { %v8613_v55 = vpop.eup %8612 }
 0x233   :  { %v236_v57 = vmul.f32 %v8613_v55, %v224_v44  ;;  %v8551_v44 = vld [vmem:[%s10208_s7 + $0x34] ss:$12 sps:$4 sm:$0xff]  }
 0x235   :  { %v243_v59 = vmul.f32 %v7157_v56, %v236_v57 }
 0x237   :  { %v250_v60 = vadd.f32 %v7158_v58, %v243_v59 }
 0x239   :  { %v251_v61 = vmax.f32 %v250_v60, 0.0 }
 0x23b   :  { %v256_v62 = vpack.c.bf16 %v251_v61, %v251_v61 }
 0x23d   :  { %7869 = vmatmul.mubr.msk.bf16.vlgmr.msra.gmra.mxu1 %vm168_vm3, %v256_v62 }
 0x23e   :  { %442 = vmatprep.mubr.bf16.mxu1 %v8673_v11  ;;  %423 = vmatpush1.bf16.msra.mxu1 %v8521_v63 }
 0x23f   :  { %424 = vmatprep.subr.bf16.mxu1 %v8526_v2 }
 0x242   :  { %425 = vmatpush1.bf16.msra.mxu1 %v8524_v3 }
 0x243   :  { %7872 = vmatprep.subr.bf16.mxu1 %v8671_v0 }
 0x2fd   :  { %v313_v5 = vpop.f32.mrf.mxu1 }
 0x2fe   :  { %v314_v6 = vadd.f32 %v7159_v4, %v313_v5 }
 0x2ff   :  { %v7870_v9 = vpop.f32.mrf.mxu1 }
 0x300   :  { %v7163_v10 = vmul.f32 -1.442695, %v314_v6 }
 0x301   :  { %v316_v12 = vpop.f32.mrf.mxu1 }
 0x302   :  { %8614 = vpow2.f32 %v7163_v10 }
 0x303   :  { %v7871_v13 = vpop.f32.mrf.mxu1 }
 0x30f   :  { %v8615_v14 = vpop.eup %8614 }
 0x310   :  { %v322_v15 = vadd.f32 1.0, %v8615_v14 }
 0x312   :  { %8616 = vrcp.f32 %v322_v15 }
 0x31f   :  { %v8617_v16 = vpop.eup %8616 }
 0x320   :  { %v325_v17 = vmul.f32 %v8617_v16, %v8762_v7  ;;  %v8529_v7 = vld [vmem:[%s10208_s7 + $0x16c] ss:$12 sps:$4 sm:$0xff]  }
 0x322   :  { %v330_v18 = vpack.c.bf16 %v325_v17, %v325_v17 }
 0x324   :  { %7171 = vmatmul.mubr.msk.bf16.vlgmr.msra.gmra.mxu1 %vm168_vm3, %v330_v18 }
 0x325   :  { %7876 = vmatprep.mubr.msk.bf16.mxu1 %vm8672_vm1, %v8671_v0  ;;  %7873 = vmatpush3.bf16.msra.mxu1 %v8527_v19 }
 0x326   :  { %7874 = vmatprep.subr.bf16.mxu1 %v8671_v0 }
 0x329   :  { %7875 = vmatpush3.bf16.msra.mxu1 %v8528_v20 }
 0x32a   :  { %7530 = vmatprep.subr.bf16.mxu1 %v8529_v7 }
 0x32c   :  { %7877 = vmatmul.mubr.msk.bf16.vlgmr.msra.gmra.mxu1 %vm168_vm3, %v8769_v8 }
 0x32d   :  { %7531 = vmatpush3.bf16.msra.mxu1 %v8531_v22 }
 0x32e   :  { %7532 = vmatprep.subr.bf16.mxu1 %v8533_v24 }
 0x331   :  { %7533 = vmatpush3.bf16.msra.mxu1 %v8535_v28 }
 0x332   :  { %7534 = vmatprep.subr.bf16.mxu1 %v8537_v30 }
 0x335   :  { %7535 = vmatpush3.bf16.msra.mxu1 %v8539_v32 }
 0x336   :  { %7536 = vmatprep.subr.bf16.mxu1 %v8541_v34 }
 0x339   :  { %7537 = vmatpush3.bf16.msra.mxu1 %v8543_v36 }
 0x33a   :  { %7538 = vmatprep.subr.bf16.mxu1 %v8545_v38 }
 0x33d   :  { %7539 = vmatpush3.bf16.msra.mxu1 %v8547_v40  ;;  %v8955_v40 = vsub.s32 0, %v8952_v39 }
 0x33e   :  { %7540 = vmatprep.subr.bf16.mxu1 %v8549_v42  ;;  %v8961_v42 = vsub.s32 1, %v8952_v39 }
 0x340   :  { %v503_v47 = vrot.slane %v451_v41, %v8961_v42 }
 0x341   :  { %7541 = vmatpush3.bf16.msra.mxu1 %v8551_v44  ;;  %v499_v44 = vrot.slane %v451_v41, %v8955_v40 }
 0x342   :  { %7542 = vmatprep.subr.bf16.mxu1 %v8553_v46 }
 0x345   :  { %7543 = vmatpush3.bf16.msra.mxu1 %v8555_v48  ;;  %v512_v48 = vrot.slane %v452_v43, %v8955_v40 }
 0x346   :  { %7544 = vmatprep.subr.bf16.mxu1 %v8557_v50 }
 0x349   :  { %7545 = vmatpush3.bf16.msra.mxu1 %v8559_v52  ;;  %v516_v52 = vrot.slane %v452_v43, %v8961_v42 }
 0x34a   :  { %7888 = vmatprep.subr.bf16.mxu1 %v8942_v54 }
 0x3e4   :  { %v444_v55 = vpop.f32.mrf.mxu1 }
 0x3e5   :  { %v445_v56 = vadd.f32 %v444_v55, %v8793_v25 }
 0x3e6   :  { %v446_v57 = vpop.f32.mrf.mxu1 }
 0x3e7   :  { %v453_v58 = vsel %vm51_vm0, %v445_v56, 0.0  ;;  %v447_v59 = vadd.f32 %v446_v57, %v8795_v26 }
 0x3e8   :  { %v454_v60 = vrot.slane %v453_v58, 4  ;;  %v448_v61 = vpop.f32.mrf.mxu1 }
 0x3e9   :  { %v460_v62 = vsel %vm51_vm0, %v447_v59, 0.0 }
 0x3ea   :  { %v455_v63 = vadd.f32 %v454_v60, %v453_v58  ;;  %v461_v1 = vrot.slane %v460_v62, 4  ;;  %v449_v2 = vpop.f32.mrf.mxu1  ;;  %v1073_v58 = vld [vmem:[%s10209_s3] sm:$0xff] }
 0x3eb   :  { %v8563_v2 = vld [vmem:[%s10202_s8 + $0x8] sm:$0xff]  }
 0x3ec   :  { %v456_v3 = vrot.slane %v455_v63, 2  ;;  %v462_v4 = vadd.f32 %v461_v1, %v460_v62  ;;  %v8562_v1 = vld [vmem:[%s10202_s8 + $0x10] sm:$0xff]  }
 0x3ee   :  { %v457_v5 = vadd.f32 %v456_v3, %v455_v63  ;;  %v463_v6 = vrot.slane %v462_v4, 2  ;;  %v1075_v3 = vld [vmem:[%s10209_s3 + $0x10] sm:$0xff] }
 0x3f0   :  { %v458_v9 = vrot.slane %v457_v5, 1  ;;  %v464_v10 = vadd.f32 %v463_v6, %v462_v4  ;;  %v1076_v4 = vld [vmem:[%s10209_s3 + $0x18] sm:$0xff] }
 0x3f2   :  { %v459_v12 = vadd.f32 %v458_v9, %v457_v5  ;;  %v465_v25 = vrot.slane %v464_v10, 1  ;;  %v8996_v5 = vpop.f32.mrf.mxu1 }
 0x3f4   :  { %v467_v13 = vmul.f32 0.5, %v459_v12  ;;  %v466_v14 = vadd.f32 %v465_v25, %v464_v10  ;;  %v7878_v6 = vpop.f32.mrf.mxu1  ;;  %v8999_v12 = vadd.s32 24, %v8952_v39  ;;  %v9001_v25 = vand.u32 127, %v496_v37 }
 0x3f6   :  { %v469_v15 = vsub.f32 %v445_v56, %v467_v13  ;;  %v468_v16 = vmul.f32 0.5, %v466_v14  ;;  %v747_v9 = vpop.f32.mrf.mxu1  ;;  %v1187_v13 = vand.u32 7, %v8999_v12  ;;  %v9005_v14 = vand.u32 7, %v9001_v25 }
 0x3f8   :  { %v471_v26 = vmul.f32 %v469_v15, %v469_v15  ;;  %v470_v17 = vsub.f32 %v447_v59, %v468_v16  ;;  %v1074_v59 = vld [vmem:[%s10209_s3 + $0x8] sm:$0xff]  ;;  %v7879_v10 = vpop.f32.mrf.mxu1  ;;  %vm9011_vm7 = vcmp.eq.s32.totalorder %v1187_v13, %v9005_v14 }
 0x3f9   :  { %v1077_v62 = vpack.c.bf16 %v1074_v59, %v1073_v58 }
 0x3fa   :  { %v473_v18 = vsel %vm51_vm0, %v471_v26, 0.0  ;;  %v472_v19 = vmul.f32 %v470_v17, %v470_v17 }
 0x3fb   :  { %v474_v20 = vrot.slane %v473_v18, 4 }
 0x3fc   :  { %v480_v7 = vsel %vm51_vm0, %v472_v19, 0.0  ;;  %v7443_v19 = vld [vmem:[%s10207_s4 + $0x1d] ss:$0 sm:$0xff] }
 0x3fd   :  { %v475_v21 = vadd.f32 %v474_v20, %v473_v18  ;;  %v481_v22 = vrot.slane %v480_v7, 4  ;;  %v8676_v18 = vmov 0.25  }
 0x3ff   :  { %v476_v23 = vrot.slane %v475_v21, 2  ;;  %v482_v24 = vadd.f32 %v481_v22, %v480_v7 }
 0x401   :  { %v477_v27 = vadd.f32 %v476_v23, %v475_v21  ;;  %v483_v28 = vrot.slane %v482_v24, 2  ;;  %v1166_v21 = vand.u32 7, %v8952_v39  ;;  %v8564_v23 = vld [vmem:[%s10204_s6 + $0x8c] ss:$60 sps:$4 sm:$0xff]  }
 0x403   :  { %v478_v29 = vrot.slane %v477_v27, 1  ;;  %v484_v30 = vadd.f32 %v483_v28, %v482_v24  ;;  %vm9044_vm10 = vcmp.eq.s32.totalorder %v1166_v21, %v9005_v14  ;;  %v8565_v24 = vld [vmem:[%s10204_s6 + $0x14] ss:$60 sps:$4 sm:$0xff]  }
 0x405   :  { %v479_v31 = vadd.f32 %v478_v29, %v477_v27  ;;  %v485_v32 = vrot.slane %v484_v30, 1 }
 0x407   :  { %v487_v33 = vmul.f32 0.5, %v479_v31  ;;  %v486_v34 = vadd.f32 %v485_v32, %v484_v30 }
 0x409   :  { %v489_v35 = vadd.f32 1e-05, %v487_v33  ;;  %v488_v36 = vmul.f32 0.5, %v486_v34 }
 0x40b   :  { %8618 = vrsqrt.f32 %v489_v35  ;;  %v490_v38 = vadd.f32 1e-05, %v488_v36 }
 0x40d   :  { %8620 = vrsqrt.f32 %v490_v38 }
 0x418   :  { %v8619_v45 = vpop.eup %8618 }
 0x419   :  { %v493_v46 = vmul.f32 %v8619_v45, %v469_v15  ;;  %v9008_v15 = vadd.s32 16, %v8952_v39 }
 0x41a   :  { %v8621_v49 = vpop.eup %8620 }
 0x41b   :  { %v506_v50 = vmul.f32 %v499_v44, %v493_v46  ;;  %v494_v51 = vmul.f32 %v8621_v49, %v470_v17  ;;  %v1180_v26 = vand.u32 7, %v9008_v15  ;;  %v9017_v17 = vadd.s32 8, %v8952_v39 }
 0x41d   :  { %v507_v53 = vmul.f32 %v503_v47, %v494_v51  ;;  %v519_v55 = vadd.f32 %v512_v48, %v506_v50  ;;  %vm9024_vm8 = vcmp.eq.s32.totalorder %v1180_v26, %v9005_v14  ;;  %v1173_v20 = vand.u32 7, %v9017_v17 }
 0x41f   :  { %v520_v56 = vadd.f32 %v516_v52, %v507_v53  ;;  %v521_v57 = vmax.f32 %v519_v55, 0.0  ;;  %vm9034_vm9 = vcmp.eq.s32.totalorder %v1173_v20, %v9005_v14 }
 0x421   :  { %v522_v60 = vmax.f32 %v520_v56, 0.0  ;;  %v560_v63 = vpack.c.bf16 %v521_v57, %v521_v57 }
 0x423   :  { %v561_v61 = vpack.c.bf16 %v522_v60, %v522_v60 }
 0x425   :  { %690 = vmatprep.mubr.bf16.mxu0 %v561_v61  ;;  %952 = vmatprep.mubr.bf16.mxu1 %v561_v61 }
 0x426   :  { %691 = vmatmul.mubr.bf16.vlgmr.msra.gmra.mxu0 %v560_v63  ;;  %953 = vmatmul.mubr.bf16.vlgmr.msra.gmra.mxu1 %v560_v63 }
 0x427   :  { %7889 = vmatpush3.bf16.msra.mxu1 %v8942_v54  ;;  %7894 = vmatprep.mubr.msk.bf16.mxu1 %vm1097_vm6, %v1077_v62  ;;  %v1078_v54 = vpack.c.bf16 %v1076_v4, %v1075_v3 }
 0x428   :  { %7890 = vmatprep.subr.bf16.mxu1 %v8562_v1  ;;  %7884 = vmatprep.mubr.msk.bf16.mxu0 %vm8672_vm1, %v8671_v0 }
 0x429   :  { %7881 = vmatpush3.bf16.msra.mxu0 %v8564_v23 }
 0x42a   :  { %7882 = vmatprep.subr.bf16.mxu0 %v8671_v0 }
 0x42b   :  { %7891 = vmatpush3.bf16.msra.mxu1 %v8562_v1 }
 0x42c   :  { %7892 = vmatprep.subr.bf16.mxu1 %v8563_v2 }
 0x42d   :  { %7883 = vmatpush3.bf16.msra.mxu0 %v8565_v24 }
 0x42f   :  { %7893 = vmatpush3.bf16.msra.mxu1 %v8563_v2 }
 0x430   :  { %7898 = vmatprep.subr.mxu1 %v8671_v0 }
 0x432   :  { %7895 = vmatmul.mubr.msk.bf16.vlgmr.msra.gmra.mxu1 %vm1097_vm6, %v1078_v54 }
 0x433   :  { %7906 = vmatprep.mubr.msk.f32.mxu1 %vm8672_vm1, %v8671_v0  ;;  %7899 = vmatpush3.msk.msra.mxu1 %vm9011_vm7, %v8676_v18 }
 0x434   :  { %7900 = vmatprep.subr.mxu1 %v8671_v0 }
 0x435   :  { %7901 = vmatpush3.msk.msra.mxu1 %vm9024_vm8, %v8676_v18 }
 0x436   :  { %7902 = vmatprep.subr.mxu1 %v8671_v0 }
 0x437   :  { %7903 = vmatpush3.msk.msra.mxu1 %vm9034_vm9, %v8676_v18 }
 0x438   :  { %7904 = vmatprep.subr.mxu1 %v8671_v0 }
 0x439   :  { %7905 = vmatpush3.msk.msra.mxu1 %vm9044_vm10, %v8676_v18 }
 0x43a   :  { %7909 = vmatprep.subr.mxu1 %v8671_v0 }
 0x4e6   :  { %v7521_v27 = vpop.f32.mrf.mxu0  ;;  %v7546_v28 = vpop.f32.mrf.mxu1 }
 0x4e8   :  { %v7522_v29 = vpop.f32.mrf.mxu0  ;;  %v7547_v30 = vpop.f32.mrf.mxu1 }
 0x4e9   :  { %v9059_v31 = vadd.f32 %v7522_v29, %v7521_v27  ;;  %v7548_v32 = vadd.f32 %v7547_v30, %v7546_v28 }
 0x4ea   :  { %v7524_v33 = vpop.f32.mrf.mxu0  ;;  %v7549_v34 = vpop.f32.mrf.mxu1 }
 0x4eb   :  { %v962_v35 = vsel %vm10213_vm5, %v7548_v32, 0.0 }
 0x4ec   :  { %v963_v36 = vrot.slane %v962_v35, 4  ;;  %v7525_v37 = vpop.f32.mrf.mxu0  ;;  %v7550_v38 = vpop.f32.mrf.mxu1 }
 0x4ee   :  { %v964_v41 = vadd.f32 %v963_v36, %v962_v35 }
 0x4f0   :  { %v965_v43 = vrot.slane %v964_v41, 2 }
 0x4f2   :  { %v966_v44 = vadd.f32 %v965_v43, %v964_v41  ;;  %v9062_v45 = vpop.f32.mrf.mxu1 }
 0x4f3   :  { %v1247_v53 = vmul.f32 %v9062_v45, %v9062_v45  ;;  %v1233_v60 = vsel %vm168_vm3, %v9062_v45, 0.0 }
 0x4f4   :  { %v967_v46 = vrot.slane %v966_v44, 1  ;;  %v9064_v47 = vpop.f32.mrf.mxu1 }
 0x4f5   :  { %v1245_v50 = vmul.f32 %v9064_v47, %v9064_v47  ;;  %v1230_v55 = vsel %vm168_vm3, %v9064_v47, 0.0  ;;  %v1252_v4 = vsel %vm168_vm3, %v1247_v53, 0.0 }
 0x4f6   :  { %v968_v48 = vadd.f32 %v967_v46, %v966_v44  ;;  %v9066_v49 = vpop.f32.mrf.mxu1 }
 0x4f7   :  { %v1249_v61 = vsel %vm168_vm3, %v1245_v50, 0.0  ;;  %v1248_v62 = vmul.f32 %v9066_v49, %v9066_v49  ;;  %v1235_v54 = vsel %vm168_vm3, %v9066_v49, 0.0 }
 0x4f8   :  { %v969_v51 = vmul.f32 0.5, %v968_v48  ;;  %v9070_v52 = vpop.f32.mrf.mxu1 }
 0x4f9   :  { %v1231_v56 = vsel %vm168_vm3, %v9070_v52, 0.0  ;;  %v1246_v57 = vmul.f32 %v9070_v52, %v9070_v52  ;;  %v1254_v26 = vsel %vm168_vm3, %v1248_v62, 0.0 }
 0x4fa   :  { %v970_v58 = vsub.f32 %v7548_v32, %v969_v51  ;;  %v1232_v59 = vadd.f32 %v1231_v56, %v1230_v55  ;;  %v7209_v55 = vld [vmem:[%s10207_s4 + $0x9] ss:$0 sm:$0xff] }
 0x4fb   :  { %v1250_v63 = vsel %vm168_vm3, %v1246_v57, 0.0  ;;  %v7210_v57 = vld [vmem:[%s10207_s4 + $0xa] ss:$0 sm:$0xff] }
 0x4fc   :  { %v971_v1 = vmul.f32 %v970_v58, %v970_v58  ;;  %v1234_v2 = vadd.f32 %v1233_v60, %v1232_v59  ;;  %v1251_v3 = vadd.f32 %v1250_v63, %v1249_v61  ;;  %v8566_v63 = vld [vmem:[%s10204_s6 + $0xac] ss:$60 sps:$4 sm:$0xff]  }
 0x4fd   :  { %7920 = vmatprep.subr.bf16.mxu0 %v8566_v63 }
 0x4fe   :  { %v972_v6 = vsel %vm10213_vm5, %v971_v1, 0.0  ;;  %v1236_v9 = vadd.f32 %v1235_v54, %v1234_v2  ;;  %v1253_v10 = vadd.f32 %v1252_v4, %v1251_v3  ;;  %v8567_v1 = vld [vmem:[%s10204_s6 + $0x34] ss:$60 sps:$4 sm:$0xff]  }
 0x4ff   :  { %v973_v13 = vrot.slane %v972_v6, 4 }
 0x500   :  { %v1237_v20 = vrot.slane %v1236_v9, 4  ;;  %v1255_v21 = vadd.f32 %v1254_v26, %v1253_v10 }
 0x501   :  { %v974_v23 = vadd.f32 %v973_v13, %v972_v6 }
 0x502   :  { %v1238_v24 = vadd.f32 %v1237_v20, %v1236_v9  ;;  %v1256_v27 = vrot.slane %v1255_v21, 4 }
 0x503   :  { %v975_v28 = vrot.slane %v974_v23, 2 }
 0x504   :  { %v1239_v29 = vrot.slane %v1238_v24, 2  ;;  %v1257_v30 = vadd.f32 %v1256_v27, %v1255_v21 }
 0x505   :  { %v976_v32 = vadd.f32 %v975_v28, %v974_v23 }
 0x506   :  { %v1240_v33 = vadd.f32 %v1239_v29, %v1238_v24  ;;  %v1258_v34 = vrot.slane %v1257_v30, 2 }
 0x507   :  { %v977_v35 = vrot.slane %v976_v32, 1 }
 0x508   :  { %v1241_v36 = vrot.slane %v1240_v33, 1  ;;  %v1259_v37 = vadd.f32 %v1258_v34, %v1257_v30 }
 0x509   :  { %v978_v38 = vadd.f32 %v977_v35, %v976_v32  ;;  %v7230_v32 = vld [vmem:[%s10207_s4 + $0xc] ss:$0 sm:$0xff] }
 0x50a   :  { %v1242_v41 = vadd.f32 %v1241_v36, %v1240_v33  ;;  %v1260_v46 = vrot.slane %v1259_v37, 1 }
 0x50b   :  { %v979_v43 = vmul.f32 0.5, %v978_v38 }
 0x50c   :  { %v1244_v44 = vmul.f32 0.03125, %v1242_v41  ;;  %v1261_v50 = vadd.f32 %v1260_v46, %v1259_v37 }
 0x50d   :  { %v980_v48 = vadd.f32 1e-05, %v979_v43 }
 0x50e   :  { %7907 = vmatmul.mubr.msk.f32.vlgmr.msra.gmra.mxu1 %vm168_vm3, %v1244_v44  ;;  %v1262_v51 = vmul.f32 0.03125, %v1261_v50 }
 0x50f   :  { %8622 = vrsqrt.f32 %v980_v48  ;;  %7910 = vmatpush3.msk.msra.mxu1 %vm9011_vm7, %v8676_v18  ;;  %7917 = vmatprep.mubr.msk.f32.mxu1 %vm8672_vm1, %v8671_v0 }
 0x510   :  { %7911 = vmatprep.subr.mxu1 %v8671_v0 }
 0x511   :  { %7912 = vmatpush3.msk.msra.mxu1 %vm9024_vm8, %v8676_v18 }
 0x512   :  { %7913 = vmatprep.subr.mxu1 %v8671_v0 }
 0x513   :  { %7914 = vmatpush3.msk.msra.mxu1 %vm9034_vm9, %v8676_v18 }
 0x514   :  { %7915 = vmatprep.subr.mxu1 %v8671_v0 }
 0x515   :  { %7916 = vmatpush3.msk.msra.mxu1 %vm9044_vm10, %v8676_v18 }
 0x516   :  { %7918 = vmatmul.mubr.msk.f32.vlgmr.msra.gmra.mxu1 %vm168_vm3, %v1262_v51  ;;  %7928 = vmatprep.subr.mxu1 %v8671_v0 }
 0x517   :  { %7936 = vmatprep.mubr.msk.f32.mxu1 %vm8672_vm1, %v8671_v0 }
 0x51c   :  { %v8623_v53 = vpop.eup %8622 }
 0x51d   :  { %v982_v56 = vmul.f32 %v8623_v53, %v970_v58 }
 0x51f   :  { %v989_v59 = vmul.f32 %v7209_v55, %v982_v56 }
 0x521   :  { %v996_v60 = vadd.f32 %v7210_v57, %v989_v59  ;;  %v8569_v57 = vld [vmem:[%s10208_s7 + $0x8] ss:$12 sps:$4 sm:$0xff]  }
 0x523   :  { %v997_v61 = vmax.f32 %v996_v60, 0.0 }
 0x525   :  { %v1002_v62 = vpack.c.bf16 %v997_v61, %v997_v61 }
 0x527   :  { %7885 = vmatmul.mubr.msk.bf16.vlgmr.msra.gmra.mxu0 %vm168_vm3, %v1002_v62 }
 0x528   :  { %7921 = vmatpush3.bf16.msra.mxu0 %v8566_v63 }
 0x529   :  { %7922 = vmatprep.subr.bf16.mxu0 %v8567_v1 }
 0x52c   :  { %7923 = vmatpush3.bf16.msra.mxu0 %v8567_v1 }
 0x52d   :  { %7939 = vmatprep.subr.bf16.mxu0 %v8671_v0 }
 0x5ce   :  { %v1332_v58 = vpop.f32.mrf.mxu1 }
 0x5cf   :  { %v1409_v3 = vmul.f32 %v1332_v58, %v1332_v58  ;;  %v1415_v13 = vrot.slane %v1332_v58, %v8955_v40 }
 0x5d0   :  { %v7908_v2 = vpop.f32.mrf.mxu1 }
 0x5d1   :  { %v1416_v23 = vsub.f32 %v9064_v47, %v1415_v13  ;;  %v1417_v24 = vsub.f32 %v9070_v52, %v1415_v13  ;;  %v1418_v27 = vsub.f32 %v9062_v45, %v1415_v13  ;;  %v1419_v28 = vsub.f32 %v9066_v49, %v1415_v13  ;;  %v7231_v47 = vld [vmem:[%s10207_s4 + $0xd] ss:$0 sm:$0xff] }
 0x5d6   :  { %v1405_v4 = vpop.f32.mrf.mxu1 }
 0x5d7   :  { %v1410_v54 = vsub.f32 %v1405_v4, %v1409_v3 }
 0x5d8   :  { %v7919_v6 = vpop.f32.mrf.mxu1 }
 0x5d9   :  { %v1411_v9 = vmax.f32 %v1410_v54, 0.0 }
 0x5db   :  { %v1420_v10 = vadd.f32 1e-05, %v1411_v9 }
 0x5dd   :  { %8624 = vrsqrt.f32 %v1420_v10 }
 0x5e7   :  { %v9128_v26 = vpop.f32.mrf.mxu0 }
 0x5e9   :  { %v7886_v20 = vpop.f32.mrf.mxu0 }
 0x5ea   :  { %v8625_v21 = vpop.eup %8624 }
 0x5eb   :  { %v1425_v29 = vrot.slane %v8625_v21, %v8955_v40  ;;  %v1062_v30 = vpop.f32.mrf.mxu0 }
 0x5ed   :  { %v7887_v33 = vpop.f32.mrf.mxu0  ;;  %v1426_v34 = vmul.f32 %v1425_v29, %v1416_v23  ;;  %v1427_v35 = vmul.f32 %v1425_v29, %v1417_v24  ;;  %v1428_v36 = vmul.f32 %v1425_v29, %v1418_v27  ;;  %v1429_v37 = vmul.f32 %v1425_v29, %v1419_v28 }
 0x5ef   :  { %v1436_v52 = vmul.f32 %v7230_v32, %v1426_v34  ;;  %v1437_v45 = vmul.f32 %v7230_v32, %v1427_v35  ;;  %v1438_v38 = vmul.f32 %v7230_v32, %v1428_v36  ;;  %v1439_v49 = vmul.f32 %v7230_v32, %v1429_v37 }
 0x5f1   :  { %v1446_v41 = vadd.f32 %v7231_v47, %v1436_v52  ;;  %v1447_v43 = vadd.f32 %v7231_v47, %v1437_v45  ;;  %v1448_v44 = vadd.f32 %v7231_v47, %v1438_v38  ;;  %v1449_v46 = vadd.f32 %v7231_v47, %v1439_v49 }
 0x5f3   :  { %v1450_v48 = vmax.f32 %v1446_v41, 0.0  ;;  %v1451_v50 = vmax.f32 %v1447_v43, 0.0  ;;  %v1452_v51 = vmax.f32 %v1448_v44, 0.0  ;;  %v1453_v53 = vmax.f32 %v1449_v46, 0.0 }
 0x5f5   :  { %v1458_v55 = vpack.c.bf16 %v1451_v50, %v1450_v48  ;;  %v1459_v56 = vpack.c.bf16 %v1453_v53, %v1452_v51 }
 0x5f7   :  { %7924 = vmatprep.mubr.msk.bf16.mxu0 %vm168_vm3, %v1458_v55  ;;  %v7236_v55 = vld [vmem:[%s10207_s4 + $0xe] ss:$0 sm:$0xff] }
 0x5f8   :  { %7925 = vmatmul.mubr.msk.bf16.vlgmr.msra.gmra.mxu0 %vm168_vm3, %v1459_v56 }
 0x5f9   :  { %7941 = vmatprep.mubr.msk.bf16.mxu0 %vm8672_vm1, %v8671_v0  ;;  %7940 = vmatpush3.bf16.msra.mxu0 %v8569_v57 }
 0x5fa   :  { %7968 = vmatprep.subr.mxu0 %v8671_v0 }
 0x6b8   :  { %v7926_v59 = vpop.f32.mrf.mxu0 }
 0x6b9   :  { %v1532_v2 = vsel %vm112_vm4, %v7926_v59, 0.0 }
 0x6ba   :  { %v1512_v60 = vpop.f32.mrf.mxu0 }
 0x6bb   :  { %v1529_v63 = vsel %vm112_vm4, %v1512_v60, 0.0 }
 0x6bc   :  { %v7927_v61 = vpop.f32.mrf.mxu0 }
 0x6bd   :  { %v1534_v4 = vsel %vm112_vm4, %v7927_v61, 0.0 }
 0x6be   :  { %v1515_v62 = vpop.f32.mrf.mxu0 }
 0x6bf   :  { %v1530_v1 = vsel %vm112_vm4, %v1515_v62, 0.0 }
 0x6c0   :  { %v1531_v58 = vadd.f32 %v1530_v1, %v1529_v63 }
 0x6c2   :  { %v1533_v3 = vadd.f32 %v1532_v2, %v1531_v58 }
 0x6c4   :  { %v1535_v54 = vadd.f32 %v1534_v4, %v1533_v3  ;;  %v9165_v4 = vsub.s32 %v9001_v25, %v8952_v39 }
 0x6c6   :  { %v1536_v6 = vrot.slane %v1535_v54, 4  ;;  %vm1598_vm11 = vcmp.eq.s32.totalorder %v9165_v4, 0  ;;  %vm1777_vm12 = vcmp.eq.s32.totalorder %v9165_v4, 2  ;;  %vm1906_vm13 = vcmp.eq.s32.totalorder %v9165_v4, 4 }
 0x6c7   :  { %vm2035_vm14 = vcmp.eq.s32.totalorder %v9165_v4, 6  ;;  %vm2164_vm15 = vcmp.eq.s32.totalorder %v9165_v4, 8  ;;  %vm2293_vm2 = vcmp.eq.s32.totalorder %v9165_v4, 10  ;;  %vm2422_vm6 = vcmp.eq.s32.totalorder %v9165_v4, 12 }
 0x6c8   :  { %v1537_v9 = vadd.f32 %v1536_v6, %v1535_v54 }
 0x6ca   :  { %v1538_v10 = vrot.slane %v1537_v9, 2 }
 0x6cc   :  { %v1539_v13 = vadd.f32 %v1538_v10, %v1537_v9 }
 0x6ce   :  { %v1540_v20 = vrot.slane %v1539_v13, 1 }
 0x6d0   :  { %v1541_v21 = vadd.f32 %v1540_v20, %v1539_v13 }
 0x6d2   :  { %v1542_v23 = vmul.f32 0.03125, %v1541_v21  ;;  %v7238_v21 = vsel %vm1598_vm11, 1.0, %v8671_v0  ;;  %vm2551_vm11 = vcmp.eq.s32.totalorder %v9165_v4, 14 }
 0x6d4   :  { %v1543_v24 = vsub.f32 %v1512_v60, %v1542_v23  ;;  %v1544_v27 = vsub.f32 %v1515_v62, %v1542_v23  ;;  %v1545_v28 = vsub.f32 %v7926_v59, %v1542_v23  ;;  %v1546_v29 = vsub.f32 %v7927_v61, %v1542_v23  ;;  %v7237_v61 = vld [vmem:[%s10207_s4 + $0xf] ss:$0 sm:$0xff] }
 0x6d5   :  { %v8568_v23 = vld [vmem:[%s10206_s5 + $0xc] ss:$20 sps:$4 sm:$0xff]  }
 0x6d6   :  { %v1547_v30 = vmul.f32 %v1543_v24, %v1543_v24  ;;  %v1548_v32 = vmul.f32 %v1544_v27, %v1544_v27  ;;  %v1549_v33 = vmul.f32 %v1545_v28, %v1545_v28  ;;  %v1550_v34 = vmul.f32 %v1546_v29, %v1546_v29 }
 0x6d8   :  { %v1551_v35 = vsel %vm112_vm4, %v1547_v30, 0.0  ;;  %v1552_v36 = vsel %vm112_vm4, %v1548_v32, 0.0  ;;  %v1554_v47 = vsel %vm112_vm4, %v1549_v33, 0.0  ;;  %v1556_v45 = vsel %vm112_vm4, %v1550_v34, 0.0 }
 0x6d9   :  { %v1553_v37 = vadd.f32 %v1552_v36, %v1551_v35  ;;  %v7248_v36 = vsel %vm1906_vm13, 1.0, %v8671_v0  ;;  %vm2809_vm13 = vcmp.eq.s32.totalorder %v9165_v4, 18 }
 0x6db   :  { %v1555_v52 = vadd.f32 %v1554_v47, %v1553_v37 }
 0x6dd   :  { %v1557_v38 = vadd.f32 %v1556_v45, %v1555_v52 }
 0x6df   :  { %v1558_v49 = vrot.slane %v1557_v38, 4 }
 0x6e1   :  { %v1559_v41 = vadd.f32 %v1558_v49, %v1557_v38  ;;  %v7252_v38 = vsel %vm2035_vm14, 1.0, %v8671_v0  ;;  %v7256_v49 = vsel %vm2164_vm15, 1.0, %v8671_v0  ;;  %vm2938_vm14 = vcmp.eq.s32.totalorder %v9165_v4, 20 }
 0x6e2   :  { %vm3067_vm15 = vcmp.eq.s32.totalorder %v9165_v4, 22 }
 0x6e3   :  { %v1560_v43 = vrot.slane %v1559_v41, 2 }
 0x6e5   :  { %v1561_v44 = vadd.f32 %v1560_v43, %v1559_v41  ;;  %v7260_v41 = vsel %vm2293_vm2, 1.0, %v8671_v0  ;;  %v7264_v43 = vsel %vm2422_vm6, 1.0, %v8671_v0  ;;  %vm3196_vm2 = vcmp.eq.s32.totalorder %v9165_v4, 24 }
 0x6e6   :  { %vm3325_vm6 = vcmp.eq.s32.totalorder %v9165_v4, 26 }
 0x6e7   :  { %v1562_v46 = vrot.slane %v1561_v44, 1 }
 0x6e9   :  { %v1563_v48 = vadd.f32 %v1562_v46, %v1561_v44  ;;  %v7268_v44 = vsel %vm2551_vm11, 1.0, %v8671_v0  ;;  %vm3454_vm11 = vcmp.eq.s32.totalorder %v9165_v4, 28 }
 0x6eb   :  { %v1564_v50 = vmul.f32 0.03125, %v1563_v48  ;;  %v7276_v48 = vsel %vm2809_vm13, 1.0, %v8671_v0  ;;  %vm4371_vm13 = vcmask 15360  }
 0x6ed   :  { %v1565_v51 = vadd.f32 1e-05, %v1564_v50  ;;  %v7280_v50 = vsel %vm2938_vm14, 1.0, %v8671_v0 }
 0x6ef   :  { %8626 = vrsqrt.f32 %v1565_v51  ;;  %v8571_v51 = vld [vmem:[%s10208_s7 + $0x38] ss:$12 sps:$4 sm:$0xff]  }
 0x6fc   :  { %v8627_v53 = vpop.eup %8626 }
 0x6fd   :  { %v1567_v56 = vmul.f32 %v8627_v53, %v1543_v24  ;;  %v1568_v57 = vmul.f32 %v8627_v53, %v1544_v27  ;;  %v1569_v59 = vmul.f32 %v8627_v53, %v1545_v28  ;;  %v1570_v60 = vmul.f32 %v8627_v53, %v1546_v29  ;;  %v1727_v24 = vpop.permute.xlu0 %1726  ;;  %v8570_v28 = vld [vmem:[%s10208_s7 + $0x20] ss:$12 sps:$4 sm:$0xff]  }
 0x6fe   :  { %v7244_v27 = vsel %vm1777_vm12, 1.0, %v8671_v0  ;;  %vm2680_vm12 = vcmp.eq.s32.totalorder %v9165_v4, 16  ;;  %v7284_v53 = vsel %vm3067_vm15, 1.0, %v8671_v0 }
 0x6ff   :  { %v1578_v62 = vmul.f32 %v7236_v55, %v1568_v57  ;;  %v1579_v63 = vmul.f32 %v7236_v55, %v1569_v59  ;;  %v1580_v1 = vmul.f32 %v7236_v55, %v1570_v60  ;;  %v1577_v58 = vmul.f32 %v7236_v55, %v1567_v56  ;;  %v9409_v60 = vld [vmem:[%s10207_s4 + $0x12] ss:$0 sm:$0xff] }
 0x700   :  { %v7272_v46 = vsel %vm2680_vm12, 1.0, %v8671_v0  ;;  %v7288_v55 = vsel %vm3196_vm2, 1.0, %v8671_v0  ;;  %v7292_v56 = vsel %vm3325_vm6, 1.0, %v8671_v0  ;;  %v7296_v57 = vsel %vm3454_vm11, 1.0, %v8671_v0  ;;  %3882 = vrot.lane.b32.xlu1 %v9409_v60, %s8677_s29 }
 0x701   :  { %v1589_v2 = vadd.f32 %v7237_v61, %v1579_v63  ;;  %v1590_v3 = vadd.f32 %v7237_v61, %v1580_v1  ;;  %v1588_v54 = vadd.f32 %v7237_v61, %v1578_v62  ;;  %v1587_v9 = vadd.f32 %v7237_v61, %v1577_v58 }
 0x702   :  { %vm3583_vm12 = vcmp.eq.s32.totalorder %v9165_v4, 30 }
 0x703   :  { %v9167_v6 = vmax.f32 %v1590_v3, 0.0  ;;  %v9169_v10 = vmax.f32 %v1589_v2, 0.0  ;;  %v9174_v13 = vmax.f32 %v1588_v54, 0.0  ;;  %v9178_v20 = vmax.f32 %v1587_v9, 0.0  ;;  %v8572_v2 = vld [vmem:[%s10208_s7 + $0x50] ss:$12 sps:$4 sm:$0xff]  }
 0x704   :  { %v7300_v59 = vsel %vm3583_vm12, 1.0, %v8671_v0 }
 0x705   :  { %7929 = vmatpush3.msra.mxu1 %v9167_v6 }
 0x706   :  { %7930 = vmatprep.subr.mxu1 %v8671_v0 }
 0x707   :  { %7931 = vmatpush3.msra.mxu1 %v9169_v10 }
 0x708   :  { %7932 = vmatprep.subr.mxu1 %v8671_v0 }
 0x709   :  { %7933 = vmatpush3.msra.mxu1 %v9174_v13 }
 0x70a   :  { %7934 = vmatprep.subr.mxu1 %v8671_v0 }
 0x70b   :  { %7935 = vmatpush3.msra.mxu1 %v9178_v20 }
 0x70c   :  { %7937 = vmatmul.mubr.msk.f32.vlgmr.msra.gmra.mxu1 %vm168_vm3, %v7238_v21  ;;  %7945 = vmatprep.subr.bf16.mxu1 %v8671_v0 }
 0x70d   :  { %7946 = vmatpush3.bf16.msra.mxu1 %v8568_v23  ;;  %7947 = vmatprep.mubr.msk.bf16.mxu1 %vm8672_vm1, %v8671_v0 }
 0x70e   :  { %7951 = vmatprep.subr.mxu1 %v8671_v0 }
 0x710   :  { %7948 = vmatmul.mubr.msk.bf16.vlgmr.msra.gmra.mxu1 %vm112_vm4, %v1727_v24 }
 0x711   :  { %7952 = vmatpush3.msra.mxu1 %v9167_v6  ;;  %7959 = vmatprep.mubr.msk.f32.mxu1 %vm8672_vm1, %v8671_v0 }
 0x712   :  { %7953 = vmatprep.subr.mxu1 %v8671_v0 }
 0x713   :  { %7954 = vmatpush3.msra.mxu1 %v9169_v10 }
 0x714   :  { %7955 = vmatprep.subr.mxu1 %v8671_v0 }
 0x715   :  { %7956 = vmatpush3.msra.mxu1 %v9174_v13 }
 0x716   :  { %7957 = vmatprep.subr.mxu1 %v8671_v0 }
 0x717   :  { %7958 = vmatpush3.msra.mxu1 %v9178_v20 }
 0x718   :  { %7960 = vmatmul.mubr.msk.f32.vlgmr.msra.gmra.mxu1 %vm168_vm3, %v7244_v27  ;;  %7962 = vmatprep.subr.bf16.mxu1 %v8671_v0 }
 0x719   :  { %7964 = vmatprep.mubr.msk.bf16.mxu1 %vm8672_vm1, %v8671_v0  ;;  %7963 = vmatpush3.bf16.msra.mxu1 %v8570_v28 }
 0x71a   :  { %7979 = vmatprep.subr.bf16.mxu1 %v8671_v0 }
 0x7cc   :  { %v1670_v29 = vpop.f32.mrf.mxu1 }
 0x7cd   :  { %v1676_v30 = vpack.c.bf16 %v1670_v29, %v1670_v29  ;;  %v8574_v29 = vld [vmem:[%s10208_s7 + $0x80] ss:$12 sps:$4 sm:$0xff]  }
 0x7ce   :  { %v7938_v32 = vpop.f32.mrf.mxu1 }
 0x7cf   :  { %7942 = vmatmul.mubr.msk.bf16.vlgmr.msra.gmra.mxu0 %vm112_vm4, %v1676_v30 }
 0x7d0   :  { %7969 = vmatpush3.msra.mxu0 %v9167_v6  ;;  %v9214_v33 = vpop.f32.mrf.mxu1  ;;  %7976 = vmatprep.mubr.msk.f32.mxu0 %vm8672_vm1, %v8671_v0 }
 0x7d1   :  { %7970 = vmatprep.subr.mxu0 %v8671_v0 }
 0x7d2   :  { %7971 = vmatpush3.msra.mxu0 %v9169_v10  ;;  %v7949_v34 = vpop.f32.mrf.mxu1 }
 0x7d3   :  { %7972 = vmatprep.subr.mxu0 %v8671_v0  ;;  %v8575_v34 = vld [vmem:[%s10208_s7 + $0x98] ss:$12 sps:$4 sm:$0xff]  }
 0x7d4   :  { %7973 = vmatpush3.msra.mxu0 %v9174_v13  ;;  %v1774_v35 = vpop.f32.mrf.mxu1 }
 0x7d5   :  { %7974 = vmatprep.subr.mxu0 %v8671_v0 }
 0x7d6   :  { %7975 = vmatpush3.msra.mxu0 %v9178_v20  ;;  %v7950_v37 = vpop.f32.mrf.mxu1 }
 0x7d7   :  { %7985 = vmatprep.subr.mxu0 %v8671_v0  ;;  %7977 = vmatmul.mubr.msk.f32.vlgmr.msra.gmra.mxu0 %vm168_vm3, %v7248_v36 }
 0x7d8   :  { %7986 = vmatpush3.msra.mxu0 %v9167_v6  ;;  %v1849_v47 = vpop.f32.mrf.mxu1  ;;  %7993 = vmatprep.mubr.msk.f32.mxu0 %vm8672_vm1, %v8671_v0 }
 0x7d9   :  { %v1855_v52 = vpack.c.bf16 %v1849_v47, %v1849_v47  ;;  %7987 = vmatprep.subr.mxu0 %v8671_v0  ;;  %v8576_v47 = vld [vmem:[%s10208_s7 + $0xb0] ss:$12 sps:$4 sm:$0xff]  }
 0x7da   :  { %7988 = vmatpush3.msra.mxu0 %v9169_v10  ;;  %v7961_v45 = vpop.f32.mrf.mxu1 }
 0x7db   :  { %7989 = vmatprep.subr.mxu0 %v8671_v0  ;;  %7965 = vmatmul.mubr.msk.bf16.vlgmr.msra.gmra.mxu1 %vm112_vm4, %v1855_v52 }
 0x7dc   :  { %7990 = vmatpush3.msra.mxu0 %v9174_v13  ;;  %7981 = vmatprep.mubr.msk.bf16.mxu1 %vm8672_vm1, %v8671_v0 }
 0x7dd   :  { %7991 = vmatprep.subr.mxu0 %v8671_v0  ;;  %7980 = vmatpush3.bf16.msra.mxu1 %v8571_v51 }
 0x7de   :  { %7992 = vmatpush3.msra.mxu0 %v9178_v20  ;;  %7996 = vmatprep.subr.bf16.mxu1 %v8671_v0 }
 0x7df   :  { %7994 = vmatmul.mubr.msk.f32.vlgmr.msra.gmra.mxu0 %vm168_vm3, %v7252_v38  ;;  %8002 = vmatprep.subr.mxu0 %v8671_v0 }
 0x7e0   :  { %8003 = vmatpush3.msra.mxu0 %v9167_v6  ;;  %8010 = vmatprep.mubr.msk.f32.mxu0 %vm8672_vm1, %v8671_v0 }
 0x7e1   :  { %8004 = vmatprep.subr.mxu0 %v8671_v0 }
 0x7e2   :  { %8005 = vmatpush3.msra.mxu0 %v9169_v10 }
 0x7e3   :  { %8006 = vmatprep.subr.mxu0 %v8671_v0 }
 0x7e4   :  { %8007 = vmatpush3.msra.mxu0 %v9174_v13 }
 0x7e5   :  { %8008 = vmatprep.subr.mxu0 %v8671_v0 }
 0x7e6   :  { %8009 = vmatpush3.msra.mxu0 %v9178_v20 }
 0x7e7   :  { %8011 = vmatmul.mubr.msk.f32.vlgmr.msra.gmra.mxu0 %vm168_vm3, %v7256_v49  ;;  %8019 = vmatprep.subr.mxu0 %v8671_v0  ;;  %v8577_v49 = vld [vmem:[%s10208_s7 + $0xc8] ss:$12 sps:$4 sm:$0xff]  }
 0x7e8   :  { %8020 = vmatpush3.msra.mxu0 %v9167_v6  ;;  %8027 = vmatprep.mubr.msk.f32.mxu0 %vm8672_vm1, %v8671_v0 }
 0x7e9   :  { %8021 = vmatprep.subr.mxu0 %v8671_v0 }
 0x7ea   :  { %8022 = vmatpush3.msra.mxu0 %v9169_v10 }
 0x7eb   :  { %8023 = vmatprep.subr.mxu0 %v8671_v0 }
 0x7ec   :  { %8024 = vmatpush3.msra.mxu0 %v9174_v13 }
 0x7ed   :  { %8025 = vmatprep.subr.mxu0 %v8671_v0 }
 0x7ee   :  { %8026 = vmatpush3.msra.mxu0 %v9178_v20 }
 0x7ef   :  { %8028 = vmatmul.mubr.msk.f32.vlgmr.msra.gmra.mxu0 %vm168_vm3, %v7260_v41  ;;  %8036 = vmatprep.subr.mxu0 %v8671_v0 }
 0x7f0   :  { %8037 = vmatpush3.msra.mxu0 %v9167_v6  ;;  %8044 = vmatprep.mubr.msk.f32.mxu0 %vm8672_vm1, %v8671_v0 }
 0x7f1   :  { %8038 = vmatprep.subr.mxu0 %v8671_v0 }
 0x7f2   :  { %8039 = vmatpush3.msra.mxu0 %v9169_v10 }
 0x7f3   :  { %8040 = vmatprep.subr.mxu0 %v8671_v0 }
 0x7f4   :  { %8041 = vmatpush3.msra.mxu0 %v9174_v13 }
 0x7f5   :  { %8042 = vmatprep.subr.mxu0 %v8671_v0 }
 0x7f6   :  { %8043 = vmatpush3.msra.mxu0 %v9178_v20 }
 0x7f7   :  { %8045 = vmatmul.mubr.msk.f32.vlgmr.msra.gmra.mxu0 %vm168_vm3, %v7264_v43  ;;  %8053 = vmatprep.subr.mxu0 %v8671_v0 }
 0x7f8   :  { %8054 = vmatpush3.msra.mxu0 %v9167_v6  ;;  %8061 = vmatprep.mubr.msk.f32.mxu0 %vm8672_vm1, %v8671_v0 }
 0x7f9   :  { %8055 = vmatprep.subr.mxu0 %v8671_v0 }
 0x7fa   :  { %8056 = vmatpush3.msra.mxu0 %v9169_v10 }
 0x7fb   :  { %8057 = vmatprep.subr.mxu0 %v8671_v0 }
 0x7fc   :  { %8058 = vmatpush3.msra.mxu0 %v9174_v13 }
 0x7fd   :  { %8059 = vmatprep.subr.mxu0 %v8671_v0 }
 0x7fe   :  { %8060 = vmatpush3.msra.mxu0 %v9178_v20 }
 0x7ff   :  { %8062 = vmatmul.mubr.msk.f32.vlgmr.msra.gmra.mxu0 %vm168_vm3, %v7268_v44  ;;  %8070 = vmatprep.subr.mxu0 %v8671_v0 }
 0x800   :  { %8071 = vmatpush3.msra.mxu0 %v9167_v6  ;;  %8078 = vmatprep.mubr.msk.f32.mxu0 %vm8672_vm1, %v8671_v0 }
 0x801   :  { %8072 = vmatprep.subr.mxu0 %v8671_v0 }
 0x802   :  { %8073 = vmatpush3.msra.mxu0 %v9169_v10 }
 0x803   :  { %8074 = vmatprep.subr.mxu0 %v8671_v0 }
 0x804   :  { %8075 = vmatpush3.msra.mxu0 %v9174_v13 }
 0x805   :  { %8076 = vmatprep.subr.mxu0 %v8671_v0 }
 0x806   :  { %8077 = vmatpush3.msra.mxu0 %v9178_v20 }
 0x807   :  { %8079 = vmatmul.mubr.msk.f32.vlgmr.msra.gmra.mxu0 %vm168_vm3, %v7272_v46  ;;  %8087 = vmatprep.subr.mxu0 %v8671_v0  ;;  %v8578_v46 = vld [vmem:[%s10208_s7 + $0xe0] ss:$12 sps:$4 sm:$0xff]  }
 0x808   :  { %8088 = vmatpush3.msra.mxu0 %v9167_v6  ;;  %8095 = vmatprep.mubr.msk.f32.mxu0 %vm8672_vm1, %v8671_v0 }
 0x809   :  { %8089 = vmatprep.subr.mxu0 %v8671_v0 }
 0x80a   :  { %8090 = vmatpush3.msra.mxu0 %v9169_v10 }
 0x80b   :  { %8091 = vmatprep.subr.mxu0 %v8671_v0 }
 0x80c   :  { %8092 = vmatpush3.msra.mxu0 %v9174_v13 }
 0x80d   :  { %8093 = vmatprep.subr.mxu0 %v8671_v0 }
 0x80e   :  { %8094 = vmatpush3.msra.mxu0 %v9178_v20 }
 0x80f   :  { %8096 = vmatmul.mubr.msk.f32.vlgmr.msra.gmra.mxu0 %vm168_vm3, %v7276_v48  ;;  %8104 = vmatprep.subr.mxu0 %v8671_v0 }
 0x810   :  { %8105 = vmatpush3.msra.mxu0 %v9167_v6  ;;  %8112 = vmatprep.mubr.msk.f32.mxu0 %vm8672_vm1, %v8671_v0 }
 0x811   :  { %8106 = vmatprep.subr.mxu0 %v8671_v0 }
 0x812   :  { %8107 = vmatpush3.msra.mxu0 %v9169_v10 }
 0x813   :  { %8108 = vmatprep.subr.mxu0 %v8671_v0 }
 0x814   :  { %8109 = vmatpush3.msra.mxu0 %v9174_v13 }
 0x815   :  { %8110 = vmatprep.subr.mxu0 %v8671_v0 }
 0x816   :  { %8111 = vmatpush3.msra.mxu0 %v9178_v20 }
 0x817   :  { %8113 = vmatmul.mubr.msk.f32.vlgmr.msra.gmra.mxu0 %vm168_vm3, %v7280_v50  ;;  %8121 = vmatprep.subr.mxu0 %v8671_v0 }
 0x818   :  { %8122 = vmatpush3.msra.mxu0 %v9167_v6  ;;  %8129 = vmatprep.mubr.msk.f32.mxu0 %vm8672_vm1, %v8671_v0 }
 0x819   :  { %8123 = vmatprep.subr.mxu0 %v8671_v0 }
 0x81a   :  { %8124 = vmatpush3.msra.mxu0 %v9169_v10 }
 0x81b   :  { %8125 = vmatprep.subr.mxu0 %v8671_v0 }
 0x81c   :  { %8126 = vmatpush3.msra.mxu0 %v9174_v13 }
 0x81d   :  { %8127 = vmatprep.subr.mxu0 %v8671_v0 }
 0x81e   :  { %8128 = vmatpush3.msra.mxu0 %v9178_v20 }
 0x81f   :  { %8130 = vmatmul.mubr.msk.f32.vlgmr.msra.gmra.mxu0 %vm168_vm3, %v7284_v53  ;;  %8138 = vmatprep.subr.mxu0 %v8671_v0  ;;  %v8579_v53 = vld [vmem:[%s10208_s7 + $0xf8] ss:$12 sps:$4 sm:$0xff]  }
 0x820   :  { %8139 = vmatpush3.msra.mxu0 %v9167_v6  ;;  %8146 = vmatprep.mubr.msk.f32.mxu0 %vm8672_vm1, %v8671_v0 }
 0x821   :  { %8140 = vmatprep.subr.mxu0 %v8671_v0 }
 0x822   :  { %8141 = vmatpush3.msra.mxu0 %v9169_v10 }
 0x823   :  { %8142 = vmatprep.subr.mxu0 %v8671_v0 }
 0x824   :  { %8143 = vmatpush3.msra.mxu0 %v9174_v13 }
 0x825   :  { %8144 = vmatprep.subr.mxu0 %v8671_v0 }
 0x826   :  { %8145 = vmatpush3.msra.mxu0 %v9178_v20 }
 0x827   :  { %8147 = vmatmul.mubr.msk.f32.vlgmr.msra.gmra.mxu0 %vm168_vm3, %v7288_v55  ;;  %8155 = vmatprep.subr.mxu0 %v8671_v0 }
 0x828   :  { %8156 = vmatpush3.msra.mxu0 %v9167_v6  ;;  %8163 = vmatprep.mubr.msk.f32.mxu0 %vm8672_vm1, %v8671_v0 }
 0x829   :  { %8157 = vmatprep.subr.mxu0 %v8671_v0 }
 0x82a   :  { %8158 = vmatpush3.msra.mxu0 %v9169_v10 }
 0x82b   :  { %8159 = vmatprep.subr.mxu0 %v8671_v0 }
 0x82c   :  { %8160 = vmatpush3.msra.mxu0 %v9174_v13 }
 0x82d   :  { %8161 = vmatprep.subr.mxu0 %v8671_v0 }
 0x82e   :  { %8162 = vmatpush3.msra.mxu0 %v9178_v20 }
 0x82f   :  { %8164 = vmatmul.mubr.msk.f32.vlgmr.msra.gmra.mxu0 %vm168_vm3, %v7292_v56  ;;  %8172 = vmatprep.subr.mxu0 %v8671_v0 }
 0x830   :  { %8173 = vmatpush3.msra.mxu0 %v9167_v6  ;;  %8180 = vmatprep.mubr.msk.f32.mxu0 %vm8672_vm1, %v8671_v0 }
 0x831   :  { %8174 = vmatprep.subr.mxu0 %v8671_v0 }
 0x832   :  { %8175 = vmatpush3.msra.mxu0 %v9169_v10 }
 0x833   :  { %8176 = vmatprep.subr.mxu0 %v8671_v0 }
 0x834   :  { %8177 = vmatpush3.msra.mxu0 %v9174_v13 }
 0x835   :  { %8178 = vmatprep.subr.mxu0 %v8671_v0 }
 0x836   :  { %8179 = vmatpush3.msra.mxu0 %v9178_v20 }
 0x837   :  { %8181 = vmatmul.mubr.msk.f32.vlgmr.msra.gmra.mxu0 %vm168_vm3, %v7296_v57  ;;  %8189 = vmatprep.subr.mxu0 %v8671_v0 }
 0x838   :  { %8190 = vmatpush3.msra.mxu0 %v9167_v6  ;;  %8197 = vmatprep.mubr.msk.f32.mxu0 %vm8672_vm1, %v8671_v0 }
 0x839   :  { %8191 = vmatprep.subr.mxu0 %v8671_v0 }
 0x83a   :  { %8192 = vmatpush3.msra.mxu0 %v9169_v10 }
 0x83b   :  { %8193 = vmatprep.subr.mxu0 %v8671_v0 }
 0x83c   :  { %8194 = vmatpush3.msra.mxu0 %v9174_v13 }
 0x83d   :  { %8195 = vmatprep.subr.mxu0 %v8671_v0 }
 0x83e   :  { %8196 = vmatpush3.msra.mxu0 %v9178_v20  ;;  %v8573_v20 = vld [vmem:[%s10208_s7 + $0x68] ss:$12 sps:$4 sm:$0xff]  }
 0x83f   :  { %8198 = vmatmul.mubr.msk.f32.vlgmr.msra.gmra.mxu0 %vm168_vm3, %v7300_v59  ;;  %8206 = vmatprep.subr.bf16.mxu0 %v8671_v0  ;;  %v8580_v59 = vld [vmem:[%s10208_s7 + $0x110] ss:$12 sps:$4 sm:$0xff]  }
 0x840   :  { %8210 = vmatprep.mubr.msk.bf16.mxu0 %vm8672_vm1, %v8671_v0 }
 0x88f   :  { %v1720_v61 = vpop.f32.mrf.mxu0 }
 0x890   :  { %v1772_v54 = vadd.f32 %v9214_v33, %v1720_v61 }
 0x891   :  { %v7943_v62 = vpop.f32.mrf.mxu0 }
 0x893   :  { %v1723_v63 = vpop.f32.mrf.mxu0 }
 0x895   :  { %v7944_v1 = vpop.f32.mrf.mxu0 }
 0x896   :  { %v8581_v1 = vld [vmem:[%s10208_s7 + $0x128] ss:$12 sps:$4 sm:$0xff]  }
 0x897   :  { %v1978_v58 = vpop.f32.mrf.mxu0 }
 0x898   :  { %v1984_v3 = vpack.c.bf16 %v1978_v58, %v1978_v58 }
 0x899   :  { %v7978_v4 = vpop.f32.mrf.mxu0 }
 0x89a   :  { %7982 = vmatmul.mubr.msk.bf16.vlgmr.msra.gmra.mxu1 %vm112_vm4, %v1984_v3  ;;  %v8582_v4 = vld [vmem:[%s10208_s7 + $0x140] ss:$12 sps:$4 sm:$0xff]  }
 0x89b   :  { %v1899_v6 = vpop.f32.mrf.mxu1  ;;  %7997 = vmatpush3.bf16.msra.mxu1 %v8572_v2  ;;  %7998 = vmatprep.mubr.msk.bf16.mxu1 %vm8672_vm1, %v8671_v0 }
 0x89c   :  { %v9420_v9 = vadd.f32 %v1899_v6, %v1772_v54  ;;  %8013 = vmatprep.subr.bf16.mxu1 %v8671_v0 }
 0x89d   :  { %v7966_v10 = vpop.f32.mrf.mxu1 }
 0x89f   :  { %v2107_v13 = vpop.f32.mrf.mxu0  ;;  %v1902_v21 = vpop.f32.mrf.mxu1 }
 0x8a0   :  { %v2113_v23 = vpack.c.bf16 %v2107_v13, %v2107_v13  ;;  %v8583_v13 = vld [vmem:[%s10208_s7 + $0x158] ss:$12 sps:$4 sm:$0xff]  }
 0x8a1   :  { %v7995_v24 = vpop.f32.mrf.mxu0  ;;  %v7967_v27 = vpop.f32.mrf.mxu1 }
 0x8a2   :  { %7999 = vmatmul.mubr.msk.bf16.vlgmr.msra.gmra.mxu1 %vm112_vm4, %v2113_v23  ;;  %v8584_v24 = vld [vmem:[%s10208_s7 + $0x170] ss:$12 sps:$4 sm:$0xff]  }
 0x8a3   :  { %8014 = vmatpush3.bf16.msra.mxu1 %v8573_v20  ;;  %8015 = vmatprep.mubr.msk.bf16.mxu1 %vm8672_vm1, %v8671_v0 }
 0x8a4   :  { %8030 = vmatprep.subr.bf16.mxu1 %v8671_v0 }
 0x8a7   :  { %v2236_v28 = vpop.f32.mrf.mxu0 }
 0x8a8   :  { %v2242_v30 = vpack.c.bf16 %v2236_v28, %v2236_v28 }
 0x8a9   :  { %v8012_v32 = vpop.f32.mrf.mxu0 }
 0x8aa   :  { %8016 = vmatmul.mubr.msk.bf16.vlgmr.msra.gmra.mxu1 %vm112_vm4, %v2242_v30  ;;  %v8585_v30 = vld [vmem:[%s10204_s6 + $0x94] ss:$60 sps:$4 sm:$0xff]  }
 0x8ab   :  { %8031 = vmatpush3.bf16.msra.mxu1 %v8574_v29  ;;  %8032 = vmatprep.mubr.msk.bf16.mxu1 %vm8672_vm1, %v8671_v0 }
 0x8ac   :  { %8047 = vmatprep.subr.bf16.mxu1 %v8671_v0 }
 0x8af   :  { %v2365_v33 = vpop.f32.mrf.mxu0 }
 0x8b0   :  { %v2371_v35 = vpack.c.bf16 %v2365_v33, %v2365_v33 }
 0x8b1   :  { %v8029_v36 = vpop.f32.mrf.mxu0 }
 0x8b2   :  { %8033 = vmatmul.mubr.msk.bf16.vlgmr.msra.gmra.mxu1 %vm112_vm4, %v2371_v35 }
 0x8b3   :  { %8048 = vmatpush3.bf16.msra.mxu1 %v8575_v34  ;;  %8049 = vmatprep.mubr.msk.bf16.mxu1 %vm8672_vm1, %v8671_v0  ;;  %v8586_v34 = vld [vmem:[%s10204_s6 + $0x1c] ss:$60 sps:$4 sm:$0xff]  }
 0x8b4   :  { %8064 = vmatprep.subr.bf16.mxu1 %v8671_v0 }
 0x8b7   :  { %v2494_v37 = vpop.f32.mrf.mxu0 }
 0x8b8   :  { %v2500_v52 = vpack.c.bf16 %v2494_v37, %v2494_v37 }
 0x8b9   :  { %v8046_v45 = vpop.f32.mrf.mxu0 }
 0x8ba   :  { %8050 = vmatmul.mubr.msk.bf16.vlgmr.msra.gmra.mxu1 %vm112_vm4, %v2500_v52 }
 0x8bb   :  { %8065 = vmatpush3.bf16.msra.mxu1 %v8576_v47  ;;  %8066 = vmatprep.mubr.msk.bf16.mxu1 %vm8672_vm1, %v8671_v0 }
 0x8bc   :  { %8081 = vmatprep.subr.bf16.mxu1 %v8671_v0 }
 0x8bf   :  { %v2623_v38 = vpop.f32.mrf.mxu0 }
 0x8c0   :  { %v2629_v41 = vpack.c.bf16 %v2623_v38, %v2623_v38 }
 0x8c1   :  { %v8063_v43 = vpop.f32.mrf.mxu0 }
 0x8c2   :  { %8067 = vmatmul.mubr.msk.bf16.vlgmr.msra.gmra.mxu1 %vm112_vm4, %v2629_v41 }
 0x8c3   :  { %8082 = vmatpush3.bf16.msra.mxu1 %v8577_v49  ;;  %8083 = vmatprep.mubr.msk.bf16.mxu1 %vm8672_vm1, %v8671_v0 }
 0x8c4   :  { %8098 = vmatprep.subr.bf16.mxu1 %v8671_v0 }
 0x8c7   :  { %v2752_v44 = vpop.f32.mrf.mxu0 }
 0x8c8   :  { %v2758_v48 = vpack.c.bf16 %v2752_v44, %v2752_v44 }
 0x8c9   :  { %v8080_v50 = vpop.f32.mrf.mxu0 }
 0x8ca   :  { %8084 = vmatmul.mubr.msk.bf16.vlgmr.msra.gmra.mxu1 %vm112_vm4, %v2758_v48 }
 0x8cb   :  { %8099 = vmatpush3.bf16.msra.mxu1 %v8578_v46  ;;  %8100 = vmatprep.mubr.msk.bf16.mxu1 %vm8672_vm1, %v8671_v0 }
 0x8cc   :  { %8115 = vmatprep.subr.bf16.mxu1 %v8671_v0 }
 0x8cf   :  { %v2881_v51 = vpop.f32.mrf.mxu0 }
 0x8d0   :  { %v2887_v55 = vpack.c.bf16 %v2881_v51, %v2881_v51 }
 0x8d1   :  { %v8097_v56 = vpop.f32.mrf.mxu0 }
 0x8d2   :  { %8101 = vmatmul.mubr.msk.bf16.vlgmr.msra.gmra.mxu1 %vm112_vm4, %v2887_v55 }
 0x8d3   :  { %8116 = vmatpush3.bf16.msra.mxu1 %v8579_v53  ;;  %8117 = vmatprep.mubr.msk.bf16.mxu1 %vm8672_vm1, %v8671_v0 }
 0x8d4   :  { %8132 = vmatprep.subr.bf16.mxu1 %v8671_v0 }
 0x8d7   :  { %v3010_v57 = vpop.f32.mrf.mxu0 }
 0x8d8   :  { %v3016_v61 = vpack.c.bf16 %v3010_v57, %v3010_v57 }
 0x8d9   :  { %v8114_v62 = vpop.f32.mrf.mxu0 }
 0x8da   :  { %8118 = vmatmul.mubr.msk.bf16.vlgmr.msra.gmra.mxu1 %vm112_vm4, %v3016_v61 }
 0x8db   :  { %8133 = vmatpush3.bf16.msra.mxu1 %v8580_v59  ;;  %8134 = vmatprep.mubr.msk.bf16.mxu1 %vm8672_vm1, %v8671_v0  ;;  %v8588_v59 = vld [vmem:[%s10204_s6 + $0x98] ss:$60 sps:$4 sm:$0xff]  }
 0x8dc   :  { %8149 = vmatprep.subr.bf16.mxu1 %v8671_v0 }
 0x8df   :  { %v3139_v63 = vpop.f32.mrf.mxu0 }
 0x8e0   :  { %v3145_v58 = vpack.c.bf16 %v3139_v63, %v3139_v63  ;;  %v8589_v63 = vld [vmem:[%s10204_s6 + $0x18] ss:$60 sps:$4 sm:$0xff]  }
 0x8e1   :  { %v8131_v2 = vpop.f32.mrf.mxu0 }
 0x8e2   :  { %8135 = vmatmul.mubr.msk.bf16.vlgmr.msra.gmra.mxu1 %vm112_vm4, %v3145_v58 }
 0x8e3   :  { %8150 = vmatpush3.bf16.msra.mxu1 %v8581_v1  ;;  %8151 = vmatprep.mubr.msk.bf16.mxu1 %vm8672_vm1, %v8671_v0  ;;  %v8590_v1 = vld [vmem:[%s10204_s6 + $0x20] ss:$60 sps:$4 sm:$0xff]  }
 0x8e4   :  { %8166 = vmatprep.subr.bf16.mxu1 %v8671_v0 }
 0x8e7   :  { %v3268_v3 = vpop.f32.mrf.mxu0 }
 0x8e8   :  { %v3274_v54 = vpack.c.bf16 %v3268_v3, %v3268_v3 }
 0x8e9   :  { %v8148_v6 = vpop.f32.mrf.mxu0 }
 0x8ea   :  { %8152 = vmatmul.mubr.msk.bf16.vlgmr.msra.gmra.mxu1 %vm112_vm4, %v3274_v54 }
 0x8eb   :  { %8167 = vmatpush3.bf16.msra.mxu1 %v8582_v4  ;;  %8168 = vmatprep.mubr.msk.bf16.mxu1 %vm8672_vm1, %v8671_v0 }
 0x8ec   :  { %8183 = vmatprep.subr.bf16.mxu1 %v8671_v0 }
 0x8ef   :  { %v3397_v10 = vpop.f32.mrf.mxu0 }
 0x8f0   :  { %v3403_v20 = vpack.c.bf16 %v3397_v10, %v3397_v10 }
 0x8f1   :  { %v8165_v21 = vpop.f32.mrf.mxu0 }
 0x8f2   :  { %8169 = vmatmul.mubr.msk.bf16.vlgmr.msra.gmra.mxu1 %vm112_vm4, %v3403_v20 }
 0x8f3   :  { %8184 = vmatpush3.bf16.msra.mxu1 %v8583_v13  ;;  %8185 = vmatprep.mubr.msk.bf16.mxu1 %vm8672_vm1, %v8671_v0 }
 0x8f4   :  { %8200 = vmatprep.subr.bf16.mxu1 %v8671_v0 }
 0x8f7   :  { %v3526_v23 = vpop.f32.mrf.mxu0 }
 0x8f8   :  { %v3532_v27 = vpack.c.bf16 %v3526_v23, %v3526_v23 }
 0x8f9   :  { %v8182_v28 = vpop.f32.mrf.mxu0 }
 0x8fa   :  { %8186 = vmatmul.mubr.msk.bf16.vlgmr.msra.gmra.mxu1 %vm112_vm4, %v3532_v27 }
 0x8fb   :  { %8201 = vmatpush3.bf16.msra.mxu1 %v8584_v24  ;;  %8202 = vmatprep.mubr.msk.bf16.mxu1 %vm8672_vm1, %v8671_v0 }
 0x8fc   :  { %8214 = vmatprep.subr.bf16.mxu1 %v8671_v0 }
 0x8ff   :  { %v3655_v29 = vpop.f32.mrf.mxu0 }
 0x900   :  { %v3661_v32 = vpack.c.bf16 %v3655_v29, %v3655_v29 }
 0x901   :  { %v8199_v33 = vpop.f32.mrf.mxu0 }
 0x902   :  { %8203 = vmatmul.mubr.msk.bf16.vlgmr.msra.gmra.mxu1 %vm112_vm4, %v3661_v32 }
 0x903   :  { %8215 = vmatpush3.bf16.msra.mxu1 %v8585_v30  ;;  %8218 = vmatprep.mubr.msk.bf16.mxu1 %vm8672_vm1, %v8671_v0 }
 0x904   :  { %8216 = vmatprep.subr.bf16.mxu1 %v8671_v0 }
 0x907   :  { %8217 = vmatpush3.bf16.msra.mxu1 %v8586_v34 }
 0x908   :  { %8230 = vmatprep.subr.bf16.mxu1 %v8671_v0 }
 0x90a   :  { %8219 = vmatmul.mubr.msk.bf16.vlgmr.msra.gmra.mxu1 %vm168_vm3, %v8769_v8 }
 0x90b   :  { %8234 = vmatprep.mubr.msk.bf16.mxu1 %vm8672_vm1, %v8671_v0  ;;  %8231 = vmatpush3.bf16.msra.mxu1 %v8588_v59 }
 0x90c   :  { %8232 = vmatprep.subr.bf16.mxu1 %v8671_v0 }
 0x90f   :  { %8233 = vmatpush3.bf16.msra.mxu1 %v8590_v1 }
 0x95a   :  { %v2028_v35 = vpop.f32.mrf.mxu1 }
 0x95b   :  { %v2034_v36 = vadd.f32 %v2028_v35, %v9420_v9  ;;  %v8587_v9 = vld [vmem:[%s10204_s6 + $0x90] ss:$60 sps:$4 sm:$0xff]  }
 0x95c   :  { %v7983_v37 = vpop.f32.mrf.mxu1  ;;  %8207 = vmatpush3.bf16.msra.mxu0 %v8587_v9 }
 0x95d   :  { %8208 = vmatprep.subr.bf16.mxu0 %v8671_v0 }
 0x95e   :  { %v2031_v47 = vpop.f32.mrf.mxu1 }
 0x960   :  { %v7984_v52 = vpop.f32.mrf.mxu1  ;;  %8209 = vmatpush3.bf16.msra.mxu0 %v8589_v63 }
 0x961   :  { %8222 = vmatprep.subr.bf16.mxu0 %v8671_v0 }
 0x962   :  { %v2157_v45 = vpop.f32.mrf.mxu1 }
 0x963   :  { %v2163_v38 = vadd.f32 %v2157_v45, %v2034_v36 }
 0x964   :  { %v8000_v49 = vpop.f32.mrf.mxu1 }
 0x966   :  { %v2160_v41 = vpop.f32.mrf.mxu1 }
 0x968   :  { %v8001_v43 = vpop.f32.mrf.mxu1 }
 0x96a   :  { %v2286_v44 = vpop.f32.mrf.mxu1 }
 0x96b   :  { %v2292_v46 = vadd.f32 %v2286_v44, %v2163_v38 }
 0x96c   :  { %v8017_v48 = vpop.f32.mrf.mxu1 }
 0x96e   :  { %v2289_v50 = vpop.f32.mrf.mxu1 }
 0x970   :  { %v8018_v51 = vpop.f32.mrf.mxu1 }
 0x972   :  { %v2415_v53 = vpop.f32.mrf.mxu1 }
 0x973   :  { %v2421_v38 = vadd.f32 %v2415_v53, %v2292_v46 }
 0x974   :  { %v8034_v55 = vpop.f32.mrf.mxu1 }
 0x976   :  { %v2418_v56 = vpop.f32.mrf.mxu1 }
 0x978   :  { %v8035_v57 = vpop.f32.mrf.mxu1 }
 0x97a   :  { %v2544_v61 = vpop.f32.mrf.mxu1 }
 0x97b   :  { %v2550_v41 = vadd.f32 %v2544_v61, %v2421_v38 }
 0x97c   :  { %v8051_v62 = vpop.f32.mrf.mxu1 }
 0x97e   :  { %v2547_v58 = vpop.f32.mrf.mxu1 }
 0x980   :  { %v8052_v2 = vpop.f32.mrf.mxu1 }
 0x982   :  { %v2673_v3 = vpop.f32.mrf.mxu1 }
 0x983   :  { %v2679_v44 = vadd.f32 %v2673_v3, %v2550_v41 }
 0x984   :  { %v8068_v4 = vpop.f32.mrf.mxu1 }
 0x986   :  { %v2676_v54 = vpop.f32.mrf.mxu1 }
 0x988   :  { %v8069_v6 = vpop.f32.mrf.mxu1 }
 0x98a   :  { %v2802_v10 = vpop.f32.mrf.mxu1 }
 0x98b   :  { %v2808_v50 = vadd.f32 %v2802_v10, %v2679_v44 }
 0x98c   :  { %v8085_v13 = vpop.f32.mrf.mxu1 }
 0x98e   :  { %v2805_v20 = vpop.f32.mrf.mxu1 }
 0x98f   :  { %v3883_v20 = vpop.permute.xlu1 %3882 }
 0x990   :  { %v8086_v21 = vpop.f32.mrf.mxu1 }
 0x992   :  { %v2931_v23 = vpop.f32.mrf.mxu1 }
 0x993   :  { %v2937_v55 = vadd.f32 %v2931_v23, %v2808_v50 }
 0x994   :  { %v8102_v24 = vpop.f32.mrf.mxu1 }
 0x996   :  { %v2934_v27 = vpop.f32.mrf.mxu1 }
 0x998   :  { %v8103_v28 = vpop.f32.mrf.mxu1 }
 0x99a   :  { %v3060_v29 = vpop.f32.mrf.mxu1 }
 0x99b   :  { %v3066_v57 = vadd.f32 %v3060_v29, %v2937_v55 }
 0x99c   :  { %v8119_v30 = vpop.f32.mrf.mxu1 }
 0x99e   :  { %v3063_v32 = vpop.f32.mrf.mxu1 }
 0x9a0   :  { %v8120_v33 = vpop.f32.mrf.mxu1 }
 0x9a2   :  { %v3189_v34 = vpop.f32.mrf.mxu1 }
 0x9a3   :  { %v3195_v59 = vadd.f32 %v3189_v34, %v3066_v57  ;;  %v8670_v34 = vld [vmem:[%s10205_s1] sm:$0x3] }
 0x9a4   :  { %v8136_v35 = vpop.f32.mrf.mxu1 }
 0x9a6   :  { %v3192_v36 = vpop.f32.mrf.mxu1 }
 0x9a8   :  { %v8137_v37 = vpop.f32.mrf.mxu1 }
 0x9aa   :  { %v3318_v47 = vpop.f32.mrf.mxu1 }
 0x9ab   :  { %v3324_v63 = vadd.f32 %v3318_v47, %v3195_v59 }
 0x9ac   :  { %v8153_v52 = vpop.f32.mrf.mxu1 }
 0x9ae   :  { %v3321_v45 = vpop.f32.mrf.mxu1 }
 0x9b0   :  { %v8154_v49 = vpop.f32.mrf.mxu1 }
 0x9b2   :  { %v3447_v43 = vpop.f32.mrf.mxu1 }
 0x9b3   :  { %v3453_v58 = vadd.f32 %v3447_v43, %v3324_v63 }
 0x9b4   :  { %v8170_v48 = vpop.f32.mrf.mxu1 }
 0x9b6   :  { %v3450_v51 = vpop.f32.mrf.mxu1 }
 0x9b7   :  { %v7304_v51 = vld [vmem:[%s10207_s4 + $0x10] ss:$0 sm:$0xff] }
 0x9b8   :  { %v8171_v56 = vpop.f32.mrf.mxu1 }
 0x9b9   :  { %v7305_v56 = vld [vmem:[%s10207_s4 + $0x11] ss:$0 sm:$0xff] }
 0x9ba   :  { %v3576_v9 = vpop.f32.mrf.mxu1 }
 0x9bb   :  { %v3582_v4 = vadd.f32 %v3576_v9, %v3453_v58  ;;  %v8593_v58 = vld [vmem:[%s10204_s6 + $0xa0] ss:$60 sps:$4 sm:$0xff]  }
 0x9bc   :  { %v8187_v62 = vpop.f32.mrf.mxu1 }
 0x9bd   :  { %v8591_v62 = vld [vmem:[%s10204_s6 + $0x9c] ss:$60 sps:$4 sm:$0xff]  }
 0x9be   :  { %v3579_v1 = vpop.f32.mrf.mxu1 }
 0x9bf   :  { %v8592_v1 = vld [vmem:[%s10204_s6 + $0x24] ss:$60 sps:$4 sm:$0xff]  }
 0x9c0   :  { %v8188_v2 = vpop.f32.mrf.mxu1 }
 0x9c2   :  { %v3705_v54 = vpop.f32.mrf.mxu1 }
 0x9c3   :  { %v3711_v46 = vadd.f32 %v3705_v54, %v3582_v4 }
 0x9c4   :  { %v8204_v53 = vpop.f32.mrf.mxu1 }
 0x9c5   :  { %v3714_v61 = vsel %vm10213_vm5, %v3711_v46, 0.0 }
 0x9c6   :  { %v3715_v3 = vrot.slane %v3714_v61, 4  ;;  %v3708_v6 = vpop.f32.mrf.mxu1 }
 0x9c8   :  { %v3716_v10 = vadd.f32 %v3715_v3, %v3714_v61  ;;  %v8205_v13 = vpop.f32.mrf.mxu1 }
 0x9ca   :  { %v3717_v21 = vrot.slane %v3716_v10, 2  ;;  %v3861_v23 = vpop.f32.mrf.mxu1 }
 0x9cb   :  { %v3885_v24 = vadd.f32 %v3883_v20, %v3861_v23 }
 0x9cc   :  { %v3718_v27 = vadd.f32 %v3717_v21, %v3716_v10  ;;  %v8220_v28 = vpop.f32.mrf.mxu1 }
 0x9cd   :  { %3887 = vrot.lane.b32.xlu1 %v3885_v24, %s8678_s28 }
 0x9ce   :  { %v3719_v29 = vrot.slane %v3718_v27, 1  ;;  %v3864_v30 = vpop.f32.mrf.mxu1 }
 0x9d0   :  { %v3720_v32 = vadd.f32 %v3719_v29, %v3718_v27  ;;  %v8221_v33 = vpop.f32.mrf.mxu1 }
 0x9d1   :  { %787 = vrot.lane.b32.xlu1 %v8670_v34, %s8679_s14 }
 0x9d2   :  { %v3721_v35 = vmul.f32 0.5, %v3720_v32 }
 0x9d4   :  { %v3722_v36 = vsub.f32 %v3711_v46, %v3721_v35 }
 0x9d6   :  { %v3723_v37 = vmul.f32 %v3722_v36, %v3722_v36 }
 0x9d8   :  { %v3724_v47 = vsel %vm10213_vm5, %v3723_v37, 0.0 }
 0x9d9   :  { %v3725_v52 = vrot.slane %v3724_v47, 4 }
 0x9db   :  { %v3726_v45 = vadd.f32 %v3725_v52, %v3724_v47 }
 0x9dd   :  { %v3727_v38 = vrot.slane %v3726_v45, 2 }
 0x9df   :  { %v3728_v49 = vadd.f32 %v3727_v38, %v3726_v45 }
 0x9e1   :  { %v3729_v41 = vrot.slane %v3728_v49, 1 }
 0x9e3   :  { %v3730_v43 = vadd.f32 %v3729_v41, %v3728_v49 }
 0x9e5   :  { %v3731_v44 = vmul.f32 0.5, %v3730_v43 }
 0x9e7   :  { %v3732_v48 = vadd.f32 1e-05, %v3731_v44 }
 0x9e9   :  { %8628 = vrsqrt.f32 %v3732_v48 }
 0x9f6   :  { %v8629_v50 = vpop.eup %8628 }
 0x9f7   :  { %v3734_v55 = vmul.f32 %v8629_v50, %v3722_v36 }
 0x9f9   :  { %v3741_v57 = vmul.f32 %v7304_v51, %v3734_v55 }
 0x9fb   :  { %v3748_v9 = vadd.f32 %v7305_v56, %v3741_v57 }
 0x9fd   :  { %v3749_v59 = vmax.f32 %v3748_v9, 0.0 }
 0x9ff   :  { %v3759_v63 = vpack.c.bf16 %v3749_v59, %v3749_v59 }
 0xa01   :  { %8211 = vmatmul.mubr.msk.bf16.vlgmr.msra.gmra.mxu0 %vm168_vm3, %v3759_v63  ;;  %8235 = vmatmul.mubr.msk.bf16.vlgmr.msra.gmra.mxu1 %vm168_vm3, %v3759_v63 }
 0xa02   :  { %8223 = vmatpush3.bf16.msra.mxu0 %v8591_v62  ;;  %8226 = vmatprep.mubr.msk.bf16.mxu0 %vm8672_vm1, %v8671_v0  ;;  %v7320_v62 = vld [vmem:[%s10207_s4 + $0x13] ss:$0 sm:$0xff] }
 0xa03   :  { %8224 = vmatprep.subr.bf16.mxu0 %v8671_v0  ;;  %4259 = vmatprep.mubr.bf16.mxu1 %v8673_v11  ;;  %v8594_v11 = vld [vmem:[%s10204_s6 + $0x28] ss:$60 sps:$4 sm:$0xff]  }
 0xa06   :  { %8225 = vmatpush3.bf16.msra.mxu0 %v8592_v1  ;;  %v7321_v1 = vld [vmem:[%s10207_s4 + $0x14] ss:$0 sm:$0xff] }
 0xa07   :  { %8238 = vmatprep.subr.bf16.mxu0 %v8671_v0 }
 0xa09   :  { %8227 = vmatmul.mubr.msk.bf16.vlgmr.msra.gmra.mxu0 %vm168_vm3, %v8769_v8 }
 0xa0a   :  { %8242 = vmatprep.mubr.msk.bf16.mxu0 %vm8672_vm1, %v8671_v0  ;;  %8239 = vmatpush3.bf16.msra.mxu0 %v8593_v58 }
 0xa0b   :  { %8240 = vmatprep.subr.bf16.mxu0 %v8671_v0 }
 0xa0e   :  { %8241 = vmatpush3.bf16.msra.mxu0 %v8594_v11 }
 0xa3f   :  { %v3888_v48 = vpop.permute.xlu1 %3887 }
 0xac1   :  { %v3809_v2 = vpop.f32.mrf.mxu0  ;;  %v4011_v4 = vpop.f32.mrf.mxu1 }
 0xac2   :  { %v3867_v54 = vadd.f32 %v3861_v23, %v3809_v2 }
 0xac3   :  { %v8212_v46 = vpop.f32.mrf.mxu0  ;;  %v8236_v8 = vpop.f32.mrf.mxu1 }
 0xac4   :  { %v3874_v53 = vadd.f32 %v9409_v60, %v3867_v54  ;;  %v3881_v46 = vadd.f32 %v9409_v60, %v3809_v2 }
 0xac5   :  { %v3812_v61 = vpop.f32.mrf.mxu0  ;;  %v4014_v3 = vpop.f32.mrf.mxu1 }
 0xac6   :  { %v7313_v6 = vmul.f32 -1.442695, %v3874_v53  ;;  %v7322_v3 = vld [vmem:[%s10207_s4 + $0x15] ss:$0 sm:$0xff] }
 0xac7   :  { %v8213_v10 = vpop.f32.mrf.mxu0  ;;  %v8237_v13 = vpop.f32.mrf.mxu1 }
 0xac8   :  { %8630 = vpow2.f32 %v7313_v6 }
 0xac9   :  { %v3959_v20 = vpop.f32.mrf.mxu0 }
 0xaca   :  { %v4012_v21 = vadd.f32 %v4011_v4, %v3959_v20 }
 0xacb   :  { %v8228_v24 = vpop.f32.mrf.mxu0 }
 0xacc   :  { %v4019_v27 = vsel %vm10213_vm5, %v4012_v21, 0.0 }
 0xacd   :  { %v4020_v28 = vrot.slane %v4019_v27, 4  ;;  %v3962_v29 = vpop.f32.mrf.mxu0 }
 0xace   :  { %v8597_v29 = vld [vmem:[%s10204_s6 + $0xa8] ss:$60 sps:$4 sm:$0xff]  }
 0xacf   :  { %v4021_v30 = vadd.f32 %v4020_v28, %v4019_v27  ;;  %v8229_v32 = vpop.f32.mrf.mxu0  ;;  %v8595_v28 = vld [vmem:[%s10204_s6 + $0xa4] ss:$60 sps:$4 sm:$0xff]   ;;  %4239 = vmatprep.subr.bf16.mxu1 %v8597_v29 }
 0xad0   :  { %4240 = vmatpush1.bf16.msra.mxu1 %v8595_v28  ;;  %v8598_v32 = vld [vmem:[%s10204_s6 + $0x2c] ss:$60 sps:$4 sm:$0xff]  }
 0xad1   :  { %v4022_v23 = vrot.slane %v4021_v30, 2 }
 0xad3   :  { %v4023_v33 = vadd.f32 %v4022_v23, %v4021_v30  ;;  %v8600_v30 = vld [vmem:[%s10204_s6 + $0x30] ss:$60 sps:$4 sm:$0xff]   ;;  %v37_v23 = vld [vmem:[%s10210_s2] sm:$0x3] }
 0xad4   :  { %4241 = vmatprep.subr.bf16.mxu1 %v8600_v30 }
 0xad5   :  { %v8631_v34 = vpop.eup %8630  ;;  %v4024_v35 = vrot.slane %v4023_v33, 1  ;;  %4242 = vmatpush1.bf16.msra.mxu1 %v8598_v32 }
 0xad6   :  { %v3878_v36 = vadd.f32 1.0, %v8631_v34 }
 0xad7   :  { %v4025_v37 = vadd.f32 %v4024_v35, %v4023_v33 }
 0xad8   :  { %8632 = vrcp.f32 %v3878_v36 }
 0xad9   :  { %v4026_v47 = vmul.f32 0.5, %v4025_v37 }
 0xadb   :  { %v4027_v52 = vsub.f32 %v4012_v21, %v4026_v47  ;;  %v9610_v47 = vpop.permute.xlu1 %787 }
 0xadd   :  { %v4028_v45 = vmul.f32 %v4027_v52, %v4027_v52 }
 0xadf   :  { %v4029_v38 = vsel %vm10213_vm5, %v4028_v45, 0.0 }
 0xae0   :  { %v4030_v49 = vrot.slane %v4029_v38, 4 }
 0xae2   :  { %v4031_v41 = vadd.f32 %v4030_v49, %v4029_v38 }
 0xae4   :  { %v4032_v43 = vrot.slane %v4031_v41, 2 }
 0xae5   :  { %v8633_v44 = vpop.eup %8632 }
 0xae6   :  { %v4033_v50 = vadd.f32 %v4032_v43, %v4031_v41  ;;  %v3890_v51 = vmul.f32 %v8633_v44, %v3888_v48  ;;  %v3897_v36 = vsub.f32 1.0, %v8633_v44  ;;  %v9624_v48 = vsub.s32 %v8952_v39, %v9001_v25 }
 0xae8   :  { %v4034_v55 = vrot.slane %v4033_v50, 1  ;;  %3892 = vrot.lane.b32.xlu0 %v3890_v51, %s8678_s28  ;;  %vm4344_vm14 = vcmp.eq.s32.totalorder %v9624_v48, 0  ;;  %vm4356_vm15 = vcmp.eq.s32.totalorder %v9624_v48, 2  ;;  %vm4687_vm12 = vcmp.eq.s32.totalorder %v9624_v48, 6 }
 0xaea   :  { %v4035_v56 = vadd.f32 %v4034_v55, %v4033_v50 }
 0xaec   :  { %v4036_v57 = vmul.f32 0.5, %v4035_v56 }
 0xaee   :  { %v4037_v9 = vadd.f32 1e-05, %v4036_v57 }
 0xaf0   :  { %8634 = vrsqrt.f32 %v4037_v9 }
 0xafd   :  { %v8635_v59 = vpop.eup %8634 }
 0xafe   :  { %v4039_v63 = vmul.f32 %v8635_v59, %v4027_v52  ;;  %v3903_v52 = vmul.f32 %v8633_v44, %v9610_v47  ;;  %v7331_v44 = vsel %vm4344_vm14, 1.0, %v8671_v0 }
 0xb00   :  { %v4046_v58 = vmul.f32 %v7320_v62, %v4039_v63 }
 0xb02   :  { %v4053_v11 = vadd.f32 %v7321_v1, %v4046_v58 }
 0xb04   :  { %v4054_v4 = vmax.f32 %v4053_v11, 0.0 }
 0xb06   :  { %v4059_v54 = vpack.c.bf16 %v4054_v4, %v4054_v4 }
 0xb08   :  { %8243 = vmatmul.mubr.msk.bf16.vlgmr.msra.gmra.mxu0 %vm168_vm3, %v4059_v54 }
 0xb5a   :  { %v3893_v8 = vpop.permute.xlu0 %3892 }
 0xb5b   :  { %v3895_v53 = vadd.f32 %v3893_v8, %v3881_v46 }
 0xb5d   :  { %8636 = vtanh.f32 %v3895_v53 }
 0xb6a   :  { %v8637_v61 = vpop.eup %8636 }
 0xb6b   :  { %3899 = vrot.lane.b32.xlu0 %v8637_v61, %s8677_s29 }
 0xbc8   :  { %v4116_v6 = vpop.f32.mrf.mxu0 }
 0xbc9   :  { %v4117_v10 = vadd.f32 %v7322_v3, %v4116_v6 }
 0xbca   :  { %v8244_v13 = vpop.f32.mrf.mxu0 }
 0xbcb   :  { %v4122_v20 = vmax.f32 %v4117_v10, -5.0 }
 0xbcc   :  { %v4119_v21 = vpop.f32.mrf.mxu0 }
 0xbcd   :  { %v9591_v24 = vmin.f32 %v4122_v20, 2.0 }
 0xbce   :  { %v8245_v27 = vpop.f32.mrf.mxu0 }
 0xbcf   :  { %v4124_v60 = vmul.f32 0.5, %v9591_v24 }
 0xbd1   :  { %v4125_v2 = vmul.f32 1.442695, %v4124_v60 }
 0xbd3   :  { %8638 = vpow2.f32 %v4125_v2 }
 0xbdd   :  { %v3900_v35 = vpop.permute.xlu0 %3899 }
 0xbde   :  { %v3902_v37 = vmul.f32 %v3900_v35, %v3897_v36 }
 0xbe0   :  { %v8639_v33 = vpop.eup %8638  ;;  %v9613_v45 = vadd.f32 %v3903_v52, %v3902_v37 }
 0xbe1   :  { %v4127_v34 = vmul.f32 %v8639_v33, %v37_v23 }
 0xbe3   :  { %4129 = vrot.lane.b32.xlu1 %v4127_v34, %s8679_s14 }
 0xc55   :  { %v4130_v38 = vpop.permute.xlu1 %4129 }
 0xc56   :  { %v9616_v49 = vadd.f32 %v4130_v38, %v9613_v45 }
 0xc58   :  { %v4200_v41 = vpack.c.bf16 %v9616_v49, %v9616_v49 }
 0xc5a   :  { %4202 = vrot.lane.b32.xlu0 %v4200_v41, %s8677_s29 }
 0xccc   :  { %v4203_v43 = vpop.permute.xlu0 %4202 }
 0xccd   :  { %7330 = vmatmul.mubr.msk.bf16.vlgmr.msra.gmra.mxu1 %vm168_vm3, %v4203_v43 }
 0xcce   :  { %8256 = vmatprep.mubr.msk.f32.mxu1 %vm4371_vm13, %v7331_v44 }
 0xd8d   :  { %v4261_v50 = vpop.f32.mrf.mxu1 }
 0xd8e   :  { %v4270_v51 = vsel %vm51_vm0, %v4261_v50, 0.0 }
 0xd8f   :  { %v4271_v55 = vrot.slane %v4270_v51, 4  ;;  %v4263_v56 = vpop.f32.mrf.mxu1 }
 0xd90   :  { %v4277_v57 = vsel %vm51_vm0, %v4263_v56, 0.0 }
 0xd91   :  { %v4272_v9 = vadd.f32 %v4271_v55, %v4270_v51  ;;  %v4278_v59 = vrot.slane %v4277_v57, 4  ;;  %v4265_v62 = vpop.f32.mrf.mxu1  ;;  %v7335_v51 = vsel %vm4356_vm15, 1.0, %v8671_v0  ;;  %v4269_v55 = vld [vmem:[%s10207_s4 + $0x18] sm:$0x3] }
 0xd92   :  { %8248 = vmatprep.mubr.msk.f32.mxu0 %vm4371_vm13, %v7335_v51  ;;  %v9646_v62 = vsub.s32 %v9017_v17, %v9001_v25 }
 0xd93   :  { %v4273_v63 = vrot.slane %v4272_v9, 2  ;;  %v4279_v1 = vadd.f32 %v4278_v59, %v4277_v57  ;;  %v4266_v58 = vpop.f32.mrf.mxu1  ;;  %v4329_v59 = vrot.slane %v4269_v55, %v8955_v40 }
 0xd94   :  { %v9650_v58 = vsub.s32 %v9008_v15, %v9001_v25  ;;  %vm4345_vm2 = vcmp.eq.s32.totalorder %v9646_v62, 0  ;;  %vm4357_vm14 = vcmp.eq.s32.totalorder %v9646_v62, 2 }
 0xd95   :  { %v4274_v11 = vadd.f32 %v4273_v63, %v4272_v9  ;;  %v4280_v4 = vrot.slane %v4279_v1, 2  ;;  %v7332_v15 = vsel %vm4345_vm2, 1.0, %v8671_v0 }
 0xd96   :  { %vm4346_vm6 = vcmp.eq.s32.totalorder %v9650_v58, 0  ;;  %vm4358_vm15 = vcmp.eq.s32.totalorder %v9650_v58, 2  ;;  %vm4572_vm5 = vcmp.eq.s32.totalorder %v9650_v58, 4 }
 0xd97   :  { %v4275_v54 = vrot.slane %v4274_v11, 1  ;;  %v4281_v46 = vadd.f32 %v4280_v4, %v4279_v1  ;;  %v9654_v4 = vsub.s32 %v8999_v12, %v9001_v25  ;;  %v4333_v25 = vrot.slane %v4269_v55, %v8961_v42 }
 0xd98   :  { %v7333_v17 = vsel %vm4346_vm6, 1.0, %v8671_v0  ;;  %vm4688_vm6 = vcmp.eq.s32.totalorder %v9646_v62, 6 }
 0xd99   :  { %v4276_v8 = vadd.f32 %v4275_v54, %v4274_v11  ;;  %v4282_v53 = vrot.slane %v4281_v46, 1  ;;  %vm4347_vm11 = vcmp.eq.s32.totalorder %v9654_v4, 0  ;;  %vm4359_vm2 = vcmp.eq.s32.totalorder %v9654_v4, 2 }
 0xd9b   :  { %v4284_v61 = vmul.f32 0.5, %v4276_v8  ;;  %v4283_v3 = vadd.f32 %v4282_v53, %v4281_v46  ;;  %v7334_v53 = vsel %vm4347_vm11, 1.0, %v8671_v0  ;;  %vm4570_vm11 = vcmp.eq.s32.totalorder %v9624_v48, 4 }
 0xd9c   :  { %v7349_v48 = vsel %vm4570_vm11, 1.0, %v8671_v0  ;;  %vm4923_vm11 = vcmp.eq.s32.totalorder %v9650_v58, 10 }
 0xd9d   :  { %v4286_v6 = vsub.f32 %v4261_v50, %v4284_v61  ;;  %v4285_v10 = vmul.f32 0.5, %v4283_v3  ;;  %v4268_v50 = vld [vmem:[%s10207_s4 + $0x16] sm:$0x3]  ;;  %v7358_v3 = vsel %vm4687_vm12, 1.0, %v8671_v0  ;;  %vm4689_vm12 = vcmp.eq.s32.totalorder %v9650_v58, 6 }
 0xd9e   :  { %v4320_v8 = vrot.slane %v4268_v50, %v8961_v42 }
 0xd9f   :  { %v4288_v13 = vmul.f32 %v4286_v6, %v4286_v6  ;;  %v4287_v20 = vsub.f32 %v4263_v56, %v4285_v10  ;;  %v4316_v56 = vrot.slane %v4268_v50, %v8955_v40 }
 0xda1   :  { %v4290_v21 = vsel %vm51_vm0, %v4288_v13, 0.0  ;;  %v4289_v27 = vmul.f32 %v4287_v20, %v4287_v20 }
 0xda2   :  { %v4291_v60 = vrot.slane %v4290_v21, 4 }
 0xda3   :  { %v4297_v2 = vsel %vm51_vm0, %v4289_v27, 0.0 }
 0xda4   :  { %v4292_v28 = vadd.f32 %v4291_v60, %v4290_v21  ;;  %v4298_v29 = vrot.slane %v4297_v2, 4  ;;  %v7337_v21 = vsel %vm4358_vm15, 1.0, %v8671_v0  ;;  %vm4690_vm15 = vcmp.eq.s32.totalorder %v9654_v4, 6 }
 0xda6   :  { %v4293_v30 = vrot.slane %v4292_v28, 2  ;;  %v4299_v32 = vadd.f32 %v4298_v29, %v4297_v2  ;;  %v7338_v2 = vsel %vm4359_vm2, 1.0, %v8671_v0  ;;  %v7360_v29 = vsel %vm4689_vm12, 1.0, %v8671_v0 }
 0xda7   :  { %vm4573_vm2 = vcmp.eq.s32.totalorder %v9654_v4, 4  ;;  %vm4924_vm12 = vcmp.eq.s32.totalorder %v9654_v4, 10 }
 0xda8   :  { %v4294_v23 = vadd.f32 %v4293_v30, %v4292_v28  ;;  %v4300_v33 = vrot.slane %v4299_v32, 2  ;;  %v7359_v28 = vsel %vm4688_vm6, 1.0, %v8671_v0  ;;  %vm4922_vm6 = vcmp.eq.s32.totalorder %v9646_v62, 10 }
 0xdaa   :  { %v4295_v34 = vrot.slane %v4294_v23, 1  ;;  %v4301_v35 = vadd.f32 %v4300_v33, %v4299_v32  ;;  %v7351_v33 = vsel %vm4572_vm5, 1.0, %v8671_v0  ;;  %vm4805_vm5 = vcmp.eq.s32.totalorder %v9646_v62, 8 }
 0xdac   :  { %v4296_v36 = vadd.f32 %v4295_v34, %v4294_v23  ;;  %v4302_v37 = vrot.slane %v4301_v35, 1  ;;  %v7361_v23 = vsel %vm4690_vm15, 1.0, %v8671_v0  ;;  %vm4807_vm15 = vcmp.eq.s32.totalorder %v9654_v4, 8 }
 0xdad   :  { %v7369_v55 = vsel %vm4807_vm15, 1.0, %v8671_v0  ;;  %vm5390_vm15 = vcmp.eq.s32.totalorder %v9650_v58, 18 }
 0xdae   :  { %v4304_v52 = vmul.f32 0.5, %v4296_v36  ;;  %v4303_v38 = vadd.f32 %v4302_v37, %v4301_v35  ;;  %v7352_v36 = vsel %vm4573_vm2, 1.0, %v8671_v0  ;;  %v7374_v37 = vsel %vm4922_vm6, 1.0, %v8671_v0 }
 0xdaf   :  { %vm5156_vm2 = vcmp.eq.s32.totalorder %v9646_v62, 14  ;;  %vm5157_vm6 = vcmp.eq.s32.totalorder %v9650_v58, 14 }
 0xdb0   :  { %v4306_v41 = vadd.f32 1e-05, %v4304_v52  ;;  %v4305_v43 = vmul.f32 0.5, %v4303_v38  ;;  %v7375_v52 = vsel %vm4923_vm11, 1.0, %v8671_v0  ;;  %vm5039_vm11 = vcmp.eq.s32.totalorder %v9646_v62, 12 }
 0xdb2   :  { %8640 = vrsqrt.f32 %v4306_v41  ;;  %v4307_v44 = vadd.f32 1e-05, %v4305_v43  ;;  %v7367_v43 = vsel %vm4805_vm5, 1.0, %v8671_v0  ;;  %vm5158_vm5 = vcmp.eq.s32.totalorder %v9654_v4, 14 }
 0xdb4   :  { %8642 = vrsqrt.f32 %v4307_v44  ;;  %v7376_v44 = vsel %vm4924_vm12, 1.0, %v8671_v0  ;;  %vm5040_vm12 = vcmp.eq.s32.totalorder %v9650_v58, 12 }
 0xdbf   :  { %v8641_v57 = vpop.eup %8640 }
 0xdc0   :  { %v4310_v9 = vmul.f32 %v8641_v57, %v4286_v6  ;;  %v9694_v6 = vld [vmem:[%s10207_s4 + $0x8] ss:$0 sm:$0xff]  ;;  %v7389_v57 = vsel %vm5157_vm6, 1.0, %v8671_v0  ;;  %vm5274_vm6 = vcmp.eq.s32.totalorder %v9650_v58, 16 }
 0xdc1   :  { %v8643_v1 = vpop.eup %8642 }
 0xdc2   :  { %v4323_v63 = vmul.f32 %v4316_v56, %v4310_v9  ;;  %v4311_v46 = vmul.f32 %v8643_v1, %v4287_v20  ;;  %v7336_v20 = vsel %vm4357_vm14, 1.0, %v8671_v0  ;;  %vm4571_vm14 = vcmp.eq.s32.totalorder %v9646_v62, 4 }
 0xdc3   :  { %v7350_v32 = vsel %vm4571_vm14, 1.0, %v8671_v0  ;;  %vm4806_vm14 = vcmp.eq.s32.totalorder %v9650_v58, 8  ;;  %v7388_v56 = vsel %vm5156_vm2, 1.0, %v8671_v0  ;;  %v7390_v62 = vsel %vm5158_vm5, 1.0, %v8671_v0 }
 0xdc4   :  { %v4336_v11 = vadd.f32 %v4329_v59, %v4323_v63  ;;  %v4324_v12 = vmul.f32 %v4320_v8, %v4311_v46  ;;  %v7368_v50 = vsel %vm4806_vm14, 1.0, %v8671_v0  ;;  %v7381_v63 = vsel %vm5039_vm11, 1.0, %v8671_v0 }
 0xdc5   :  { %v7382_v1 = vsel %vm5040_vm12, 1.0, %v8671_v0  ;;  %vm5041_vm14 = vcmp.eq.s32.totalorder %v9654_v4, 12  ;;  %v7400_v8 = vsel %vm5390_vm15, 1.0, %v8671_v0  ;;  %vm5391_vm2 = vcmp.eq.s32.totalorder %v9654_v4, 18 }
 0xdc6   :  { %v4338_v54 = vmax.f32 %v4336_v11, 0.0  ;;  %v4337_v61 = vadd.f32 %v4333_v25, %v4324_v12  ;;  %v7401_v12 = vsel %vm5391_vm2, 1.0, %v8671_v0  ;;  %vm5275_vm11 = vcmp.eq.s32.totalorder %v9654_v4, 16 }
 0xdc7   :  { %v7395_v25 = vsel %vm5274_vm6, 1.0, %v8671_v0  ;;  %vm5624_vm5 = vcmp.eq.s32.totalorder %v9650_v58, 22  ;;  %vm5625_vm12 = vcmp.eq.s32.totalorder %v9654_v4, 22  ;;  %vm5508_vm15 = vcmp.eq.s32.totalorder %v9654_v4, 20 }
 0xdc8   :  { %4582 = vrot.lane.b32.xlu0 %v4338_v54, %s8677_s29  ;;  %4369 = vrot.lane.b32.xlu1 %v4338_v54, %s8675_s11  ;;  %v9677_v42 = vmax.f32 %v4337_v61, 0.0  ;;  %vm5859_vm2 = vcmp.eq.s32.totalorder %v9654_v4, 26  ;;  %vm5742_vm6 = vcmp.eq.s32.totalorder %v9654_v4, 24 }
 0xdc9   :  { %8254 = vmatprep.subr.msk.mxu1 %vm51_vm0, %v4338_v54 }
 0xdca   :  { %8255 = vmatpush3.msk.msra.mxu1 %vm51_vm0, %v4338_v54 }
 0xdcb   :  { %8257 = vmatmul.mubr.msk.f32.vlgmr.msra.gmra.mxu1 %vm4371_vm13, %v7332_v15 }
 0xdcc   :  { %4816 = vrot.lane.b32.xlu0 %v4338_v54, %s8678_s28  ;;  %4699 = vrot.lane.b32.xlu1 %v4338_v54, %s8674_s30 }
 0xdcd   :  { %8259 = vmatprep.mubr.msk.f32.mxu1 %vm4371_vm13, %v7333_v17  ;;  %v7396_v17 = vsel %vm5275_vm11, 1.0, %v8671_v0  ;;  %vm6093_vm11 = vcmp.eq.s32.totalorder %v9654_v4, 30 }
 0xdcf   :  { %8260 = vmatmul.mubr.msk.f32.gmra.mxu1 %vm4371_vm13, %v7334_v53  ;;  %v7410_v53 = vsel %vm5624_vm5, 1.0, %v8671_v0  ;;  %vm5976_vm5 = vcmp.eq.s32.totalorder %v9654_v4, 28  ;;  %v750_v4 = vadd.f32 %v9059_v31, %v8996_v5 }
 0xdd0   :  { %5050 = vrot.lane.b32.xlu0 %v4338_v54, %s8679_s14  ;;  %4933 = vrot.lane.b32.xlu1 %v4338_v54, %s8680_s23 }
 0xdd1   :  { %8272 = vmatprep.mubr.msk.f32.mxu1 %vm4371_vm13, %v7358_v3  ;;  %v7411_v3 = vsel %vm5625_vm12, 1.0, %v8671_v0  ;;  %vm4182_vm12 = vcmask 1042176  }
 0xdd4   :  { %5167 = vrot.lane.b32.xlu1 %v4338_v54, %s8681_s24  ;;  %5400 = vrot.lane.b32.xlu0 %v9677_v42, %s8675_s11  ;;  %v7383_v54 = vsel %vm5041_vm14, 1.0, %v8671_v0  ;;  %vm5507_vm14 = vcmp.eq.s32.totalorder %v9650_v58, 20  ;;  %v7406_v58 = vsel %vm5508_vm15, 1.0, %v8671_v0 }
 0xdd8   :  { %5517 = vrot.lane.b32.xlu1 %v9677_v42, %s8677_s29  ;;  %5634 = vrot.lane.b32.xlu0 %v9677_v42, %s8674_s30 }
 0xddc   :  { %5751 = vrot.lane.b32.xlu1 %v9677_v42, %s8678_s28  ;;  %5868 = vrot.lane.b32.xlu0 %v9677_v42, %s8680_s23 }
 0xde0   :  { %5985 = vrot.lane.b32.xlu1 %v9677_v42, %s8679_s14  ;;  %6102 = vrot.lane.b32.xlu0 %v9677_v42, %s8681_s24 }
 0xde4   :  { %765 = vrot.lane.b32.xlu1 %v9694_v6, %s8677_s29 }
 0xe3a   :  { %v4583_v10 = vpop.permute.xlu0 %4582  ;;  %v4370_v13 = vpop.permute.xlu1 %4369 }
 0xe3b   :  { %8246 = vmatprep.subr.msk.mxu0 %vm51_vm0, %v4370_v13 }
 0xe3c   :  { %8247 = vmatpush3.msk.msra.mxu0 %vm51_vm0, %v4370_v13  ;;  %v7415_v13 = vsel %vm5742_vm6, 1.0, %v8671_v0 }
 0xe3d   :  { %8249 = vmatmul.mubr.msk.f32.vlgmr.msra.gmra.mxu0 %vm4371_vm13, %v7336_v20  ;;  %8262 = vmatprep.subr.msk.mxu0 %vm51_vm0, %v4583_v10  ;;  %v7424_v20 = vsel %vm6093_vm11, 1.0, %v8671_v0 }
 0xe3e   :  { %v4817_v27 = vpop.permute.xlu0 %4816  ;;  %8263 = vmatpush3.msk.msra.mxu0 %vm51_vm0, %v4583_v10  ;;  %v4700_v60 = vpop.permute.xlu1 %4699  ;;  %8251 = vmatprep.mubr.msk.f32.mxu0 %vm4371_vm13, %v7337_v21  ;;  %v7418_v10 = vsel %vm5859_vm2, 1.0, %v8671_v0  ;;  %v7421_v21 = vsel %vm5976_vm5, 1.0, %v8671_v0 }
 0xe3f   :  { %8270 = vmatprep.subr.msk.mxu1 %vm51_vm0, %v4700_v60  ;;  %8278 = vmatprep.subr.msk.mxu0 %vm51_vm0, %v4817_v27 }
 0xe40   :  { %8271 = vmatpush3.msk.msra.mxu1 %vm51_vm0, %v4700_v60 }
 0xe41   :  { %8252 = vmatmul.mubr.msk.f32.gmra.mxu0 %vm4371_vm13, %v7338_v2  ;;  %8273 = vmatmul.mubr.msk.f32.vlgmr.msra.gmra.mxu1 %vm4371_vm13, %v7359_v28 }
 0xe42   :  { %v4934_v30 = vpop.permute.xlu1 %4933  ;;  %8264 = vmatprep.mubr.msk.f32.mxu0 %vm4371_vm13, %v7349_v48  ;;  %8275 = vmatprep.mubr.msk.f32.mxu1 %vm4371_vm13, %v7360_v29  ;;  %v5051_v34 = vpop.permute.xlu0 %5050  ;;  %v8601_v48 = vld [vmem:[%s10206_s5 + $0x10] ss:$20 sps:$4 sm:$0xff]  }
 0xe43   :  { %8286 = vmatprep.subr.msk.mxu1 %vm51_vm0, %v4934_v30 }
 0xe44   :  { %8287 = vmatpush3.msk.msra.mxu1 %vm51_vm0, %v4934_v30 }
 0xe45   :  { %8265 = vmatmul.mubr.msk.f32.vlgmr.msra.gmra.mxu0 %vm4371_vm13, %v7350_v32  ;;  %8276 = vmatmul.mubr.msk.f32.gmra.mxu1 %vm4371_vm13, %v7361_v23 }
 0xe46   :  { %8279 = vmatpush3.msk.msra.mxu0 %vm51_vm0, %v4817_v27  ;;  %v5168_v35 = vpop.permute.xlu1 %5167  ;;  %8267 = vmatprep.mubr.msk.f32.mxu0 %vm4371_vm13, %v7351_v33  ;;  %v5401_v38 = vpop.permute.xlu0 %5400  ;;  %v757_v27 = vadd.f32 %v9694_v6, %v750_v4 }
 0xe47   :  { %8294 = vmatprep.subr.msk.mxu0 %vm51_vm0, %v5051_v34  ;;  %8302 = vmatprep.subr.msk.mxu1 %vm51_vm0, %v5168_v35 }
 0xe48   :  { %8288 = vmatprep.mubr.f32.mxu1 %v8671_v0  ;;  %v7192_v60 = vmul.f32 -1.442695, %v757_v27 }
 0xe49   :  { %8268 = vmatmul.mubr.msk.f32.gmra.mxu0 %vm4371_vm13, %v7352_v36  ;;  %8289 = vmatmul.mubr.msk.f32.vlgmr.msra.gmra.mxu1 %vm4371_vm13, %v7374_v37 }
 0xe4a   :  { %8303 = vmatpush3.msk.msra.mxu1 %vm51_vm0, %v5168_v35  ;;  %v5518_v41 = vpop.permute.xlu1 %5517  ;;  %8280 = vmatprep.mubr.f32.mxu0 %v8671_v0  ;;  %v5635_v9 = vpop.permute.xlu0 %5634  ;;  %8644 = vpow2.f32 %v7192_v60 }
 0xe4b   :  { %8318 = vmatprep.subr.msk.mxu1 %vm51_vm0, %v5401_v38  ;;  %8291 = vmatprep.mubr.msk.f32.mxu1 %vm4371_vm13, %v7375_v52 }
 0xe4d   :  { %8281 = vmatmul.mubr.msk.f32.vlgmr.msra.gmra.mxu0 %vm4371_vm13, %v7367_v43  ;;  %8292 = vmatmul.mubr.msk.f32.gmra.mxu1 %vm4371_vm13, %v7376_v44 }
 0xe4e   :  { %8295 = vmatpush3.msk.msra.mxu0 %vm51_vm0, %v5051_v34  ;;  %v9762_v51 = vpop.permute.xlu1 %5751  ;;  %8283 = vmatprep.mubr.msk.f32.mxu0 %vm4371_vm13, %v7368_v50  ;;  %v5869_v15 = vpop.permute.xlu0 %5868 }
 0xe4f   :  { %8310 = vmatprep.subr.msk.mxu0 %vm51_vm0, %v9677_v42  ;;  %8304 = vmatprep.mubr.f32.mxu1 %v8671_v0 }
 0xe51   :  { %8284 = vmatmul.mubr.msk.f32.gmra.mxu0 %vm4371_vm13, %v7369_v55  ;;  %8305 = vmatmul.mubr.msk.f32.vlgmr.msra.gmra.mxu1 %vm4371_vm13, %v7388_v56 }
 0xe52   :  { %8319 = vmatpush3.msk.msra.mxu1 %vm51_vm0, %v5401_v38  ;;  %v9777_v59 = vpop.permute.xlu1 %5985  ;;  %8296 = vmatprep.mubr.f32.mxu0 %v8671_v0  ;;  %v6103_v61 = vpop.permute.xlu0 %6102 }
 0xe53   :  { %8334 = vmatprep.subr.msk.mxu1 %vm51_vm0, %v5635_v9  ;;  %8307 = vmatprep.mubr.msk.f32.mxu1 %vm4371_vm13, %v7389_v57 }
 0xe55   :  { %8297 = vmatmul.mubr.msk.f32.vlgmr.msra.gmra.mxu0 %vm4371_vm13, %v7381_v63  ;;  %8308 = vmatmul.mubr.msk.f32.gmra.mxu1 %vm4371_vm13, %v7390_v62 }
 0xe56   :  { %8311 = vmatpush3.msk.msra.mxu0 %vm51_vm0, %v9677_v42  ;;  %v766_v11 = vpop.permute.xlu1 %765  ;;  %8299 = vmatprep.mubr.msk.f32.mxu0 %vm4371_vm13, %v7382_v1  ;;  %v7405_v42 = vsel %vm5507_vm14, 1.0, %v8671_v0 }
 0xe57   :  { %v768_v46 = vadd.f32 %v766_v11, %v8996_v5  ;;  %8326 = vmatprep.subr.msk.mxu0 %vm51_vm0, %v5518_v41  ;;  %8320 = vmatprep.mubr.f32.mxu1 %v8671_v0  ;;  %v8645_v2 = vpop.eup %8644 }
 0xe58   :  { %v761_v28 = vadd.f32 1.0, %v8645_v2 }
 0xe59   :  { %8300 = vmatmul.mubr.msk.f32.gmra.mxu0 %vm4371_vm13, %v7383_v54  ;;  %770 = vrot.lane.b32.xlu0 %v768_v46, %s8678_s28 }
 0xe5a   :  { %8321 = vmatmul.mubr.f32.vlgmr.msra.gmra.mxu1 %v8671_v0  ;;  %8312 = vmatprep.mubr.f32.mxu0 %v8671_v0  ;;  %8646 = vrcp.f32 %v761_v28 }
 0xe5b   :  { %8335 = vmatpush3.msk.msra.mxu1 %vm51_vm0, %v5635_v9  ;;  %8323 = vmatprep.mubr.msk.f32.mxu1 %vm4371_vm13, %v7400_v8 }
 0xe5c   :  { %8350 = vmatprep.subr.msk.mxu1 %vm51_vm0, %v5869_v15 }
 0xe5d   :  { %8313 = vmatmul.mubr.f32.vlgmr.msra.gmra.mxu0 %v8671_v0 }
 0xe5e   :  { %8324 = vmatmul.mubr.msk.f32.gmra.mxu1 %vm4371_vm13, %v7401_v12  ;;  %8327 = vmatpush3.msk.msra.mxu0 %vm51_vm0, %v5518_v41 }
 0xe5f   :  { %8342 = vmatprep.subr.msk.mxu0 %vm51_vm0, %v9762_v51  ;;  %8315 = vmatprep.mubr.msk.f32.mxu0 %vm4371_vm13, %v7395_v25 }
 0xe60   :  { %8336 = vmatprep.mubr.f32.mxu1 %v8671_v0 }
 0xe61   :  { %8316 = vmatmul.mubr.msk.f32.gmra.mxu0 %vm4371_vm13, %v7396_v17 }
 0xe62   :  { %8337 = vmatmul.mubr.f32.vlgmr.msra.gmra.mxu1 %v8671_v0  ;;  %8328 = vmatprep.mubr.f32.mxu0 %v8671_v0 }
 0xe63   :  { %8351 = vmatpush3.msk.msra.mxu1 %vm51_vm0, %v5869_v15  ;;  %8339 = vmatprep.mubr.msk.f32.mxu1 %vm4371_vm13, %v7410_v53 }
 0xe64   :  { %8366 = vmatprep.subr.msk.mxu1 %vm51_vm0, %v6103_v61 }
 0xe65   :  { %8329 = vmatmul.mubr.f32.vlgmr.msra.gmra.mxu0 %v8671_v0 }
 0xe66   :  { %8340 = vmatmul.mubr.msk.f32.gmra.mxu1 %vm4371_vm13, %v7411_v3  ;;  %8343 = vmatpush3.msk.msra.mxu0 %vm51_vm0, %v9762_v51 }
 0xe67   :  { %8358 = vmatprep.subr.msk.mxu0 %vm51_vm0, %v9777_v59  ;;  %8331 = vmatprep.mubr.msk.f32.mxu0 %vm4371_vm13, %v7405_v42  ;;  %v9891_v29 = vpop.eup %8646 }
 0xe68   :  { %8352 = vmatprep.mubr.f32.mxu1 %v8671_v0 }
 0xe69   :  { %8332 = vmatmul.mubr.msk.f32.gmra.mxu0 %vm4371_vm13, %v7406_v58 }
 0xe6a   :  { %8353 = vmatmul.mubr.f32.vlgmr.msra.gmra.mxu1 %v8671_v0  ;;  %8344 = vmatprep.mubr.f32.mxu0 %v8671_v0 }
 0xe6b   :  { %8367 = vmatpush3.msk.msra.mxu1 %vm51_vm0, %v6103_v61  ;;  %8355 = vmatprep.mubr.f32.mxu1 %v8671_v0 }
 0xe6c   :  { %8380 = vmatprep.subr.mxu1 %v8671_v0 }
 0xe6d   :  { %8345 = vmatmul.mubr.f32.vlgmr.msra.gmra.mxu0 %v8671_v0 }
 0xe6e   :  { %8359 = vmatpush3.msk.msra.mxu0 %vm51_vm0, %v9777_v59  ;;  %8347 = vmatprep.mubr.f32.mxu0 %v8671_v0  ;;  %vm4156_vm0 = vcmask 517376  }
 0xe6f   :  { %8356 = vmatmul.mubr.msk.f32.gmra.mxu1 %vm4371_vm13, %v7418_v10  ;;  %8374 = vmatprep.subr.bf16.mxu0 %v8601_v48 }
 0xe70   :  { %8368 = vmatprep.mubr.f32.mxu1 %v8671_v0 }
 0xe71   :  { %8348 = vmatmul.mubr.msk.f32.gmra.mxu0 %vm4371_vm13, %v7415_v13 }
 0xe72   :  { %8360 = vmatprep.mubr.f32.mxu0 %v8671_v0 }
 0xe73   :  { %8369 = vmatmul.mubr.f32.vlgmr.msra.gmra.mxu1 %v8671_v0 }
 0xe74   :  { %8371 = vmatprep.mubr.f32.mxu1 %v8671_v0  ;;  %8381 = vmatpush3.msk.msra.mxu1 %vm9011_vm7, %v8676_v18 }
 0xe75   :  { %8361 = vmatmul.mubr.f32.vlgmr.msra.gmra.mxu0 %v8671_v0  ;;  %8382 = vmatprep.subr.mxu1 %v8671_v0 }
 0xe76   :  { %8363 = vmatprep.mubr.f32.mxu0 %v8671_v0  ;;  %8383 = vmatpush3.msk.msra.mxu1 %vm9024_vm8, %v8676_v18 }
 0xe77   :  { %8372 = vmatmul.mubr.msk.f32.gmra.mxu1 %vm4371_vm13, %v7424_v20  ;;  %8384 = vmatprep.subr.mxu1 %v8671_v0 }
 0xe78   :  { %8385 = vmatpush3.msk.msra.mxu1 %vm9034_vm9, %v8676_v18  ;;  %8388 = vmatprep.mubr.msk.f32.mxu1 %vm8672_vm1, %v8671_v0 }
 0xe79   :  { %8364 = vmatmul.mubr.msk.f32.gmra.mxu0 %vm4371_vm13, %v7421_v21  ;;  %8386 = vmatprep.subr.mxu1 %v8671_v0  ;;  %vm4169_vm13 = vcmask 779776  }
 0xe7a   :  { %8387 = vmatpush3.msk.msra.mxu1 %vm9044_vm10, %v8676_v18  ;;  %8375 = vmatpush3.bf16.msra.mxu0 %v8601_v48 }
 0xe7b   :  { %8391 = vmatprep.subr.mxu0 %v8671_v0 }
 0xe8b   :  { %v8258_v32 = vpop.f32.mrf.mxu1 }
 0xe8d   :  { %v4551_v23 = vpop.f32.mrf.mxu1 }
 0xe8f   :  { %v8261_v33 = vpop.f32.mrf.mxu1 }
 0xe91   :  { %v4561_v35 = vpop.f32.mrf.mxu1 }
 0xecb   :  { %v771_v30 = vpop.permute.xlu0 %770 }
 0xecc   :  { %v773_v5 = vmul.f32 %v9891_v29, %v771_v30 }
 0xece   :  { %775 = vrot.lane.b32.xlu1 %v773_v5, %s8678_s28 }
 0xefd   :  { %v8250_v34 = vpop.f32.mrf.mxu0 }
 0xefe   :  { %v4557_v11 = vadd.f32 %v8258_v32, %v8250_v34 }
 0xeff   :  { %v4452_v36 = vpop.f32.mrf.mxu0 }
 0xf00   :  { %v4552_v8 = vadd.f32 %v4551_v23, %v4452_v36 }
 0xf01   :  { %v8253_v37 = vpop.f32.mrf.mxu0  ;;  %v8274_v52 = vpop.f32.mrf.mxu1 }
 0xf02   :  { %v4567_v17 = vadd.f32 %v8261_v33, %v8253_v37 }
 0xf03   :  { %v4462_v38 = vpop.f32.mrf.mxu0  ;;  %v4781_v41 = vpop.f32.mrf.mxu1 }
 0xf04   :  { %v4562_v42 = vadd.f32 %v4561_v35, %v4462_v38 }
 0xf05   :  { %v8266_v43 = vpop.f32.mrf.mxu0  ;;  %v8277_v44 = vpop.f32.mrf.mxu1 }
 0xf06   :  { %v4684_v15 = vadd.f32 %v8266_v43, %v4557_v11 }
 0xf07   :  { %v4664_v50 = vpop.f32.mrf.mxu0  ;;  %v4791_v51 = vpop.f32.mrf.mxu1 }
 0xf08   :  { %v4683_v53 = vadd.f32 %v4664_v50, %v4552_v8  ;;  %v4801_v58 = vadd.f32 %v8274_v52, %v4684_v15 }
 0xf09   :  { %v8269_v55 = vpop.f32.mrf.mxu0  ;;  %v8290_v56 = vpop.f32.mrf.mxu1 }
 0xf0a   :  { %v4686_v10 = vadd.f32 %v8269_v55, %v4567_v17  ;;  %v4800_v21 = vadd.f32 %v4781_v41, %v4683_v53 }
 0xf0b   :  { %v4674_v57 = vpop.f32.mrf.mxu0  ;;  %v5015_v9 = vpop.f32.mrf.mxu1 }
 0xf0c   :  { %v4685_v4 = vadd.f32 %v4674_v57, %v4562_v42  ;;  %v4803_v2 = vadd.f32 %v8277_v44, %v4686_v10 }
 0xf0d   :  { %v8282_v59 = vpop.f32.mrf.mxu0  ;;  %v8293_v63 = vpop.f32.mrf.mxu1 }
 0xf0e   :  { %v4918_v27 = vadd.f32 %v8282_v59, %v4801_v58  ;;  %v4802_v5 = vadd.f32 %v4791_v51, %v4685_v4 }
 0xf0f   :  { %v4898_v62 = vpop.f32.mrf.mxu0  ;;  %v5025_v1 = vpop.f32.mrf.mxu1 }
 0xf10   :  { %v4917_v28 = vadd.f32 %v4898_v62, %v4800_v21  ;;  %v5035_v32 = vadd.f32 %v8290_v56, %v4918_v27 }
 0xf11   :  { %v8285_v54 = vpop.f32.mrf.mxu0  ;;  %v8306_v46 = vpop.f32.mrf.mxu1 }
 0xf12   :  { %v4920_v23 = vadd.f32 %v8285_v54, %v4803_v2  ;;  %v5034_v36 = vadd.f32 %v5015_v9, %v4917_v28 }
 0xf13   :  { %v4908_v12 = vpop.f32.mrf.mxu0  ;;  %v5249_v25 = vpop.f32.mrf.mxu1 }
 0xf14   :  { %v4919_v37 = vadd.f32 %v4908_v12, %v4802_v5  ;;  %v5037_v43 = vadd.f32 %v8293_v63, %v4920_v23 }
 0xf15   :  { %v8298_v61 = vpop.f32.mrf.mxu0  ;;  %v8309_v3 = vpop.f32.mrf.mxu1 }
 0xf16   :  { %v5152_v35 = vadd.f32 %v8298_v61, %v5035_v32  ;;  %v5036_v57 = vadd.f32 %v5025_v1, %v4919_v37 }
 0xf17   :  { %v5132_v13 = vpop.f32.mrf.mxu0  ;;  %v5259_v20 = vpop.f32.mrf.mxu1 }
 0xf18   :  { %v5151_v50 = vadd.f32 %v5132_v13, %v5034_v36  ;;  %v5269_v59 = vadd.f32 %v8306_v46, %v5152_v35 }
 0xf19   :  { %v8301_v60 = vpop.f32.mrf.mxu0 }
 0xf1a   :  { %v8322_v48 = vpop.f32.mrf.mxu1  ;;  %v5154_v44 = vadd.f32 %v8301_v60, %v5037_v43  ;;  %v5268_v8 = vadd.f32 %v5249_v25, %v5151_v50 }
 0xf1b   :  { %v5142_v30 = vpop.f32.mrf.mxu0 }
 0xf1c   :  { %v5482_v33 = vpop.f32.mrf.mxu1  ;;  %v5153_v51 = vadd.f32 %v5142_v30, %v5036_v57  ;;  %v5271_v17 = vadd.f32 %v8309_v3, %v5154_v44 }
 0xf1d   :  { %v8314_v34 = vpop.f32.mrf.mxu0 }
 0xf1e   :  { %v8325_v52 = vpop.f32.mrf.mxu1  ;;  %v5385_v56 = vadd.f32 %v8314_v34, %v5269_v59  ;;  %v5270_v61 = vadd.f32 %v5259_v20, %v5153_v51 }
 0xf1f   :  { %v5365_v38 = vpop.f32.mrf.mxu0 }
 0xf20   :  { %v5492_v41 = vpop.f32.mrf.mxu1  ;;  %v5384_v9 = vadd.f32 %v5365_v38, %v5268_v8  ;;  %v5502_v42 = vadd.f32 %v8322_v48, %v5385_v56 }
 0xf21   :  { %v8317_v55 = vpop.f32.mrf.mxu0 }
 0xf22   :  { %v8338_v62 = vpop.f32.mrf.mxu1  ;;  %v5387_v63 = vadd.f32 %v8317_v55, %v5271_v17  ;;  %v5501_v13 = vadd.f32 %v5482_v33, %v5384_v9 }
 0xf23   :  { %v5375_v11 = vpop.f32.mrf.mxu0 }
 0xf24   :  { %v5716_v54 = vpop.f32.mrf.mxu1  ;;  %v5386_v1 = vadd.f32 %v5375_v11, %v5270_v61  ;;  %v5504_v27 = vadd.f32 %v8325_v52, %v5387_v63 }
 0xf25   :  { %v8330_v15 = vpop.f32.mrf.mxu0 }
 0xf26   :  { %v8341_v12 = vpop.f32.mrf.mxu1  ;;  %v5619_v46 = vadd.f32 %v8330_v15, %v5502_v42  ;;  %v5503_v28 = vadd.f32 %v5492_v41, %v5386_v1 }
 0xf27   :  { %v5599_v53 = vpop.f32.mrf.mxu0 }
 0xf28   :  { %v5726_v58 = vpop.f32.mrf.mxu1  ;;  %v5618_v25 = vadd.f32 %v5599_v53, %v5501_v13  ;;  %v5736_v30 = vadd.f32 %v8338_v62, %v5619_v46 }
 0xf29   :  { %v8333_v10 = vpop.f32.mrf.mxu0 }
 0xf2a   :  { %v8354_v21 = vpop.f32.mrf.mxu1  ;;  %v5621_v3 = vadd.f32 %v8333_v10, %v5504_v27  ;;  %v5735_v23 = vadd.f32 %v5716_v54, %v5618_v25  ;;  %v764_v10 = vadd.f32 %v9059_v31, %v9694_v6  ;;  %v8682_v6 = vmov 1983009808  }
 0xf2b   :  { %v5609_v4 = vpop.f32.mrf.mxu0 }
 0xf2c   :  { %v5950_v60 = vpop.f32.mrf.mxu1  ;;  %v5620_v20 = vadd.f32 %v5609_v4, %v5503_v28  ;;  %v5738_v37 = vadd.f32 %v8341_v12, %v5621_v3  ;;  %v4135_v4 = vunpack.c.l.s4 %v8682_v6  ;;  %v780_v3 = vsub.f32 1.0, %v9891_v29 }
 0xf2d   :  { %v8346_v2 = vpop.f32.mrf.mxu0 }
 0xf2e   :  { %v5853_v48 = vadd.f32 %v8346_v2, %v5736_v30  ;;  %v5737_v43 = vadd.f32 %v5726_v58, %v5620_v20  ;;  %v4136_v25 = vunpack.c.0.s8 %v4135_v4 }
 0xf2f   :  { %v5833_v5 = vpop.f32.mrf.mxu0  ;;  %v8357_v32 = vpop.f32.mrf.mxu1 }
 0xf30   :  { %v5852_v33 = vadd.f32 %v5833_v5, %v5735_v23  ;;  %v5970_v50 = vadd.f32 %v8354_v21, %v5853_v48  ;;  %v7211_v21 = vld [vmem:[%s10207_s4 + $0xb] ss:$0 sm:$0xff]  ;;  %v4139_v2 = vsub.s32 %v4136_v25, %v8952_v39  ;;  %v790_v5 = vmul.f32 %v9891_v29, %v9610_v47 }
 0xf31   :  { %v8349_v34 = vpop.f32.mrf.mxu0  ;;  %v5960_v36 = vpop.f32.mrf.mxu1  ;;  %v1060_v31 = vadd.f32 %v7211_v21, %v9128_v26 }
 0xf32   :  { %v5855_v52 = vadd.f32 %v8349_v34, %v5738_v37  ;;  %v5969_v59 = vadd.f32 %v5950_v60, %v5852_v33  ;;  %v4178_v30 = vrot.slane %v9591_v24, %v4139_v2  ;;  %v4165_v48 = vrot.slane %v9613_v45, %v4139_v2 }
 0xf33   :  { %v5843_v35 = vpop.f32.mrf.mxu0  ;;  %v8370_v38 = vpop.f32.mrf.mxu1  ;;  %v1065_v27 = vmax.f32 %v1060_v31, -5.0  ;;  %v4191_v34 = vrot.slane %v9616_v49, %v4139_v2 }
 0xf34   :  { %v5854_v41 = vadd.f32 %v5843_v35, %v5737_v43  ;;  %v5972_v11 = vadd.f32 %v8357_v32, %v5855_v52 }
 0xf35   :  { %v8362_v55 = vpop.f32.mrf.mxu0  ;;  %v6184_v57 = vpop.f32.mrf.mxu1  ;;  %v1066_v60 = vmin.f32 %v1065_v27, 2.0 }
 0xf36   :  { %v6087_v44 = vadd.f32 %v8362_v55, %v5970_v50  ;;  %v5971_v54 = vadd.f32 %v5960_v36, %v5854_v41  ;;  %v7427_v36 = vld [vmem:[%s10207_s4 + $0x1a] ss:$0 sm:$0xff] }
 0xf37   :  { %v6067_v62 = vpop.f32.mrf.mxu0  ;;  %v8373_v56 = vpop.f32.mrf.mxu1  ;;  %v4152_v28 = vrot.slane %v1066_v60, %v4139_v2 }
 0xf38   :  { %v6086_v8 = vadd.f32 %v6067_v62, %v5969_v59  ;;  %v6204_v15 = vadd.f32 %v8370_v38, %v6087_v44 }
 0xf39   :  { %v8365_v51 = vpop.f32.mrf.mxu0  ;;  %v6194_v42 = vpop.f32.mrf.mxu1 }
 0xf3a   :  { %v6089_v17 = vadd.f32 %v8365_v51, %v5972_v11  ;;  %v6203_v9 = vadd.f32 %v6184_v57, %v6086_v8 }
 0xf3b   :  { %v6077_v12 = vpop.f32.mrf.mxu0 }
 0xf3c   :  { %v6209_v53 = vpack.c.bf16 %v6204_v15, %v6203_v9  ;;  %v6088_v61 = vadd.f32 %v6077_v12, %v5971_v54  ;;  %v6206_v63 = vadd.f32 %v8373_v56, %v6089_v17 }
 0xf3e   :  { %v6205_v58 = vadd.f32 %v6194_v42, %v6088_v61  ;;  %8376 = vmatprep.mubr.msk.bf16.mxu0 %vm112_vm4, %v6209_v53 }
 0xf40   :  { %v6210_v13 = vpack.c.bf16 %v6206_v63, %v6205_v58  ;;  %v776_v1 = vpop.permute.xlu1 %775 }
 0xf41   :  { %v778_v46 = vadd.f32 %v776_v1, %v764_v10 }
 0xf42   :  { %8377 = vmatmul.mubr.msk.bf16.vlgmr.msra.gmra.mxu0 %vm112_vm4, %v6210_v13  ;;  %vm10222_vm4 = vcmask 254976  }
 0xf43   :  { %8648 = vtanh.f32 %v778_v46  ;;  %8392 = vmatpush3.msk.msra.mxu0 %vm9011_vm7, %v8676_v18  ;;  %8399 = vmatprep.mubr.msk.f32.mxu0 %vm8672_vm1, %v8671_v0  ;;  %vm10223_vm14 = vmmov %vm10222_vm4 }
 0xf44   :  { %8393 = vmatprep.subr.mxu0 %v8671_v0 }
 0xf45   :  { %8394 = vmatpush3.msk.msra.mxu0 %vm9024_vm8, %v8676_v18 }
 0xf46   :  { %8395 = vmatprep.subr.mxu0 %v8671_v0 }
 0xf47   :  { %8396 = vmatpush3.msk.msra.mxu0 %vm9034_vm9, %v8676_v18 }
 0xf48   :  { %8397 = vmatprep.subr.mxu0 %v8671_v0 }
 0xf49   :  { %8398 = vmatpush3.msk.msra.mxu0 %vm9044_vm10, %v8676_v18 }
 0xf4a   :  { %8410 = vmatprep.subr.mxu0 %v8671_v0 }
 0xf50   :  { %v8649_v26 = vpop.eup %8648 }
 0xf51   :  { %782 = vrot.lane.b32.xlu0 %v8649_v26, %s8677_s29 }
 0xf55   :  { %4153 = vrot.lane.b32.xlu0 %v4152_v28, %s8679_s14  ;;  %v8602_v28 = vld [vmem:[%s10204_s6 + $0xb0] ss:$60 sps:$4 sm:$0xff]  }
 0xf56   :  { %8402 = vmatprep.subr.bf16.mxu1 %v8602_v28 }
 0xf59   :  { %4179 = vrot.lane.b32.xlu0 %v4178_v30, %s8677_s29  ;;  %v8603_v30 = vld [vmem:[%s10204_s6 + $0x38] ss:$60 sps:$4 sm:$0xff]  }
 0xfc3   :  { %v783_v18 = vpop.permute.xlu0 %782 }
 0xfc4   :  { %v785_v32 = vmul.f32 %v783_v18, %v780_v3  ;;  %v6597_v3 = vadd.s32 120, %v8952_v39 }
 0xfc6   :  { %v791_v23 = vadd.f32 %v790_v5, %v785_v32  ;;  %v6679_v18 = vand.u32 7, %v6597_v3  ;;  %v8683_v32 = vmov 0.0625  }
 0xfc7   :  { %v4154_v27 = vpop.permute.xlu0 %4153 }
 0xfc8   :  { %v4140_v20 = vrot.slane %v791_v23, %v4139_v2  ;;  %vm9995_vm15 = vcmp.eq.s32.totalorder %v6679_v18, %v9005_v14  ;;  %v6587_v18 = vadd.s32 40, %v8952_v39 }
 0xfca   :  { %4141 = vrot.lane.b32.xlu1 %v4140_v20, %s8677_s29  ;;  %v6609_v5 = vand.u32 7, %v6587_v18 }
 0xfcb   :  { %v4180_v2 = vpop.permute.xlu0 %4179 }
 0xfce   :  { %4166 = vrot.lane.b32.xlu1 %v4165_v48, %s8679_s14 }
 0xfd2   :  { %4192 = vrot.lane.b32.xlu1 %v4191_v34, %s8677_s29 }
0x1002   :  { %v8378_v24 = vpop.f32.mrf.mxu0 }
0x1003   :  { %v9939_v33 = vadd.f32 %v8378_v24, %v7427_v36 }
0x1004   :  { %v6264_v37 = vpop.f32.mrf.mxu0 }
0x1005   :  { %v9937_v47 = vadd.f32 %v7427_v36, %v6264_v37  ;;  %v6297_v43 = vmul.f32 %v9939_v33, %v9939_v33  ;;  %v6284_v59 = vsel %vm168_vm3, %v9939_v33, 0.0 }
0x1006   :  { %v8379_v29 = vpop.f32.mrf.mxu0 }
0x1007   :  { %v6295_v45 = vmul.f32 %v9937_v47, %v9937_v47  ;;  %v9943_v38 = vadd.f32 %v8379_v29, %v7427_v36  ;;  %v6281_v50 = vsel %vm168_vm3, %v9937_v47, 0.0  ;;  %v6302_v51 = vsel %vm168_vm3, %v6297_v43, 0.0 }
0x1008   :  { %v6267_v35 = vpop.f32.mrf.mxu0 }
0x1009   :  { %v9945_v49 = vadd.f32 %v7427_v36, %v6267_v35  ;;  %v6299_v41 = vsel %vm168_vm3, %v6295_v45, 0.0  ;;  %v6298_v44 = vmul.f32 %v9943_v38, %v9943_v38  ;;  %v6286_v56 = vsel %vm168_vm3, %v9943_v38, 0.0 }
0x100b   :  { %v6282_v52 = vsel %vm168_vm3, %v9945_v49, 0.0  ;;  %v6296_v55 = vmul.f32 %v9945_v49, %v9945_v49  ;;  %v6304_v17 = vsel %vm168_vm3, %v6298_v44, 0.0 }
0x100c   :  { %v6283_v57 = vadd.f32 %v6282_v52, %v6281_v50 }
0x100d   :  { %v6300_v62 = vsel %vm168_vm3, %v6296_v55, 0.0 }
0x100e   :  { %v6285_v11 = vadd.f32 %v6284_v59, %v6283_v57  ;;  %v6301_v8 = vadd.f32 %v6300_v62, %v6299_v41  ;;  %v7441_v59 = vld [vmem:[%s10207_s4 + $0x1b] ss:$0 sm:$0xff] }
0x1010   :  { %v6287_v54 = vadd.f32 %v6286_v56, %v6285_v11  ;;  %v6303_v15 = vadd.f32 %v6302_v51, %v6301_v8 }
0x1012   :  { %v6288_v9 = vrot.slane %v6287_v54, 4  ;;  %v6305_v12 = vadd.f32 %v6304_v17, %v6303_v15 }
0x1014   :  { %v6289_v53 = vadd.f32 %v6288_v9, %v6287_v54  ;;  %v6306_v61 = vrot.slane %v6305_v12, 4 }
0x1016   :  { %v6290_v42 = vrot.slane %v6289_v53, 2  ;;  %v6307_v63 = vadd.f32 %v6306_v61, %v6305_v12 }
0x1018   :  { %v6291_v58 = vadd.f32 %v6290_v42, %v6289_v53  ;;  %v6308_v10 = vrot.slane %v6307_v63, 2 }
0x101a   :  { %v6292_v13 = vrot.slane %v6291_v58, 1  ;;  %v6309_v1 = vadd.f32 %v6308_v10, %v6307_v63  ;;  %v6596_v63 = vadd.s32 112, %v8952_v39  ;;  %v6595_v10 = vadd.s32 104, %v8952_v39 }
0x101c   :  { %v6293_v46 = vadd.f32 %v6292_v13, %v6291_v58  ;;  %v6310_v21 = vrot.slane %v6309_v1, 1  ;;  %v6672_v58 = vand.u32 7, %v6596_v63  ;;  %v6665_v13 = vand.u32 7, %v6595_v10  ;;  %v8611_v63 = vld [vmem:[%s10202_s8 + $0x20] sm:$0xff]  }
0x101e   :  { %v6294_v31 = vmul.f32 0.03125, %v6293_v46  ;;  %v6311_v6 = vadd.f32 %v6310_v21, %v6309_v1  ;;  %vm6752_vm2 = vcmp.eq.s32.totalorder %v6672_v58, %v9005_v14  ;;  %v6594_v1 = vadd.s32 96, %v8952_v39 }
0x101f   :  { %v6593_v21 = vadd.s32 88, %v8952_v39 }
0x1020   :  { %8389 = vmatmul.mubr.msk.f32.vlgmr.msra.gmra.mxu1 %vm168_vm3, %v6294_v31  ;;  %v6312_v4 = vmul.f32 0.03125, %v6311_v6  ;;  %v6658_v46 = vand.u32 7, %v6594_v1  ;;  %v6592_v6 = vadd.s32 80, %v8952_v39 }
0x1021   :  { %8403 = vmatpush3.bf16.msra.mxu1 %v8602_v28  ;;  %v6651_v31 = vand.u32 7, %v6593_v21 }
0x1022   :  { %8400 = vmatmul.mubr.msk.f32.vlgmr.msra.gmra.mxu0 %vm168_vm3, %v6312_v4  ;;  %8404 = vmatprep.subr.bf16.mxu1 %v8603_v30  ;;  %v6644_v4 = vand.u32 7, %v6592_v6 }
0x1023   :  { %8442 = vmatprep.mubr.msk.f32.mxu0 %vm8672_vm1, %v8671_v0  ;;  %8411 = vmatpush3.msk.msra.mxu0 %vm9995_vm15, %v8683_v32  ;;  %vm6749_vm6 = vcmp.eq.s32.totalorder %v6651_v31, %v9005_v14 }
0x1024   :  { %8412 = vmatprep.subr.mxu0 %v8671_v0  ;;  %vm6748_vm11 = vcmp.eq.s32.totalorder %v6644_v4, %v9005_v14 }
0x1025   :  { %8405 = vmatpush3.bf16.msra.mxu1 %v8603_v30  ;;  %8413 = vmatpush3.msk.msra.mxu0 %vm6752_vm2, %v8683_v32  ;;  %v6588_v30 = vadd.s32 48, %v8952_v39 }
0x1026   :  { %8445 = vmatprep.subr.mxu1 %v8671_v0  ;;  %8414 = vmatprep.subr.mxu0 %v8671_v0 }
0x1027   :  { %v6616_v3 = vand.u32 7, %v6588_v30  ;;  %v7480_v30 = vld [vmem:[%s10207_s4 + $0x1e] ss:$0 sm:$0xff] }
0x103c   :  { %v4142_v25 = vpop.permute.xlu1 %4141 }
0x103d   :  { %4144 = vst.msk [vmem:[%s10211_s9] sm:$0x3] %vm10222_vm4, %v4142_v25 }
0x103e   :  { %4157 = vst.msk [vmem:[%s10211_s9] sm:$0x3] %vm4156_vm0, %v4154_v27  ;;  %v6591_v27 = vadd.s32 72, %v8952_v39 }
0x1040   :  { %v4167_v60 = vpop.permute.xlu1 %4166  ;;  %v6637_v25 = vand.u32 7, %v6591_v27 }
0x1041   :  { %4170 = vst.msk [vmem:[%s10211_s9] sm:$0x3] %vm4169_vm13, %v4167_v60  ;;  %v6590_v60 = vadd.s32 64, %v8952_v39  ;;  %vm6744_vm13 = vcmp.eq.s32.totalorder %v6616_v3, %v9005_v14 }
0x1042   :  { %4183 = vst.msk [vmem:[%s10211_s9] sm:$0x3] %vm4182_vm12, %v4180_v2  ;;  %vm6747_vm5 = vcmp.eq.s32.totalorder %v6637_v25, %v9005_v14  ;;  %vm6743_vm12 = vcmp.eq.s32.totalorder %v6609_v5, %v9005_v14 }
0x1043   :  { %v6630_v2 = vand.u32 7, %v6590_v60 }
0x1044   :  { %v4193_v26 = vpop.permute.xlu1 %4192 }
0x1045   :  { %4195 = vst.msk [vmem:[%s10211_s9 + $0x2] sm:$0x3] %vm10223_vm14, %v4193_v26  ;;  %v6589_v26 = vadd.s32 56, %v8952_v39  ;;  %vm6746_vm0 = vcmp.eq.s32.totalorder %v6630_v2, %v9005_v14 }
0x1047   :  { %v6623_v28 = vand.u32 7, %v6589_v26 }
0x1049   :  { %vm6745_vm4 = vcmp.eq.s32.totalorder %v6623_v28, %v9005_v14 }
0x10e0   :  { %v6382_v23 = vpop.f32.mrf.mxu1 }
0x10e1   :  { %v6459_v20 = vmul.f32 %v6382_v23, %v6382_v23  ;;  %v6465_v35 = vrot.slane %v6382_v23, %v8955_v40  ;;  %v6586_v23 = vadd.s32 32, %v8952_v39 }
0x10e2   :  { %v8390_v48 = vpop.f32.mrf.mxu1  ;;  %v6455_v34 = vpop.f32.mrf.mxu0 }
0x10e3   :  { %v6460_v24 = vsub.f32 %v6455_v34, %v6459_v20  ;;  %v6466_v43 = vsub.f32 %v9937_v47, %v6465_v35  ;;  %v6467_v50 = vsub.f32 %v9945_v49, %v6465_v35  ;;  %v6468_v52 = vsub.f32 %v9939_v33, %v6465_v35  ;;  %v7442_v47 = vld [vmem:[%s10207_s4 + $0x1c] ss:$0 sm:$0xff] }
0x10e4   :  { %v8401_v36 = vpop.f32.mrf.mxu0  ;;  %v6469_v55 = vsub.f32 %v9943_v38, %v6465_v35  ;;  %v6602_v20 = vand.u32 7, %v6586_v23 }
0x10e5   :  { %v6461_v37 = vmax.f32 %v6460_v24, 0.0 }
0x10e6   :  { %vm6742_vm14 = vcmp.eq.s32.totalorder %v6602_v20, %v9005_v14  ;;  %v7481_v20 = vld [vmem:[%s10207_s4 + $0x1f] ss:$0 sm:$0xff] }
0x10e7   :  { %v6470_v29 = vadd.f32 1e-05, %v6461_v37 }
0x10e9   :  { %8650 = vrsqrt.f32 %v6470_v29 }
0x10f6   :  { %v8651_v45 = vpop.eup %8650 }
0x10f7   :  { %v6475_v57 = vrot.slane %v8651_v45, %v8955_v40 }
0x10f9   :  { %v6476_v41 = vmul.f32 %v6475_v57, %v6466_v43  ;;  %v6477_v44 = vmul.f32 %v6475_v57, %v6467_v50  ;;  %v6478_v62 = vmul.f32 %v6475_v57, %v6468_v52  ;;  %v6479_v11 = vmul.f32 %v6475_v57, %v6469_v55 }
0x10fb   :  { %v6486_v8 = vmul.f32 %v7441_v59, %v6476_v41  ;;  %v6487_v49 = vmul.f32 %v7441_v59, %v6477_v44  ;;  %v6488_v51 = vmul.f32 %v7441_v59, %v6478_v62  ;;  %v6489_v33 = vmul.f32 %v7441_v59, %v6479_v11 }
0x10fd   :  { %v6496_v56 = vadd.f32 %v7442_v47, %v6486_v8  ;;  %v6497_v38 = vadd.f32 %v7442_v47, %v6487_v49  ;;  %v6498_v54 = vadd.f32 %v7442_v47, %v6488_v51  ;;  %v6499_v15 = vadd.f32 %v7442_v47, %v6489_v33 }
0x10ff   :  { %v6500_v17 = vmax.f32 %v6496_v56, 0.0  ;;  %v6501_v9 = vmax.f32 %v6497_v38, 0.0  ;;  %v6502_v12 = vmax.f32 %v6498_v54, 0.0  ;;  %v6503_v53 = vmax.f32 %v6499_v15, 0.0  ;;  %v8604_v15 = vld [vmem:[%s10202_s8 + $0x58] sm:$0xff]  }
0x1101   :  { %v6508_v61 = vpack.c.bf16 %v6501_v9, %v6500_v17  ;;  %v6509_v42 = vpack.c.bf16 %v6503_v53, %v6502_v12  ;;  %v8605_v17 = vld [vmem:[%s10202_s8 + $0x50] sm:$0xff]   ;;  %v8606_v9 = vld [vmem:[%s10202_s8 + $0x48] sm:$0xff]   ;;  %v8607_v12 = vld [vmem:[%s10202_s8 + $0x40] sm:$0xff]  }
0x1102   :  { %v8608_v53 = vld [vmem:[%s10202_s8 + $0x38] sm:$0xff]  }
0x1103   :  { %8406 = vmatprep.mubr.msk.bf16.mxu1 %vm168_vm3, %v6508_v61  ;;  %v8609_v61 = vld [vmem:[%s10202_s8 + $0x30] sm:$0xff]  }
0x1104   :  { %8407 = vmatmul.mubr.msk.bf16.vlgmr.msra.gmra.mxu1 %vm168_vm3, %v6509_v42  ;;  %vm6750_vm3 = vcmp.eq.s32.totalorder %v6658_v46, %v9005_v14  ;;  %v8610_v42 = vld [vmem:[%s10202_s8 + $0x28] sm:$0xff]  }
0x1105   :  { %8446 = vmatpush3.msk.msra.mxu1 %vm9995_vm15, %v8683_v32  ;;  %8477 = vmatprep.mubr.msk.f32.mxu1 %vm8672_vm1, %v8671_v0  ;;  %vm6751_vm1 = vcmp.eq.s32.totalorder %v6665_v13, %v9005_v14 }
0x1106   :  { %8447 = vmatprep.subr.mxu1 %v8671_v0  ;;  %8415 = vmatpush3.msk.msra.mxu0 %vm6751_vm1, %v8683_v32 }
0x1107   :  { %8448 = vmatpush3.msk.msra.mxu1 %vm6752_vm2, %v8683_v32  ;;  %8416 = vmatprep.subr.mxu0 %v8671_v0 }
0x1108   :  { %8449 = vmatprep.subr.mxu1 %v8671_v0  ;;  %8417 = vmatpush3.msk.msra.mxu0 %vm6750_vm3, %v8683_v32 }
0x1109   :  { %8450 = vmatpush3.msk.msra.mxu1 %vm6751_vm1, %v8683_v32  ;;  %8418 = vmatprep.subr.mxu0 %v8671_v0 }
0x110a   :  { %8451 = vmatprep.subr.mxu1 %v8671_v0  ;;  %8419 = vmatpush3.msk.msra.mxu0 %vm6749_vm6, %v8683_v32 }
0x110b   :  { %8452 = vmatpush3.msk.msra.mxu1 %vm6750_vm3, %v8683_v32  ;;  %8420 = vmatprep.subr.mxu0 %v8671_v0 }
0x110c   :  { %8453 = vmatprep.subr.mxu1 %v8671_v0  ;;  %8421 = vmatpush3.msk.msra.mxu0 %vm6748_vm11, %v8683_v32 }
0x110d   :  { %8454 = vmatpush3.msk.msra.mxu1 %vm6749_vm6, %v8683_v32  ;;  %8422 = vmatprep.subr.mxu0 %v8671_v0 }
0x110e   :  { %8455 = vmatprep.subr.mxu1 %v8671_v0  ;;  %8423 = vmatpush3.msk.msra.mxu0 %vm6747_vm5, %v8683_v32 }
0x110f   :  { %8456 = vmatpush3.msk.msra.mxu1 %vm6748_vm11, %v8683_v32  ;;  %8424 = vmatprep.subr.mxu0 %v8671_v0 }
0x1110   :  { %8457 = vmatprep.subr.mxu1 %v8671_v0  ;;  %8425 = vmatpush3.msk.msra.mxu0 %vm6746_vm0, %v8683_v32 }
0x1111   :  { %8458 = vmatpush3.msk.msra.mxu1 %vm6747_vm5, %v8683_v32  ;;  %8426 = vmatprep.subr.mxu0 %v8671_v0 }
0x1112   :  { %8459 = vmatprep.subr.mxu1 %v8671_v0  ;;  %8427 = vmatpush3.msk.msra.mxu0 %vm6745_vm4, %v8683_v32 }
0x1113   :  { %8460 = vmatpush3.msk.msra.mxu1 %vm6746_vm0, %v8683_v32  ;;  %8428 = vmatprep.subr.mxu0 %v8671_v0 }
0x1114   :  { %8461 = vmatprep.subr.mxu1 %v8671_v0  ;;  %8429 = vmatpush3.msk.msra.mxu0 %vm6744_vm13, %v8683_v32 }
0x1115   :  { %8462 = vmatpush3.msk.msra.mxu1 %vm6745_vm4, %v8683_v32  ;;  %8430 = vmatprep.subr.mxu0 %v8671_v0 }
0x1116   :  { %8463 = vmatprep.subr.mxu1 %v8671_v0  ;;  %8431 = vmatpush3.msk.msra.mxu0 %vm6743_vm12, %v8683_v32 }
0x1117   :  { %8464 = vmatpush3.msk.msra.mxu1 %vm6744_vm13, %v8683_v32  ;;  %8432 = vmatprep.subr.mxu0 %v8671_v0 }
0x1118   :  { %8465 = vmatprep.subr.mxu1 %v8671_v0  ;;  %8433 = vmatpush3.msk.msra.mxu0 %vm6742_vm14, %v8683_v32 }
0x1119   :  { %8466 = vmatpush3.msk.msra.mxu1 %vm6743_vm12, %v8683_v32  ;;  %8434 = vmatprep.subr.mxu0 %v8671_v0 }
0x111a   :  { %8467 = vmatprep.subr.mxu1 %v8671_v0  ;;  %8435 = vmatpush3.msk.msra.mxu0 %vm9011_vm7, %v8683_v32 }
0x111b   :  { %8468 = vmatpush3.msk.msra.mxu1 %vm6742_vm14, %v8683_v32  ;;  %8436 = vmatprep.subr.mxu0 %v8671_v0 }
0x111c   :  { %8469 = vmatprep.subr.mxu1 %v8671_v0  ;;  %8437 = vmatpush3.msk.msra.mxu0 %vm9024_vm8, %v8683_v32 }
0x111d   :  { %8470 = vmatpush3.msk.msra.mxu1 %vm9011_vm7, %v8683_v32  ;;  %8438 = vmatprep.subr.mxu0 %v8671_v0  ;;  %vm7101_vm7 = vcmp.lt.s32.totalorder %v9005_v14, 3 }
0x111e   :  { %8471 = vmatprep.subr.mxu1 %v8671_v0  ;;  %8439 = vmatpush3.msk.msra.mxu0 %vm9034_vm9, %v8683_v32 }
0x111f   :  { %8472 = vmatpush3.msk.msra.mxu1 %vm9024_vm8, %v8683_v32  ;;  %8440 = vmatprep.subr.mxu0 %v8671_v0 }
0x1120   :  { %8473 = vmatprep.subr.mxu1 %v8671_v0  ;;  %8441 = vmatpush3.msk.msra.mxu0 %vm9044_vm10, %v8683_v32 }
0x1121   :  { %8474 = vmatpush3.msk.msra.mxu1 %vm9034_vm9, %v8683_v32  ;;  %8480 = vmatprep.subr.bf16.mxu0 %v8604_v15 }
0x1122   :  { %8475 = vmatprep.subr.mxu1 %v8671_v0 }
0x1123   :  { %8476 = vmatpush3.msk.msra.mxu1 %vm9044_vm10, %v8683_v32 }
0x11c4   :  { %v8408_v39 = vpop.f32.mrf.mxu1 }
0x11c5   :  { %v10124_v24 = vadd.f32 %v8408_v39, %v7443_v19 }
0x11c6   :  { %v6569_v16 = vpop.f32.mrf.mxu1 }
0x11c7   :  { %v10122_v48 = vadd.f32 %v7443_v19, %v6569_v16  ;;  %v6782_v29 = vmul.f32 %v10124_v24, %v10124_v24 }
0x11c8   :  { %v8409_v7 = vpop.f32.mrf.mxu1 }
0x11c9   :  { %v6780_v36 = vmul.f32 %v10122_v48, %v10122_v48  ;;  %v10130_v37 = vadd.f32 %v8409_v7, %v7443_v19 }
0x11ca   :  { %v6572_v34 = vpop.f32.mrf.mxu1 }
0x11cb   :  { %v10126_v0 = vadd.f32 %v7443_v19, %v6572_v34  ;;  %v6783_v43 = vmul.f32 %v10130_v37, %v10130_v37 }
0x11cd   :  { %v6770_v22 = vadd.f32 %v10126_v0, %v10122_v48  ;;  %v6781_v32 = vmul.f32 %v10126_v0, %v10126_v0 }
0x11cf   :  { %v6771_v35 = vadd.f32 %v6770_v22, %v10124_v24  ;;  %v6784_v45 = vadd.f32 %v6781_v32, %v6780_v36 }
0x11d1   :  { %v6772_v50 = vadd.f32 %v6771_v35, %v10130_v37  ;;  %v6785_v52 = vadd.f32 %v6784_v45, %v6782_v29  ;;  %v7482_v35 = vld [vmem:[%s10207_s4 + $0x20] ss:$0 sm:$0xff] }
0x11d3   :  { %v6773_v55 = vrot.slane %v6772_v50, 4  ;;  %v6786_v57 = vadd.f32 %v6785_v52, %v6783_v43 }
0x11d5   :  { %v6774_v59 = vadd.f32 %v6773_v55, %v6772_v50  ;;  %v6787_v41 = vrot.slane %v6786_v57, 4 }
0x11d7   :  { %v6788_v44 = vadd.f32 %v6787_v41, %v6786_v57  ;;  %v6775_v62 = vrot.slane %v6774_v59, 2 }
0x11d9   :  { %v6789_v11 = vrot.slane %v6788_v44, 2  ;;  %v6776_v47 = vadd.f32 %v6775_v62, %v6774_v59 }
0x11db   :  { %v6777_v8 = vrot.slane %v6776_v47, 1  ;;  %v6790_v49 = vadd.f32 %v6789_v11, %v6788_v44 }
0x11dd   :  { %v6778_v51 = vadd.f32 %v6777_v8, %v6776_v47  ;;  %v6791_v33 = vrot.slane %v6790_v49, 1 }
0x11df   :  { %v6779_v56 = vmul.f32 0.03125, %v6778_v51  ;;  %v6792_v38 = vadd.f32 %v6791_v33, %v6790_v49 }
0x11e1   :  { %8443 = vmatmul.mubr.f32.vlgmr.msra.gmra.mxu0 %v6779_v56  ;;  %v6793_v54 = vmul.f32 0.03125, %v6792_v38 }
0x11e2   :  { %8481 = vmatpush3.bf16.msra.mxu0 %v8604_v15 }
0x11e3   :  { %8478 = vmatmul.mubr.f32.vlgmr.msra.gmra.mxu1 %v6793_v54  ;;  %8482 = vmatprep.subr.bf16.mxu0 %v8605_v17 }
0x11e6   :  { %8483 = vmatpush3.bf16.msra.mxu0 %v8605_v17 }
0x11e7   :  { %8484 = vmatprep.subr.bf16.mxu0 %v8606_v9 }
0x11ea   :  { %8485 = vmatpush3.bf16.msra.mxu0 %v8606_v9 }
0x11eb   :  { %8486 = vmatprep.subr.bf16.mxu0 %v8607_v12 }
0x11ee   :  { %8487 = vmatpush3.bf16.msra.mxu0 %v8607_v12 }
0x11ef   :  { %8488 = vmatprep.subr.bf16.mxu0 %v8608_v53 }
0x11f2   :  { %8489 = vmatpush3.bf16.msra.mxu0 %v8608_v53 }
0x11f3   :  { %8490 = vmatprep.subr.bf16.mxu0 %v8609_v61 }
0x11f6   :  { %8491 = vmatpush3.bf16.msra.mxu0 %v8609_v61 }
0x11f7   :  { %8492 = vmatprep.subr.bf16.mxu0 %v8610_v42 }
0x11fa   :  { %8493 = vmatpush3.bf16.msra.mxu0 %v8610_v42 }
0x11fb   :  { %8494 = vmatprep.subr.bf16.mxu0 %v8611_v63 }
0x11fe   :  { %8495 = vmatpush3.bf16.msra.mxu0 %v8611_v63 }
0x12a1   :  { %v6860_v58 = vpop.f32.mrf.mxu0 }
0x12a2   :  { %v6934_v10 = vmul.f32 %v6860_v58, %v6860_v58  ;;  %v6940_v4 = vrot.slane %v6860_v58, %v8955_v40 }
0x12a3   :  { %v8444_v13 = vpop.f32.mrf.mxu0  ;;  %v6930_v1 = vpop.f32.mrf.mxu1 }
0x12a4   :  { %v6935_v46 = vsub.f32 %v6930_v1, %v6934_v10  ;;  %v6941_v25 = vsub.f32 %v10122_v48, %v6940_v4  ;;  %v6942_v60 = vsub.f32 %v10126_v0, %v6940_v4  ;;  %v6943_v2 = vsub.f32 %v10124_v24, %v6940_v4 }
0x12a5   :  { %v8479_v21 = vpop.f32.mrf.mxu1  ;;  %v6944_v26 = vsub.f32 %v10130_v37, %v6940_v4 }
0x12a6   :  { %v6936_v31 = vmax.f32 %v6935_v46, 0.0 }
0x12a8   :  { %v6945_v6 = vadd.f32 1e-05, %v6936_v31 }
0x12aa   :  { %8652 = vrsqrt.f32 %v6945_v6 }
0x12b7   :  { %v8653_v27 = vpop.eup %8652 }
0x12b8   :  { %v6950_v28 = vrot.slane %v8653_v27, %v8955_v40 }
0x12ba   :  { %v6951_v3 = vmul.f32 %v6950_v28, %v6941_v25  ;;  %v6952_v18 = vmul.f32 %v6950_v28, %v6942_v60  ;;  %v6953_v5 = vmul.f32 %v6950_v28, %v6943_v2  ;;  %v6954_v23 = vmul.f32 %v6950_v28, %v6944_v26 }
0x12bc   :  { %v6961_v39 = vmul.f32 %v7480_v30, %v6951_v3  ;;  %v6962_v16 = vmul.f32 %v7480_v30, %v6952_v18  ;;  %v6963_v19 = vmul.f32 %v7480_v30, %v6953_v5  ;;  %v6964_v7 = vmul.f32 %v7480_v30, %v6954_v23 }
0x12be   :  { %v6971_v48 = vadd.f32 %v7481_v20, %v6961_v39  ;;  %v6972_v34 = vadd.f32 %v7481_v20, %v6962_v16  ;;  %v6973_v24 = vadd.f32 %v7481_v20, %v6963_v19  ;;  %v6974_v40 = vadd.f32 %v7481_v20, %v6964_v7 }
0x12c0   :  { %v6975_v0 = vmax.f32 %v6971_v48, 0.0  ;;  %v6976_v36 = vmax.f32 %v6972_v34, 0.0  ;;  %v6977_v37 = vmax.f32 %v6973_v24, 0.0  ;;  %v6978_v22 = vmax.f32 %v6974_v40, 0.0 }
0x12c2   :  { %v6995_v32 = vpack.c.bf16 %v6976_v36, %v6975_v0  ;;  %v6996_v29 = vpack.c.bf16 %v6978_v22, %v6977_v37 }
0x12c4   :  { %8496 = vmatprep.mubr.bf16.mxu0 %v6995_v32 }
0x12c5   :  { %8497 = vmatmul.mubr.bf16.vlgmr.msra.gmra.mxu0 %v6996_v29 }
0x1385   :  { %v8498_v45 = vpop.f32.mrf.mxu0 }
0x1386   :  { %v7095_v43 = vadd.f32 %v8498_v45, %v7482_v35 }
0x1387   :  { %v7086_v50 = vpop.f32.mrf.mxu0 }
0x1388   :  { %v7493_v52 = vmul.f32 -1.442695, %v7095_v43  ;;  %v7087_v55 = vadd.f32 %v7482_v35, %v7086_v50  ;;  %v7128_v17 = vmax.f32 %v7095_v43, -5.0 }
0x1389   :  { %v8499_v57 = vpop.f32.mrf.mxu0 }
0x138a   :  { %8654 = vpow2.f32 %v7493_v52  ;;  %v7491_v59 = vmul.f32 -1.442695, %v7087_v55  ;;  %v7098_v41 = vadd.f32 %v8499_v57, %v7482_v35  ;;  %v7126_v9 = vmax.f32 %v7087_v55, -5.0 }
0x138b   :  { %v7089_v44 = vpop.f32.mrf.mxu0  ;;  %v7132_v12 = vmin.f32 %v7128_v17, 2.0 }
0x138c   :  { %8656 = vpow2.f32 %v7491_v59  ;;  %v7090_v62 = vadd.f32 %v7482_v35, %v7089_v44  ;;  %v7494_v11 = vmul.f32 -1.442695, %v7098_v41  ;;  %v7129_v61 = vmax.f32 %v7098_v41, -5.0 }
0x138d   :  { %v7130_v63 = vmin.f32 %v7126_v9, 2.0 }
0x138e   :  { %v7492_v47 = vmul.f32 -1.442695, %v7090_v62  ;;  %8658 = vpow2.f32 %v7494_v11  ;;  %v7127_v58 = vmax.f32 %v7090_v62, -5.0  ;;  %v7133_v1 = vmin.f32 %v7129_v61, 2.0 }
0x1390   :  { %8660 = vpow2.f32 %v7492_v47  ;;  %v7131_v21 = vmin.f32 %v7127_v58, 2.0 }
0x1397   :  { %v8655_v8 = vpop.eup %8654 }
0x1398   :  { %v7116_v49 = vadd.f32 1.0, %v8655_v8 }
0x1399   :  { %v8657_v51 = vpop.eup %8656 }
0x139a   :  { %8662 = vrcp.f32 %v7116_v49  ;;  %v7114_v33 = vadd.f32 1.0, %v8657_v51 }
0x139b   :  { %v8659_v56 = vpop.eup %8658 }
0x139c   :  { %8664 = vrcp.f32 %v7114_v33  ;;  %v7117_v54 = vadd.f32 1.0, %v8659_v56 }
0x139d   :  { %v8661_v38 = vpop.eup %8660 }
0x139e   :  { %v7115_v15 = vadd.f32 1.0, %v8661_v38  ;;  %8666 = vrcp.f32 %v7117_v54 }
0x13a0   :  { %8668 = vrcp.f32 %v7115_v15 }
0x13a7   :  { %v8663_v53 = vpop.eup %8662 }
0x13a8   :  { %v7136_v42 = vsel %vm7101_vm7, %v8663_v53, %v7132_v12 }
0x13a9   :  { %v8665_v10 = vpop.eup %8664  ;;  %7140 = vst [vmem:[%s10212_s10 + $0x10] sm:$0xff] %v7136_v42 }
0x13aa   :  { %v7134_v13 = vsel %vm7101_vm7, %v8665_v10, %v7130_v63 }
0x13ab   :  { %7138 = vst [vmem:[%s10212_s10] sm:$0xff] %v7134_v13  ;;  %v8667_v46 = vpop.eup %8666 }
0x13ac   :  { %v7137_v6 = vsel %vm7101_vm7, %v8667_v46, %v7133_v1 }
0x13ad   :  { %v8669_v31 = vpop.eup %8668  ;;  %7141 = vst [vmem:[%s10212_s10 + $0x18] sm:$0xff] %v7137_v6 }
0x13ae   :  { %v7135_v4 = vsel %vm7101_vm7, %v8669_v31, %v7131_v21 }
0x13af   :  { %7139 = vst [vmem:[%s10212_s10 + $0x8] sm:$0xff] %v7135_v4 }

</bundles_post_ra>
